<compile_context>
chip_gen: v6e
topology: v6e:2x2x1
jax: 0.10.0
libtpu: 0.0.40
codegen_flags: <defaults>
</compile_context>

<pallas_src>
import functools
import numpy as np
import jax
import jax.numpy as jnp
from jax.experimental import pallas as pl
from jax.experimental.pallas import tpu as pltpu


# ----------------------------- fused Pallas kernel -----------------------------

def _fused_kernel(x_ref, wf_ref, bf_ref, wtab_ref, btab_ref,
                  wfu_ref, bfu_ref, pfu_ref,
                  wq_ref, bq_ref, wk_ref, bk_ref, wv_ref, bv_ref,
                  wso_ref, bso_ref, lng_ref, lnb_ref,
                  w1_ref, b1_ref, w2_ref, b2_ref,
                  c1w_ref, c1b_ref, c2w_ref, c2b_ref,
                  o_ref, *, L, F, D, dq):
    FD = F * D
    f32 = jnp.float32

    def mm(a, b):
        # MXU matmul; cast the activation operand to the weight dtype (f32 or bf16).
        return jnp.dot(a.astype(b.dtype), b, preferred_element_type=f32)

    # ---- front 1x1 conv (+folded BN) + ReLU; forward / time-reversed branch packed
    # side by side along lanes (block-diagonally doubled weights => no cross-mixing) ----
    A = jnp.maximum(mm(x_ref[...], wf_ref[...]) + bf_ref[...], 0.0)          # [L, 2F]

    rowpos = jax.lax.broadcasted_iota(jnp.int32, (L, 1), 0)                  # time index
    scale = 1.0 / float(np.sqrt(D * dq))     # torch: / np.sqrt(d_model), d_model = D*dq

    x_flat = jnp.zeros((L, FD), f32)         # x_flatten residual   (cols d*F + f)
    score = jnp.zeros((L, FD), f32)          # score_flatten accum  (cols f*D + d)

    for li in range(D):
        d = 2 ** li
        # zero-padding masks for the dilated 'same' conv taps x[t-d] / x[t+d]
        m_dn = rowpos >= d
        m_up = rowpos < (L - d)

        def dconv(z, ci, li=li, d=d, m_dn=m_dn, m_up=m_up):
            base = (li * 2 + ci) * 3
            z_dn = jnp.where(m_dn, pltpu.roll(z, d, 0), 0.0)       # z[t-d] (XLU roll)
            z_up = jnp.where(m_up, pltpu.roll(z, L - d, 0), 0.0)   # z[t+d]
            acc = (mm(z_dn, wtab_ref[base + 0]) + mm(z, wtab_ref[base + 1])
                   + mm(z_up, wtab_ref[base + 2]) + btab_ref[li * 2 + ci])
            return jnp.maximum(acc, 0.0)                           # relu(BN(conv))

        # Temporal_Aware_Block: gate = sigmoid(relu(conv2(relu(conv1(z))))); out = z*gate
        h1 = dconv(A, 0)
        A = A * jax.nn.sigmoid(dconv(h1, 1))                       # [L, 2F]

        # fusion conv (2F -> F) on cat([fwd, bwd], dim=1) == the packed lane layout
        fused_d = mm(A, wfu_ref[...]) + bfu_ref[...]               # [L, F]
        x_flat = x_flat + mm(fused_d, pfu_ref[li])                 # place at cols li*F+f

        # ---- TIM_Attention ('MH'): one head per TAB layer ----
        q = mm(fused_d, wq_ref[...]) + bq_ref[...]                 # [L, dq]
        k = mm(fused_d, wk_ref[...]) + bk_ref[...]
        v = mm(fused_d, wv_ref[...]) + bv_ref[...]
        s = jax.lax.dot_general(q, k, (((1,), (1,)), ((), ())),
                                preferred_element_type=f32) * scale
        s = s - jnp.max(s, axis=-1, keepdims=True)
        p = jnp.exp(s)
        p = p / jnp.sum(p, axis=-1, keepdims=True)                 # exact softmax
        o = mm(p, v)                                               # [L, dq]
        score = score + mm(o, wso_ref[li])                         # place at cols f*D+li

    score = score + bso_ref[...]

    # ---- LayerNorm + FFN (same LayerNorm module applied twice, as in torch) ----
    g, be = lng_ref[...], lnb_ref[...]

    def ln(t):
        mu = jnp.mean(t, axis=-1, keepdims=True)
        var = jnp.mean(jnp.square(t - mu), axis=-1, keepdims=True)
        return (t - mu) * jax.lax.rsqrt(var + 1e-5) * g + be

    s1 = ln(score + x_flat)                                        # norm(score_fl + x_fl)
    h = jnp.maximum(mm(s1, w1_ref[...]) + b1_ref[...], 0.0)
    h2 = jnp.maximum(mm(h, w2_ref[...]) + b2_ref[...], 0.0)
    attn_out = ln(h2 + s1)                                         # norm(fc(s) + s)

    # ---- classifier: Linear(FD->1) -> Rearrange('N C L -> N (C L)') -> Linear(L->nc) ----
    c1 = jax.lax.dot_general(c1w_ref[...], attn_out.astype(c1w_ref.dtype),
                             (((1,), (1,)), ((), ())),
                             preferred_element_type=f32) + c1b_ref[...]      # [1, L]
    o_ref[0] = mm(c1, c2w_ref[...]) + c2b_ref[...]                 # [1, num_class]


# ----------------------------- host-side packing / wrapper -----------------------------

def _pack_params(p, cfg, matmul_dtype=jnp.float32):
    """Fold layout plumbing (branch doubling, placements) into the weights."""
    F, D, K = cfg.filters, cfg.dilation, cfg.kernel_size
    FD = F * D

    def wcast(a):
        return jnp.asarray(a, jnp.float32).astype(matmul_dtype)

    def f32(a):
        return jnp.asarray(a, jnp.float32)

    def dbl(w):   # block-diagonal doubling: same weights for forward / backward branch
        return jnp.kron(jnp.eye(2, dtype=jnp.float32), jnp.asarray(w, jnp.float32))

    pk = {}
    pk["wf"] = wcast(dbl(p["conv_w"]))                                      # [2Fin, 2F]
    pk["bf"] = f32(jnp.concatenate([p["conv_b"], p["conv_b"]]).reshape(1, -1))

    wt, bt = [], []
    for li in range(D):
        tp = p["tab"][li]
        for w3, b in ((tp["w1"], tp["b1"]), (tp["w2"], tp["b2"])):
            for t in range(K):
                wt.append(dbl(w3[t]))                                       # [2F, 2F]
            bt.append(jnp.concatenate([b, b]).reshape(1, 1, -1))            # [1, 1, 2F]
    pk["wtab"] = wcast(jnp.stack(wt))                                       # [D*2*K, 2F, 2F]
    pk["btab"] = f32(jnp.concatenate(bt, axis=0))                           # [D*2, 1, 2F]

    pk["wfu"] = wcast(p["fusion_w"])                                        # [2F, F]
    pk["bfu"] = f32(p["fusion_b"].reshape(1, -1))

    # x_flatten 'N C L H -> N L (H C)': layer d, filter f -> column d*F + f
    pfu = np.zeros((D, F, FD), np.float32)
    for d_ in range(D):
        pfu[d_, np.arange(F), d_ * F + np.arange(F)] = 1.0
    pk["pfu"] = wcast(pfu)                                                  # [D, F, FD]

    pk["wq"], pk["bq"] = wcast(p["wq_w"]), f32(p["wq_b"].reshape(1, -1))
    pk["wk"], pk["bk"] = wcast(p["wk_w"]), f32(p["wk_b"].reshape(1, -1))
    pk["wv"], pk["bv"] = wcast(p["wv_w"]), f32(p["wv_b"].reshape(1, -1))

    # score_flatten Conv2d(dq->F) + 'N H L C -> N L (H C)': head d, filter f -> col f*D+d
    place = np.zeros((D, F, FD), np.float32)
    for d_ in range(D):
        place[d_, np.arange(F), np.arange(F) * D + d_] = 1.0
    pk["wso"] = wcast(jnp.einsum("cf,dfm->dcm",
                                 jnp.asarray(p["so_w"], jnp.float32),
                                 jnp.asarray(place)))                       # [D, dq, FD]
    pk["bso"] = f32(jnp.repeat(p["so_b"], D).reshape(1, FD))

    pk["lng"] = f32(p["ln_g"].reshape(1, FD))
    pk["lnb"] = f32(p["ln_b"].reshape(1, FD))
    pk["w1"], pk["b1"] = wcast(p["fc1_w"]), f32(p["fc1_b"].reshape(1, -1))
    pk["w2"], pk["b2"] = wcast(p["fc2_w"]), f32(p["fc2_b"].reshape(1, -1))

    pk["c1w"] = wcast(p["cls1_w"].reshape(1, FD))                           # Linear(FD->1)^T
    pk["c1b"] = f32(p["cls1_b"].reshape(1, 1))
    pk["c2w"] = wcast(p["cls2_w"])                                          # [L, num_class]
    pk["c2b"] = f32(p["cls2_b"].reshape(1, -1))
    return pk


def at_tim_v2_forward(x, params, cfg, matmul_dtype=jnp.float32):
    """x: [N, feature_dim, seq_len]  (same convention as the torch module input).

    matmul_dtype=jnp.bfloat16 enables bf16 MXU operands (recommended on v6e/v7x);
    default f32 keeps exact parity with an f32 torch reference.
    """
    N, Fin, L = x.shape
    F, D, dq, K = cfg.filters, cfg.dilation, cfg.d_qkv, cfg.kernel_size
    assert K == 3 and L == cfg.seq_len
    assert 2 ** (D - 1) < L, "largest dilation must be smaller than seq_len"

    pk = _pack_params(params, cfg, matmul_dtype)

    # Forward & time-reversed branches side-by-side along channels: [N*L, 2*Fin]
    x_f = jnp.transpose(x, (0, 2, 1))
    x_b = jnp.transpose(jnp.flip(x, axis=-1), (0, 2, 1))
    xin = jnp.concatenate([x_f, x_b], axis=-1).reshape(N * L, 2 * Fin).astype(jnp.float32)

    weight_names = ["wf", "bf", "wtab", "btab", "wfu", "bfu", "pfu",
                    "wq", "bq", "wk", "bk", "wv", "bv", "wso", "bso",
                    "lng", "lnb", "w1", "b1", "w2", "b2",
                    "c1w", "c1b", "c2w", "c2b"]
    weights = [pk[nm] for nm in weight_names]

    # Weights: whole-array resident in VMEM (tiny, loaded once).  Activations: one
    # per-sample [L, 2*Fin] block per grid step; each step writes its own logits block.
    vmem = pl.BlockSpec(memory_space=pltpu.MemorySpace.VMEM)
    out = pl.pallas_call(
        functools.partial(_fused_kernel, L=L, F=F, D=D, dq=dq),
        grid=(N,),
        out_shape=jax.ShapeDtypeStruct((N, 1, cfg.num_class), jnp.float32),
        in_specs=[pl.BlockSpec((L, 2 * Fin), lambda n: (n, 0))] + [vmem] * len(weights),
        out_specs=pl.BlockSpec((1, 1, cfg.num_class), lambda n: (n, 0, 0)),
        compiler_params=pltpu.CompilerParams(
            dimension_semantics=("parallel",)),
    )(xin, *weights)
    return out.reshape(N, cfg.num_class)


# ----------------------------- config & (random) params -----------------------------

class Config:
    feature_dim = 4
    filters = 8
    seq_len = 16
    dilation = 4            # number of TAB layers == number of attention heads
    kernel_size = 3
    d_qkv = 8
    d_ff = 32
    num_class = 3
    drop_rate = 0.1         # inference: dropout = identity
    attention_type = "MH"   # Multi-head -> TIM_Attention


def init_params(cfg, key):
    ks = iter(jax.random.split(key, 128))

    def w(shape, s=0.1):
        return s * jax.random.normal(next(ks), shape, jnp.float32)

    eps = 1e-5

    def fold_bn(wt, b, gamma, beta, mean, var):
        scale = gamma / jnp.sqrt(var + eps)
        return wt * scale, (b - mean) * scale + beta

    F, Fin, D = cfg.filters, cfg.feature_dim, cfg.dilation
    FD = F * D
    p = {}

    # front conv: Conv1d(Fin->F, k=1) + BatchNorm1d(F) + ReLU  (BN running stats = init)
    cw, cb = w((Fin, F)), w((F,), 0.01)
    g, be = 1.0 + w((F,), 0.05), w((F,), 0.01)
    p["conv_w"], p["conv_b"] = fold_bn(cw, cb, g, be, jnp.zeros(F), jnp.ones(F))

    # Temporal_Aware_Blocks (dilations 1, 2, 4, 8)
    p["tab"] = []
    for _ in range(D):
        w1, b1 = w((cfg.kernel_size, F, F)), w((F,), 0.01)
        g1, be1 = 1.0 + w((F,), 0.05), w((F,), 0.01)
        w1, b1 = fold_bn(w1, b1, g1, be1, jnp.zeros(F), jnp.ones(F))
        w2, b2 = w((cfg.kernel_size, F, F)), w((F,), 0.01)
        g2, be2 = 1.0 + w((F,), 0.05), w((F,), 0.01)
        w2, b2 = fold_bn(w2, b2, g2, be2, jnp.zeros(F), jnp.ones(F))
        p["tab"].append(dict(w1=w1, b1=b1, w2=w2, b2=b2))

    # fusion: Conv1d(2F -> F, k=1)
    p["fusion_w"], p["fusion_b"] = w((2 * F, F)), w((F,), 0.01)

    # TIM_Attention ('MH')
    dq = cfg.d_qkv
    p["wq_w"], p["wq_b"] = w((F, dq)), w((dq,), 0.01)
    p["wk_w"], p["wk_b"] = w((F, dq)), w((dq,), 0.01)
    p["wv_w"], p["wv_b"] = w((F, dq)), w((dq,), 0.01)
    p["so_w"], p["so_b"] = w((dq, F)), w((F,), 0.01)      # score_flatten Conv2d(dq->F, 1x1)
    p["ln_g"], p["ln_b"] = 1.0 + w((FD,), 0.05), w((FD,), 0.01)
    p["fc1_w"], p["fc1_b"] = w((FD, cfg.d_ff)), w((cfg.d_ff,), 0.01)
    p["fc2_w"], p["fc2_b"] = w((cfg.d_ff, FD)), w((FD,), 0.01)

    # classifier: Linear(FD -> 1), Linear(seq_len -> num_class)
    p["cls1_w"], p["cls1_b"] = w((FD, 1)), w((1,), 0.01)
    p["cls2_w"], p["cls2_b"] = w((cfg.seq_len, cfg.num_class)), w((cfg.num_class,), 0.01)
    return p


if __name__ == "__main__":
    cfg = Config()
    key = jax.random.PRNGKey(0)
    pkey, xkey = jax.random.split(key)
    params = init_params(cfg, pkey)
    x = jax.random.normal(xkey, (2, cfg.feature_dim, cfg.seq_len), jnp.float32)

    fwd = jax.jit(lambda xx: at_tim_v2_forward(xx, params, cfg))
    out = jax.block_until_ready(fwd(x))

    assert out.shape == (2, cfg.num_class), out.shape
    assert bool(jnp.all(jnp.isfinite(out)))
    print("KERNEL_OK")
</pallas_src>

<mosaic_0001>
module attributes {stable_mosaic.version = 11 : i64} {
  func.func @_fused_kernel(%arg0: i32, %arg1: memref<16x8xf32, #tpu.memory_space<vmem>>, %arg2: memref<8x16xf32, #tpu.memory_space<vmem>>, %arg3: memref<1x16xf32, #tpu.memory_space<vmem>>, %arg4: memref<24x16x16xf32, #tpu.memory_space<vmem>>, %arg5: memref<8x1x16xf32, #tpu.memory_space<vmem>>, %arg6: memref<16x8xf32, #tpu.memory_space<vmem>>, %arg7: memref<1x8xf32, #tpu.memory_space<vmem>>, %arg8: memref<4x8x32xf32, #tpu.memory_space<vmem>>, %arg9: memref<8x8xf32, #tpu.memory_space<vmem>>, %arg10: memref<1x8xf32, #tpu.memory_space<vmem>>, %arg11: memref<8x8xf32, #tpu.memory_space<vmem>>, %arg12: memref<1x8xf32, #tpu.memory_space<vmem>>, %arg13: memref<8x8xf32, #tpu.memory_space<vmem>>, %arg14: memref<1x8xf32, #tpu.memory_space<vmem>>, %arg15: memref<4x8x32xf32, #tpu.memory_space<vmem>>, %arg16: memref<1x32xf32, #tpu.memory_space<vmem>>, %arg17: memref<1x32xf32, #tpu.memory_space<vmem>>, %arg18: memref<1x32xf32, #tpu.memory_space<vmem>>, %arg19: memref<32x32xf32, #tpu.memory_space<vmem>>, %arg20: memref<1x32xf32, #tpu.memory_space<vmem>>, %arg21: memref<32x32xf32, #tpu.memory_space<vmem>>, %arg22: memref<1x32xf32, #tpu.memory_space<vmem>>, %arg23: memref<1x32xf32, #tpu.memory_space<vmem>>, %arg24: memref<1x1xf32, #tpu.memory_space<vmem>>, %arg25: memref<16x3xf32, #tpu.memory_space<vmem>>, %arg26: memref<1x3xf32, #tpu.memory_space<vmem>>, %arg27: memref<1x1x3xf32, #tpu.memory_space<vmem>>) attributes {dimension_semantics = [#tpu.dimension_semantics<parallel>], iteration_bounds = array<i64: 2>, scalar_prefetch = 0 : i64, scratch_operands = 0 : i64, tpu.core_type = #tpu.core_type<tc>, window_params = [{transform_indices = @transform_0, window_bounds = array<i64: 16, 8>}, {pipeline_mode = #tpu.pipeline_mode<synchronous>, transform_indices = @transform_1, window_bounds = array<i64: 8, 16>}, {pipeline_mode = #tpu.pipeline_mode<synchronous>, transform_indices = @transform_2, window_bounds = array<i64: 1, 16>}, {pipeline_mode = #tpu.pipeline_mode<synchronous>, transform_indices = @transform_3, window_bounds = array<i64: 24, 16, 16>}, {pipeline_mode = #tpu.pipeline_mode<synchronous>, transform_indices = @transform_4, window_bounds = array<i64: 8, 1, 16>}, {pipeline_mode = #tpu.pipeline_mode<synchronous>, transform_indices = @transform_5, window_bounds = array<i64: 16, 8>}, {pipeline_mode = #tpu.pipeline_mode<synchronous>, transform_indices = @transform_6, window_bounds = array<i64: 1, 8>}, {pipeline_mode = #tpu.pipeline_mode<synchronous>, transform_indices = @transform_7, window_bounds = array<i64: 4, 8, 32>}, {pipeline_mode = #tpu.pipeline_mode<synchronous>, transform_indices = @transform_8, window_bounds = array<i64: 8, 8>}, {pipeline_mode = #tpu.pipeline_mode<synchronous>, transform_indices = @transform_9, window_bounds = array<i64: 1, 8>}, {pipeline_mode = #tpu.pipeline_mode<synchronous>, transform_indices = @transform_10, window_bounds = array<i64: 8, 8>}, {pipeline_mode = #tpu.pipeline_mode<synchronous>, transform_indices = @transform_11, window_bounds = array<i64: 1, 8>}, {pipeline_mode = #tpu.pipeline_mode<synchronous>, transform_indices = @transform_12, window_bounds = array<i64: 8, 8>}, {pipeline_mode = #tpu.pipeline_mode<synchronous>, transform_indices = @transform_13, window_bounds = array<i64: 1, 8>}, {pipeline_mode = #tpu.pipeline_mode<synchronous>, transform_indices = @transform_14, window_bounds = array<i64: 4, 8, 32>}, {pipeline_mode = #tpu.pipeline_mode<synchronous>, transform_indices = @transform_15, window_bounds = array<i64: 1, 32>}, {pipeline_mode = #tpu.pipeline_mode<synchronous>, transform_indices = @transform_16, window_bounds = array<i64: 1, 32>}, {pipeline_mode = #tpu.pipeline_mode<synchronous>, transform_indices = @transform_17, window_bounds = array<i64: 1, 32>}, {pipeline_mode = #tpu.pipeline_mode<synchronous>, transform_indices = @transform_18, window_bounds = array<i64: 32, 32>}, {pipeline_mode = #tpu.pipeline_mode<synchronous>, transform_indices = @transform_19, window_bounds = array<i64: 1, 32>}, {pipeline_mode = #tpu.pipeline_mode<synchronous>, transform_indices = @transform_20, window_bounds = array<i64: 32, 32>}, {pipeline_mode = #tpu.pipeline_mode<synchronous>, transform_indices = @transform_21, window_bounds = array<i64: 1, 32>}, {pipeline_mode = #tpu.pipeline_mode<synchronous>, transform_indices = @transform_22, window_bounds = array<i64: 1, 32>}, {pipeline_mode = #tpu.pipeline_mode<synchronous>, transform_indices = @transform_23, window_bounds = array<i64: 1, 1>}, {pipeline_mode = #tpu.pipeline_mode<synchronous>, transform_indices = @transform_24, window_bounds = array<i64: 16, 3>}, {pipeline_mode = #tpu.pipeline_mode<synchronous>, transform_indices = @transform_25, window_bounds = array<i64: 1, 3>}, {transform_indices = @transform_26, window_bounds = array<i64: 1, 1, 3>}]} {
    %c0 = arith.constant 0 : index
    %c0_0 = arith.constant 0 : index
    %0 = vector.load %arg1[%c0, %c0_0] : memref<16x8xf32, #tpu.memory_space<vmem>>, vector<16x8xf32>
    %c0_1 = arith.constant 0 : index
    %c0_2 = arith.constant 0 : index
    %1 = vector.load %arg2[%c0_1, %c0_2] : memref<8x16xf32, #tpu.memory_space<vmem>>, vector<8x16xf32>
    %cst = arith.constant dense<0.000000e+00> : vector<16x16xf32>
    %2 = tpu.matmul %0, %1, %cst {dimension_numbers = #tpu.dot_dimension_numbers<[1], [0], [0], [1], [0, 0, 1, 1], [], []>} : vector<16x8xf32>, vector<8x16xf32>, vector<16x16xf32> -> vector<16x16xf32>
    %c0_3 = arith.constant 0 : index
    %c0_4 = arith.constant 0 : index
    %3 = vector.load %arg3[%c0_3, %c0_4] : memref<1x16xf32, #tpu.memory_space<vmem>>, vector<1x16xf32>
    %4 = vector.broadcast %3 : vector<1x16xf32> to vector<16x16xf32>
    %5 = arith.addf %2, %4 : vector<16x16xf32>
    %cst_5 = arith.constant 0.000000e+00 : f32
    %6 = vector.broadcast %cst_5 : f32 to vector<16x16xf32>
    %7 = arith.maximumf %5, %6 : vector<16x16xf32>
    %8 = tpu.iota {dimensions = array<i32: 0>} : vector<16x1xi32>
    %cst_6 = arith.constant 0.000000e+00 : f32
    %9 = vector.broadcast %cst_6 : f32 to vector<16x32xf32>
    %cst_7 = arith.constant 0.000000e+00 : f32
    %10 = vector.broadcast %cst_7 : f32 to vector<16x32xf32>
    %c1_i32 = arith.constant 1 : i32
    %11 = vector.broadcast %c1_i32 : i32 to vector<16x1xi32>
    %12 = arith.cmpi sge, %8, %11 : vector<16x1xi32>
    %c15_i32 = arith.constant 15 : i32
    %13 = vector.broadcast %c15_i32 : i32 to vector<16x1xi32>
    %14 = arith.cmpi slt, %8, %13 : vector<16x1xi32>
    %c1_i32_8 = arith.constant 1 : i32
    %15 = tpu.dynamic_rotate %7 by %c1_i32_8 dim 0 : vector<16x16xf32>, i32 -> vector<16x16xf32>
    %cst_9 = arith.constant 0.000000e+00 : f32
    %16 = vector.shape_cast %12 : vector<16x1xi1> to vector<16x1xi1>
    %17 = vector.broadcast %16 : vector<16x1xi1> to vector<16x16xi1>
    %18 = vector.broadcast %cst_9 : f32 to vector<16x16xf32>
    %19 = arith.select %17, %15, %18 : vector<16x16xi1>, vector<16x16xf32>
    %c15_i32_10 = arith.constant 15 : i32
    %20 = tpu.dynamic_rotate %7 by %c15_i32_10 dim 0 : vector<16x16xf32>, i32 -> vector<16x16xf32>
    %cst_11 = arith.constant 0.000000e+00 : f32
    %21 = vector.shape_cast %14 : vector<16x1xi1> to vector<16x1xi1>
    %22 = vector.broadcast %21 : vector<16x1xi1> to vector<16x16xi1>
    %23 = vector.broadcast %cst_11 : f32 to vector<16x16xf32>
    %24 = arith.select %22, %20, %23 : vector<16x16xi1>, vector<16x16xf32>
    %c0_12 = arith.constant 0 : index
    %c0_13 = arith.constant 0 : index
    %c0_14 = arith.constant 0 : index
    %25 = vector.load %arg4[%c0_12, %c0_13, %c0_14] : memref<24x16x16xf32, #tpu.memory_space<vmem>>, vector<1x16x16xf32>
    %26 = vector.shape_cast %25 : vector<1x16x16xf32> to vector<16x16xf32>
    %cst_15 = arith.constant dense<0.000000e+00> : vector<16x16xf32>
    %27 = tpu.matmul %19, %26, %cst_15 {dimension_numbers = #tpu.dot_dimension_numbers<[1], [0], [0], [1], [0, 0, 1, 1], [], []>} : vector<16x16xf32>, vector<16x16xf32>, vector<16x16xf32> -> vector<16x16xf32>
    %c1 = arith.constant 1 : index
    %c0_16 = arith.constant 0 : index
    %c0_17 = arith.constant 0 : index
    %28 = vector.load %arg4[%c1, %c0_16, %c0_17] : memref<24x16x16xf32, #tpu.memory_space<vmem>>, vector<1x16x16xf32>
    %29 = vector.shape_cast %28 : vector<1x16x16xf32> to vector<16x16xf32>
    %cst_18 = arith.constant dense<0.000000e+00> : vector<16x16xf32>
    %30 = tpu.matmul %7, %29, %cst_18 {dimension_numbers = #tpu.dot_dimension_numbers<[1], [0], [0], [1], [0, 0, 1, 1], [], []>} : vector<16x16xf32>, vector<16x16xf32>, vector<16x16xf32> -> vector<16x16xf32>
    %31 = arith.addf %27, %30 : vector<16x16xf32>
    %c2 = arith.constant 2 : index
    %c0_19 = arith.constant 0 : index
    %c0_20 = arith.constant 0 : index
    %32 = vector.load %arg4[%c2, %c0_19, %c0_20] : memref<24x16x16xf32, #tpu.memory_space<vmem>>, vector<1x16x16xf32>
    %33 = vector.shape_cast %32 : vector<1x16x16xf32> to vector<16x16xf32>
    %cst_21 = arith.constant dense<0.000000e+00> : vector<16x16xf32>
    %34 = tpu.matmul %24, %33, %cst_21 {dimension_numbers = #tpu.dot_dimension_numbers<[1], [0], [0], [1], [0, 0, 1, 1], [], []>} : vector<16x16xf32>, vector<16x16xf32>, vector<16x16xf32> -> vector<16x16xf32>
    %35 = arith.addf %31, %34 : vector<16x16xf32>
    %c0_22 = arith.constant 0 : index
    %c0_23 = arith.constant 0 : index
    %c0_24 = arith.constant 0 : index
    %36 = vector.load %arg5[%c0_22, %c0_23, %c0_24] : memref<8x1x16xf32, #tpu.memory_space<vmem>>, vector<1x1x16xf32>
    %37 = vector.shape_cast %36 : vector<1x1x16xf32> to vector<1x16xf32>
    %38 = vector.broadcast %37 : vector<1x16xf32> to vector<16x16xf32>
    %39 = arith.addf %35, %38 : vector<16x16xf32>
    %cst_25 = arith.constant 0.000000e+00 : f32
    %40 = vector.broadcast %cst_25 : f32 to vector<16x16xf32>
    %41 = arith.maximumf %39, %40 : vector<16x16xf32>
    %c1_i32_26 = arith.constant 1 : i32
    %42 = tpu.dynamic_rotate %41 by %c1_i32_26 dim 0 : vector<16x16xf32>, i32 -> vector<16x16xf32>
    %cst_27 = arith.constant 0.000000e+00 : f32
    %43 = vector.shape_cast %12 : vector<16x1xi1> to vector<16x1xi1>
    %44 = vector.broadcast %43 : vector<16x1xi1> to vector<16x16xi1>
    %45 = vector.broadcast %cst_27 : f32 to vector<16x16xf32>
    %46 = arith.select %44, %42, %45 : vector<16x16xi1>, vector<16x16xf32>
    %c15_i32_28 = arith.constant 15 : i32
    %47 = tpu.dynamic_rotate %41 by %c15_i32_28 dim 0 : vector<16x16xf32>, i32 -> vector<16x16xf32>
    %cst_29 = arith.constant 0.000000e+00 : f32
    %48 = vector.shape_cast %14 : vector<16x1xi1> to vector<16x1xi1>
    %49 = vector.broadcast %48 : vector<16x1xi1> to vector<16x16xi1>
    %50 = vector.broadcast %cst_29 : f32 to vector<16x16xf32>
    %51 = arith.select %49, %47, %50 : vector<16x16xi1>, vector<16x16xf32>
    %c3 = arith.constant 3 : index
    %c0_30 = arith.constant 0 : index
    %c0_31 = arith.constant 0 : index
    %52 = vector.load %arg4[%c3, %c0_30, %c0_31] : memref<24x16x16xf32, #tpu.memory_space<vmem>>, vector<1x16x16xf32>
    %53 = vector.shape_cast %52 : vector<1x16x16xf32> to vector<16x16xf32>
    %cst_32 = arith.constant dense<0.000000e+00> : vector<16x16xf32>
    %54 = tpu.matmul %46, %53, %cst_32 {dimension_numbers = #tpu.dot_dimension_numbers<[1], [0], [0], [1], [0, 0, 1, 1], [], []>} : vector<16x16xf32>, vector<16x16xf32>, vector<16x16xf32> -> vector<16x16xf32>
    %c4 = arith.constant 4 : index
    %c0_33 = arith.constant 0 : index
    %c0_34 = arith.constant 0 : index
    %55 = vector.load %arg4[%c4, %c0_33, %c0_34] : memref<24x16x16xf32, #tpu.memory_space<vmem>>, vector<1x16x16xf32>
    %56 = vector.shape_cast %55 : vector<1x16x16xf32> to vector<16x16xf32>
    %cst_35 = arith.constant dense<0.000000e+00> : vector<16x16xf32>
    %57 = tpu.matmul %41, %56, %cst_35 {dimension_numbers = #tpu.dot_dimension_numbers<[1], [0], [0], [1], [0, 0, 1, 1], [], []>} : vector<16x16xf32>, vector<16x16xf32>, vector<16x16xf32> -> vector<16x16xf32>
    %58 = arith.addf %54, %57 : vector<16x16xf32>
    %c5 = arith.constant 5 : index
    %c0_36 = arith.constant 0 : index
    %c0_37 = arith.constant 0 : index
    %59 = vector.load %arg4[%c5, %c0_36, %c0_37] : memref<24x16x16xf32, #tpu.memory_space<vmem>>, vector<1x16x16xf32>
    %60 = vector.shape_cast %59 : vector<1x16x16xf32> to vector<16x16xf32>
    %cst_38 = arith.constant dense<0.000000e+00> : vector<16x16xf32>
    %61 = tpu.matmul %51, %60, %cst_38 {dimension_numbers = #tpu.dot_dimension_numbers<[1], [0], [0], [1], [0, 0, 1, 1], [], []>} : vector<16x16xf32>, vector<16x16xf32>, vector<16x16xf32> -> vector<16x16xf32>
    %62 = arith.addf %58, %61 : vector<16x16xf32>
    %c1_39 = arith.constant 1 : index
    %c0_40 = arith.constant 0 : index
    %c0_41 = arith.constant 0 : index
    %63 = vector.load %arg5[%c1_39, %c0_40, %c0_41] : memref<8x1x16xf32, #tpu.memory_space<vmem>>, vector<1x1x16xf32>
    %64 = vector.shape_cast %63 : vector<1x1x16xf32> to vector<1x16xf32>
    %65 = vector.broadcast %64 : vector<1x16xf32> to vector<16x16xf32>
    %66 = arith.addf %62, %65 : vector<16x16xf32>
    %cst_42 = arith.constant 0.000000e+00 : f32
    %67 = vector.broadcast %cst_42 : f32 to vector<16x16xf32>
    %68 = arith.maximumf %66, %67 : vector<16x16xf32>
    %69 = arith.negf %68 : vector<16x16xf32>
    %70 = math.exp %69 : vector<16x16xf32>
    %cst_43 = arith.constant 1.000000e+00 : f32
    %71 = vector.broadcast %cst_43 : f32 to vector<16x16xf32>
    %72 = arith.addf %71, %70 : vector<16x16xf32>
    %73 = arith.divf %71, %72 : vector<16x16xf32>
    %74 = arith.mulf %7, %73 : vector<16x16xf32>
    %c0_44 = arith.constant 0 : index
    %c0_45 = arith.constant 0 : index
    %75 = vector.load %arg6[%c0_44, %c0_45] : memref<16x8xf32, #tpu.memory_space<vmem>>, vector<16x8xf32>
    %cst_46 = arith.constant dense<0.000000e+00> : vector<16x8xf32>
    %76 = tpu.matmul %74, %75, %cst_46 {dimension_numbers = #tpu.dot_dimension_numbers<[1], [0], [0], [1], [0, 0, 1, 1], [], []>} : vector<16x16xf32>, vector<16x8xf32>, vector<16x8xf32> -> vector<16x8xf32>
    %c0_47 = arith.constant 0 : index
    %c0_48 = arith.constant 0 : index
    %77 = vector.load %arg7[%c0_47, %c0_48] : memref<1x8xf32, #tpu.memory_space<vmem>>, vector<1x8xf32>
    %78 = vector.broadcast %77 : vector<1x8xf32> to vector<16x8xf32>
    %79 = arith.addf %76, %78 : vector<16x8xf32>
    %c0_49 = arith.constant 0 : index
    %c0_50 = arith.constant 0 : index
    %c0_51 = arith.constant 0 : index
    %80 = vector.load %arg8[%c0_49, %c0_50, %c0_51] : memref<4x8x32xf32, #tpu.memory_space<vmem>>, vector<1x8x32xf32>
    %81 = vector.shape_cast %80 : vector<1x8x32xf32> to vector<8x32xf32>
    %cst_52 = arith.constant dense<0.000000e+00> : vector<16x32xf32>
    %82 = tpu.matmul %79, %81, %cst_52 {dimension_numbers = #tpu.dot_dimension_numbers<[1], [0], [0], [1], [0, 0, 1, 1], [], []>} : vector<16x8xf32>, vector<8x32xf32>, vector<16x32xf32> -> vector<16x32xf32>
    %83 = arith.addf %9, %82 : vector<16x32xf32>
    %c0_53 = arith.constant 0 : index
    %c0_54 = arith.constant 0 : index
    %84 = vector.load %arg9[%c0_53, %c0_54] : memref<8x8xf32, #tpu.memory_space<vmem>>, vector<8x8xf32>
    %cst_55 = arith.constant dense<0.000000e+00> : vector<16x8xf32>
    %85 = tpu.matmul %79, %84, %cst_55 {dimension_numbers = #tpu.dot_dimension_numbers<[1], [0], [0], [1], [0, 0, 1, 1], [], []>} : vector<16x8xf32>, vector<8x8xf32>, vector<16x8xf32> -> vector<16x8xf32>
    %c0_56 = arith.constant 0 : index
    %c0_57 = arith.constant 0 : index
    %86 = vector.load %arg10[%c0_56, %c0_57] : memref<1x8xf32, #tpu.memory_space<vmem>>, vector<1x8xf32>
    %87 = vector.broadcast %86 : vector<1x8xf32> to vector<16x8xf32>
    %88 = arith.addf %85, %87 : vector<16x8xf32>
    %c0_58 = arith.constant 0 : index
    %c0_59 = arith.constant 0 : index
    %89 = vector.load %arg11[%c0_58, %c0_59] : memref<8x8xf32, #tpu.memory_space<vmem>>, vector<8x8xf32>
    %cst_60 = arith.constant dense<0.000000e+00> : vector<16x8xf32>
    %90 = tpu.matmul %79, %89, %cst_60 {dimension_numbers = #tpu.dot_dimension_numbers<[1], [0], [0], [1], [0, 0, 1, 1], [], []>} : vector<16x8xf32>, vector<8x8xf32>, vector<16x8xf32> -> vector<16x8xf32>
    %c0_61 = arith.constant 0 : index
    %c0_62 = arith.constant 0 : index
    %91 = vector.load %arg12[%c0_61, %c0_62] : memref<1x8xf32, #tpu.memory_space<vmem>>, vector<1x8xf32>
    %92 = vector.broadcast %91 : vector<1x8xf32> to vector<16x8xf32>
    %93 = arith.addf %90, %92 : vector<16x8xf32>
    %c0_63 = arith.constant 0 : index
    %c0_64 = arith.constant 0 : index
    %94 = vector.load %arg13[%c0_63, %c0_64] : memref<8x8xf32, #tpu.memory_space<vmem>>, vector<8x8xf32>
    %cst_65 = arith.constant dense<0.000000e+00> : vector<16x8xf32>
    %95 = tpu.matmul %79, %94, %cst_65 {dimension_numbers = #tpu.dot_dimension_numbers<[1], [0], [0], [1], [0, 0, 1, 1], [], []>} : vector<16x8xf32>, vector<8x8xf32>, vector<16x8xf32> -> vector<16x8xf32>
    %c0_66 = arith.constant 0 : index
    %c0_67 = arith.constant 0 : index
    %96 = vector.load %arg14[%c0_66, %c0_67] : memref<1x8xf32, #tpu.memory_space<vmem>>, vector<1x8xf32>
    %97 = vector.broadcast %96 : vector<1x8xf32> to vector<16x8xf32>
    %98 = arith.addf %95, %97 : vector<16x8xf32>
    %cst_68 = arith.constant dense<0.000000e+00> : vector<16x16xf32>
    %99 = tpu.matmul %88, %93, %cst_68 {dimension_numbers = #tpu.dot_dimension_numbers<[1], [1], [0], [0], [0, 0, 1, 0], [], []>} : vector<16x8xf32>, vector<16x8xf32>, vector<16x16xf32> -> vector<16x16xf32>
    %cst_69 = arith.constant 0.176776692 : f32
    %100 = vector.broadcast %cst_69 : f32 to vector<16x16xf32>
    %101 = arith.mulf %99, %100 : vector<16x16xf32>
    %cst_70 = arith.constant dense<0xFF800000> : vector<16xf32>
    %102 = vector.multi_reduction <maximumf>, %101, %cst_70 [1] : vector<16x16xf32> to vector<16xf32>
    %103 = vector.shape_cast %102 : vector<16xf32> to vector<16x1xf32>
    %104 = vector.broadcast %103 : vector<16x1xf32> to vector<16x16xf32>
    %105 = arith.subf %101, %104 : vector<16x16xf32>
    %106 = math.exp %105 : vector<16x16xf32>
    %cst_71 = arith.constant dense<0.000000e+00> : vector<16xf32>
    %107 = vector.multi_reduction <add>, %106, %cst_71 [1] : vector<16x16xf32> to vector<16xf32>
    %108 = vector.shape_cast %107 : vector<16xf32> to vector<16x1xf32>
    %109 = vector.broadcast %108 : vector<16x1xf32> to vector<16x16xf32>
    %110 = arith.divf %106, %109 : vector<16x16xf32>
    %cst_72 = arith.constant dense<0.000000e+00> : vector<16x8xf32>
    %111 = tpu.matmul %110, %98, %cst_72 {dimension_numbers = #tpu.dot_dimension_numbers<[1], [0], [0], [1], [0, 0, 1, 1], [], []>} : vector<16x16xf32>, vector<16x8xf32>, vector<16x8xf32> -> vector<16x8xf32>
    %c0_73 = arith.constant 0 : index
    %c0_74 = arith.constant 0 : index
    %c0_75 = arith.constant 0 : index
    %112 = vector.load %arg15[%c0_73, %c0_74, %c0_75] : memref<4x8x32xf32, #tpu.memory_space<vmem>>, vector<1x8x32xf32>
    %113 = vector.shape_cast %112 : vector<1x8x32xf32> to vector<8x32xf32>
    %cst_76 = arith.constant dense<0.000000e+00> : vector<16x32xf32>
    %114 = tpu.matmul %111, %113, %cst_76 {dimension_numbers = #tpu.dot_dimension_numbers<[1], [0], [0], [1], [0, 0, 1, 1], [], []>} : vector<16x8xf32>, vector<8x32xf32>, vector<16x32xf32> -> vector<16x32xf32>
    %115 = arith.addf %10, %114 : vector<16x32xf32>
    %c2_i32 = arith.constant 2 : i32
    %116 = vector.broadcast %c2_i32 : i32 to vector<16x1xi32>
    %117 = arith.cmpi sge, %8, %116 : vector<16x1xi32>
    %c14_i32 = arith.constant 14 : i32
    %118 = vector.broadcast %c14_i32 : i32 to vector<16x1xi32>
    %119 = arith.cmpi slt, %8, %118 : vector<16x1xi32>
    %c2_i32_77 = arith.constant 2 : i32
    %120 = tpu.dynamic_rotate %74 by %c2_i32_77 dim 0 : vector<16x16xf32>, i32 -> vector<16x16xf32>
    %cst_78 = arith.constant 0.000000e+00 : f32
    %121 = vector.shape_cast %117 : vector<16x1xi1> to vector<16x1xi1>
    %122 = vector.broadcast %121 : vector<16x1xi1> to vector<16x16xi1>
    %123 = vector.broadcast %cst_78 : f32 to vector<16x16xf32>
    %124 = arith.select %122, %120, %123 : vector<16x16xi1>, vector<16x16xf32>
    %c14_i32_79 = arith.constant 14 : i32
    %125 = tpu.dynamic_rotate %74 by %c14_i32_79 dim 0 : vector<16x16xf32>, i32 -> vector<16x16xf32>
    %cst_80 = arith.constant 0.000000e+00 : f32
    %126 = vector.shape_cast %119 : vector<16x1xi1> to vector<16x1xi1>
    %127 = vector.broadcast %126 : vector<16x1xi1> to vector<16x16xi1>
    %128 = vector.broadcast %cst_80 : f32 to vector<16x16xf32>
    %129 = arith.select %127, %125, %128 : vector<16x16xi1>, vector<16x16xf32>
    %c6 = arith.constant 6 : index
    %c0_81 = arith.constant 0 : index
    %c0_82 = arith.constant 0 : index
    %130 = vector.load %arg4[%c6, %c0_81, %c0_82] : memref<24x16x16xf32, #tpu.memory_space<vmem>>, vector<1x16x16xf32>
    %131 = vector.shape_cast %130 : vector<1x16x16xf32> to vector<16x16xf32>
    %cst_83 = arith.constant dense<0.000000e+00> : vector<16x16xf32>
    %132 = tpu.matmul %124, %131, %cst_83 {dimension_numbers = #tpu.dot_dimension_numbers<[1], [0], [0], [1], [0, 0, 1, 1], [], []>} : vector<16x16xf32>, vector<16x16xf32>, vector<16x16xf32> -> vector<16x16xf32>
    %c7 = arith.constant 7 : index
    %c0_84 = arith.constant 0 : index
    %c0_85 = arith.constant 0 : index
    %133 = vector.load %arg4[%c7, %c0_84, %c0_85] : memref<24x16x16xf32, #tpu.memory_space<vmem>>, vector<1x16x16xf32>
    %134 = vector.shape_cast %133 : vector<1x16x16xf32> to vector<16x16xf32>
    %cst_86 = arith.constant dense<0.000000e+00> : vector<16x16xf32>
    %135 = tpu.matmul %74, %134, %cst_86 {dimension_numbers = #tpu.dot_dimension_numbers<[1], [0], [0], [1], [0, 0, 1, 1], [], []>} : vector<16x16xf32>, vector<16x16xf32>, vector<16x16xf32> -> vector<16x16xf32>
    %136 = arith.addf %132, %135 : vector<16x16xf32>
    %c8 = arith.constant 8 : index
    %c0_87 = arith.constant 0 : index
    %c0_88 = arith.constant 0 : index
    %137 = vector.load %arg4[%c8, %c0_87, %c0_88] : memref<24x16x16xf32, #tpu.memory_space<vmem>>, vector<1x16x16xf32>
    %138 = vector.shape_cast %137 : vector<1x16x16xf32> to vector<16x16xf32>
    %cst_89 = arith.constant dense<0.000000e+00> : vector<16x16xf32>
    %139 = tpu.matmul %129, %138, %cst_89 {dimension_numbers = #tpu.dot_dimension_numbers<[1], [0], [0], [1], [0, 0, 1, 1], [], []>} : vector<16x16xf32>, vector<16x16xf32>, vector<16x16xf32> -> vector<16x16xf32>
    %140 = arith.addf %136, %139 : vector<16x16xf32>
    %c2_90 = arith.constant 2 : index
    %c0_91 = arith.constant 0 : index
    %c0_92 = arith.constant 0 : index
    %141 = vector.load %arg5[%c2_90, %c0_91, %c0_92] : memref<8x1x16xf32, #tpu.memory_space<vmem>>, vector<1x1x16xf32>
    %142 = vector.shape_cast %141 : vector<1x1x16xf32> to vector<1x16xf32>
    %143 = vector.broadcast %142 : vector<1x16xf32> to vector<16x16xf32>
    %144 = arith.addf %140, %143 : vector<16x16xf32>
    %cst_93 = arith.constant 0.000000e+00 : f32
    %145 = vector.broadcast %cst_93 : f32 to vector<16x16xf32>
    %146 = arith.maximumf %144, %145 : vector<16x16xf32>
    %c2_i32_94 = arith.constant 2 : i32
    %147 = tpu.dynamic_rotate %146 by %c2_i32_94 dim 0 : vector<16x16xf32>, i32 -> vector<16x16xf32>
    %cst_95 = arith.constant 0.000000e+00 : f32
    %148 = vector.shape_cast %117 : vector<16x1xi1> to vector<16x1xi1>
    %149 = vector.broadcast %148 : vector<16x1xi1> to vector<16x16xi1>
    %150 = vector.broadcast %cst_95 : f32 to vector<16x16xf32>
    %151 = arith.select %149, %147, %150 : vector<16x16xi1>, vector<16x16xf32>
    %c14_i32_96 = arith.constant 14 : i32
    %152 = tpu.dynamic_rotate %146 by %c14_i32_96 dim 0 : vector<16x16xf32>, i32 -> vector<16x16xf32>
    %cst_97 = arith.constant 0.000000e+00 : f32
    %153 = vector.shape_cast %119 : vector<16x1xi1> to vector<16x1xi1>
    %154 = vector.broadcast %153 : vector<16x1xi1> to vector<16x16xi1>
    %155 = vector.broadcast %cst_97 : f32 to vector<16x16xf32>
    %156 = arith.select %154, %152, %155 : vector<16x16xi1>, vector<16x16xf32>
    %c9 = arith.constant 9 : index
    %c0_98 = arith.constant 0 : index
    %c0_99 = arith.constant 0 : index
    %157 = vector.load %arg4[%c9, %c0_98, %c0_99] : memref<24x16x16xf32, #tpu.memory_space<vmem>>, vector<1x16x16xf32>
    %158 = vector.shape_cast %157 : vector<1x16x16xf32> to vector<16x16xf32>
    %cst_100 = arith.constant dense<0.000000e+00> : vector<16x16xf32>
    %159 = tpu.matmul %151, %158, %cst_100 {dimension_numbers = #tpu.dot_dimension_numbers<[1], [0], [0], [1], [0, 0, 1, 1], [], []>} : vector<16x16xf32>, vector<16x16xf32>, vector<16x16xf32> -> vector<16x16xf32>
    %c10 = arith.constant 10 : index
    %c0_101 = arith.constant 0 : index
    %c0_102 = arith.constant 0 : index
    %160 = vector.load %arg4[%c10, %c0_101, %c0_102] : memref<24x16x16xf32, #tpu.memory_space<vmem>>, vector<1x16x16xf32>
    %161 = vector.shape_cast %160 : vector<1x16x16xf32> to vector<16x16xf32>
    %cst_103 = arith.constant dense<0.000000e+00> : vector<16x16xf32>
    %162 = tpu.matmul %146, %161, %cst_103 {dimension_numbers = #tpu.dot_dimension_numbers<[1], [0], [0], [1], [0, 0, 1, 1], [], []>} : vector<16x16xf32>, vector<16x16xf32>, vector<16x16xf32> -> vector<16x16xf32>
    %163 = arith.addf %159, %162 : vector<16x16xf32>
    %c11 = arith.constant 11 : index
    %c0_104 = arith.constant 0 : index
    %c0_105 = arith.constant 0 : index
    %164 = vector.load %arg4[%c11, %c0_104, %c0_105] : memref<24x16x16xf32, #tpu.memory_space<vmem>>, vector<1x16x16xf32>
    %165 = vector.shape_cast %164 : vector<1x16x16xf32> to vector<16x16xf32>
    %cst_106 = arith.constant dense<0.000000e+00> : vector<16x16xf32>
    %166 = tpu.matmul %156, %165, %cst_106 {dimension_numbers = #tpu.dot_dimension_numbers<[1], [0], [0], [1], [0, 0, 1, 1], [], []>} : vector<16x16xf32>, vector<16x16xf32>, vector<16x16xf32> -> vector<16x16xf32>
    %167 = arith.addf %163, %166 : vector<16x16xf32>
    %c3_107 = arith.constant 3 : index
    %c0_108 = arith.constant 0 : index
    %c0_109 = arith.constant 0 : index
    %168 = vector.load %arg5[%c3_107, %c0_108, %c0_109] : memref<8x1x16xf32, #tpu.memory_space<vmem>>, vector<1x1x16xf32>
    %169 = vector.shape_cast %168 : vector<1x1x16xf32> to vector<1x16xf32>
    %170 = vector.broadcast %169 : vector<1x16xf32> to vector<16x16xf32>
    %171 = arith.addf %167, %170 : vector<16x16xf32>
    %cst_110 = arith.constant 0.000000e+00 : f32
    %172 = vector.broadcast %cst_110 : f32 to vector<16x16xf32>
    %173 = arith.maximumf %171, %172 : vector<16x16xf32>
    %174 = arith.negf %173 : vector<16x16xf32>
    %175 = math.exp %174 : vector<16x16xf32>
    %cst_111 = arith.constant 1.000000e+00 : f32
    %176 = vector.broadcast %cst_111 : f32 to vector<16x16xf32>
    %177 = arith.addf %176, %175 : vector<16x16xf32>
    %178 = arith.divf %176, %177 : vector<16x16xf32>
    %179 = arith.mulf %74, %178 : vector<16x16xf32>
    %c0_112 = arith.constant 0 : index
    %c0_113 = arith.constant 0 : index
    %180 = vector.load %arg6[%c0_112, %c0_113] : memref<16x8xf32, #tpu.memory_space<vmem>>, vector<16x8xf32>
    %cst_114 = arith.constant dense<0.000000e+00> : vector<16x8xf32>
    %181 = tpu.matmul %179, %180, %cst_114 {dimension_numbers = #tpu.dot_dimension_numbers<[1], [0], [0], [1], [0, 0, 1, 1], [], []>} : vector<16x16xf32>, vector<16x8xf32>, vector<16x8xf32> -> vector<16x8xf32>
    %c0_115 = arith.constant 0 : index
    %c0_116 = arith.constant 0 : index
    %182 = vector.load %arg7[%c0_115, %c0_116] : memref<1x8xf32, #tpu.memory_space<vmem>>, vector<1x8xf32>
    %183 = vector.broadcast %182 : vector<1x8xf32> to vector<16x8xf32>
    %184 = arith.addf %181, %183 : vector<16x8xf32>
    %c1_117 = arith.constant 1 : index
    %c0_118 = arith.constant 0 : index
    %c0_119 = arith.constant 0 : index
    %185 = vector.load %arg8[%c1_117, %c0_118, %c0_119] : memref<4x8x32xf32, #tpu.memory_space<vmem>>, vector<1x8x32xf32>
    %186 = vector.shape_cast %185 : vector<1x8x32xf32> to vector<8x32xf32>
    %cst_120 = arith.constant dense<0.000000e+00> : vector<16x32xf32>
    %187 = tpu.matmul %184, %186, %cst_120 {dimension_numbers = #tpu.dot_dimension_numbers<[1], [0], [0], [1], [0, 0, 1, 1], [], []>} : vector<16x8xf32>, vector<8x32xf32>, vector<16x32xf32> -> vector<16x32xf32>
    %188 = arith.addf %83, %187 : vector<16x32xf32>
    %c0_121 = arith.constant 0 : index
    %c0_122 = arith.constant 0 : index
    %189 = vector.load %arg9[%c0_121, %c0_122] : memref<8x8xf32, #tpu.memory_space<vmem>>, vector<8x8xf32>
    %cst_123 = arith.constant dense<0.000000e+00> : vector<16x8xf32>
    %190 = tpu.matmul %184, %189, %cst_123 {dimension_numbers = #tpu.dot_dimension_numbers<[1], [0], [0], [1], [0, 0, 1, 1], [], []>} : vector<16x8xf32>, vector<8x8xf32>, vector<16x8xf32> -> vector<16x8xf32>
    %c0_124 = arith.constant 0 : index
    %c0_125 = arith.constant 0 : index
    %191 = vector.load %arg10[%c0_124, %c0_125] : memref<1x8xf32, #tpu.memory_space<vmem>>, vector<1x8xf32>
    %192 = vector.broadcast %191 : vector<1x8xf32> to vector<16x8xf32>
    %193 = arith.addf %190, %192 : vector<16x8xf32>
    %c0_126 = arith.constant 0 : index
    %c0_127 = arith.constant 0 : index
    %194 = vector.load %arg11[%c0_126, %c0_127] : memref<8x8xf32, #tpu.memory_space<vmem>>, vector<8x8xf32>
    %cst_128 = arith.constant dense<0.000000e+00> : vector<16x8xf32>
    %195 = tpu.matmul %184, %194, %cst_128 {dimension_numbers = #tpu.dot_dimension_numbers<[1], [0], [0], [1], [0, 0, 1, 1], [], []>} : vector<16x8xf32>, vector<8x8xf32>, vector<16x8xf32> -> vector<16x8xf32>
    %c0_129 = arith.constant 0 : index
    %c0_130 = arith.constant 0 : index
    %196 = vector.load %arg12[%c0_129, %c0_130] : memref<1x8xf32, #tpu.memory_space<vmem>>, vector<1x8xf32>
    %197 = vector.broadcast %196 : vector<1x8xf32> to vector<16x8xf32>
    %198 = arith.addf %195, %197 : vector<16x8xf32>
    %c0_131 = arith.constant 0 : index
    %c0_132 = arith.constant 0 : index
    %199 = vector.load %arg13[%c0_131, %c0_132] : memref<8x8xf32, #tpu.memory_space<vmem>>, vector<8x8xf32>
    %cst_133 = arith.constant dense<0.000000e+00> : vector<16x8xf32>
    %200 = tpu.matmul %184, %199, %cst_133 {dimension_numbers = #tpu.dot_dimension_numbers<[1], [0], [0], [1], [0, 0, 1, 1], [], []>} : vector<16x8xf32>, vector<8x8xf32>, vector<16x8xf32> -> vector<16x8xf32>
    %c0_134 = arith.constant 0 : index
    %c0_135 = arith.constant 0 : index
    %201 = vector.load %arg14[%c0_134, %c0_135] : memref<1x8xf32, #tpu.memory_space<vmem>>, vector<1x8xf32>
    %202 = vector.broadcast %201 : vector<1x8xf32> to vector<16x8xf32>
    %203 = arith.addf %200, %202 : vector<16x8xf32>
    %cst_136 = arith.constant dense<0.000000e+00> : vector<16x16xf32>
    %204 = tpu.matmul %193, %198, %cst_136 {dimension_numbers = #tpu.dot_dimension_numbers<[1], [1], [0], [0], [0, 0, 1, 0], [], []>} : vector<16x8xf32>, vector<16x8xf32>, vector<16x16xf32> -> vector<16x16xf32>
    %cst_137 = arith.constant 0.176776692 : f32
    %205 = vector.broadcast %cst_137 : f32 to vector<16x16xf32>
    %206 = arith.mulf %204, %205 : vector<16x16xf32>
    %cst_138 = arith.constant dense<0xFF800000> : vector<16xf32>
    %207 = vector.multi_reduction <maximumf>, %206, %cst_138 [1] : vector<16x16xf32> to vector<16xf32>
    %208 = vector.shape_cast %207 : vector<16xf32> to vector<16x1xf32>
    %209 = vector.broadcast %208 : vector<16x1xf32> to vector<16x16xf32>
    %210 = arith.subf %206, %209 : vector<16x16xf32>
    %211 = math.exp %210 : vector<16x16xf32>
    %cst_139 = arith.constant dense<0.000000e+00> : vector<16xf32>
    %212 = vector.multi_reduction <add>, %211, %cst_139 [1] : vector<16x16xf32> to vector<16xf32>
    %213 = vector.shape_cast %212 : vector<16xf32> to vector<16x1xf32>
    %214 = vector.broadcast %213 : vector<16x1xf32> to vector<16x16xf32>
    %215 = arith.divf %211, %214 : vector<16x16xf32>
    %cst_140 = arith.constant dense<0.000000e+00> : vector<16x8xf32>
    %216 = tpu.matmul %215, %203, %cst_140 {dimension_numbers = #tpu.dot_dimension_numbers<[1], [0], [0], [1], [0, 0, 1, 1], [], []>} : vector<16x16xf32>, vector<16x8xf32>, vector<16x8xf32> -> vector<16x8xf32>
    %c1_141 = arith.constant 1 : index
    %c0_142 = arith.constant 0 : index
    %c0_143 = arith.constant 0 : index
    %217 = vector.load %arg15[%c1_141, %c0_142, %c0_143] : memref<4x8x32xf32, #tpu.memory_space<vmem>>, vector<1x8x32xf32>
    %218 = vector.shape_cast %217 : vector<1x8x32xf32> to vector<8x32xf32>
    %cst_144 = arith.constant dense<0.000000e+00> : vector<16x32xf32>
    %219 = tpu.matmul %216, %218, %cst_144 {dimension_numbers = #tpu.dot_dimension_numbers<[1], [0], [0], [1], [0, 0, 1, 1], [], []>} : vector<16x8xf32>, vector<8x32xf32>, vector<16x32xf32> -> vector<16x32xf32>
    %220 = arith.addf %115, %219 : vector<16x32xf32>
    %c4_i32 = arith.constant 4 : i32
    %221 = vector.broadcast %c4_i32 : i32 to vector<16x1xi32>
    %222 = arith.cmpi sge, %8, %221 : vector<16x1xi32>
    %c12_i32 = arith.constant 12 : i32
    %223 = vector.broadcast %c12_i32 : i32 to vector<16x1xi32>
    %224 = arith.cmpi slt, %8, %223 : vector<16x1xi32>
    %c4_i32_145 = arith.constant 4 : i32
    %225 = tpu.dynamic_rotate %179 by %c4_i32_145 dim 0 : vector<16x16xf32>, i32 -> vector<16x16xf32>
    %cst_146 = arith.constant 0.000000e+00 : f32
    %226 = vector.shape_cast %222 : vector<16x1xi1> to vector<16x1xi1>
    %227 = vector.broadcast %226 : vector<16x1xi1> to vector<16x16xi1>
    %228 = vector.broadcast %cst_146 : f32 to vector<16x16xf32>
    %229 = arith.select %227, %225, %228 : vector<16x16xi1>, vector<16x16xf32>
    %c12_i32_147 = arith.constant 12 : i32
    %230 = tpu.dynamic_rotate %179 by %c12_i32_147 dim 0 : vector<16x16xf32>, i32 -> vector<16x16xf32>
    %cst_148 = arith.constant 0.000000e+00 : f32
    %231 = vector.shape_cast %224 : vector<16x1xi1> to vector<16x1xi1>
    %232 = vector.broadcast %231 : vector<16x1xi1> to vector<16x16xi1>
    %233 = vector.broadcast %cst_148 : f32 to vector<16x16xf32>
    %234 = arith.select %232, %230, %233 : vector<16x16xi1>, vector<16x16xf32>
    %c12 = arith.constant 12 : index
    %c0_149 = arith.constant 0 : index
    %c0_150 = arith.constant 0 : index
    %235 = vector.load %arg4[%c12, %c0_149, %c0_150] : memref<24x16x16xf32, #tpu.memory_space<vmem>>, vector<1x16x16xf32>
    %236 = vector.shape_cast %235 : vector<1x16x16xf32> to vector<16x16xf32>
    %cst_151 = arith.constant dense<0.000000e+00> : vector<16x16xf32>
    %237 = tpu.matmul %229, %236, %cst_151 {dimension_numbers = #tpu.dot_dimension_numbers<[1], [0], [0], [1], [0, 0, 1, 1], [], []>} : vector<16x16xf32>, vector<16x16xf32>, vector<16x16xf32> -> vector<16x16xf32>
    %c13 = arith.constant 13 : index
    %c0_152 = arith.constant 0 : index
    %c0_153 = arith.constant 0 : index
    %238 = vector.load %arg4[%c13, %c0_152, %c0_153] : memref<24x16x16xf32, #tpu.memory_space<vmem>>, vector<1x16x16xf32>
    %239 = vector.shape_cast %238 : vector<1x16x16xf32> to vector<16x16xf32>
    %cst_154 = arith.constant dense<0.000000e+00> : vector<16x16xf32>
    %240 = tpu.matmul %179, %239, %cst_154 {dimension_numbers = #tpu.dot_dimension_numbers<[1], [0], [0], [1], [0, 0, 1, 1], [], []>} : vector<16x16xf32>, vector<16x16xf32>, vector<16x16xf32> -> vector<16x16xf32>
    %241 = arith.addf %237, %240 : vector<16x16xf32>
    %c14 = arith.constant 14 : index
    %c0_155 = arith.constant 0 : index
    %c0_156 = arith.constant 0 : index
    %242 = vector.load %arg4[%c14, %c0_155, %c0_156] : memref<24x16x16xf32, #tpu.memory_space<vmem>>, vector<1x16x16xf32>
    %243 = vector.shape_cast %242 : vector<1x16x16xf32> to vector<16x16xf32>
    %cst_157 = arith.constant dense<0.000000e+00> : vector<16x16xf32>
    %244 = tpu.matmul %234, %243, %cst_157 {dimension_numbers = #tpu.dot_dimension_numbers<[1], [0], [0], [1], [0, 0, 1, 1], [], []>} : vector<16x16xf32>, vector<16x16xf32>, vector<16x16xf32> -> vector<16x16xf32>
    %245 = arith.addf %241, %244 : vector<16x16xf32>
    %c4_158 = arith.constant 4 : index
    %c0_159 = arith.constant 0 : index
    %c0_160 = arith.constant 0 : index
    %246 = vector.load %arg5[%c4_158, %c0_159, %c0_160] : memref<8x1x16xf32, #tpu.memory_space<vmem>>, vector<1x1x16xf32>
    %247 = vector.shape_cast %246 : vector<1x1x16xf32> to vector<1x16xf32>
    %248 = vector.broadcast %247 : vector<1x16xf32> to vector<16x16xf32>
    %249 = arith.addf %245, %248 : vector<16x16xf32>
    %cst_161 = arith.constant 0.000000e+00 : f32
    %250 = vector.broadcast %cst_161 : f32 to vector<16x16xf32>
    %251 = arith.maximumf %249, %250 : vector<16x16xf32>
    %c4_i32_162 = arith.constant 4 : i32
    %252 = tpu.dynamic_rotate %251 by %c4_i32_162 dim 0 : vector<16x16xf32>, i32 -> vector<16x16xf32>
    %cst_163 = arith.constant 0.000000e+00 : f32
    %253 = vector.shape_cast %222 : vector<16x1xi1> to vector<16x1xi1>
    %254 = vector.broadcast %253 : vector<16x1xi1> to vector<16x16xi1>
    %255 = vector.broadcast %cst_163 : f32 to vector<16x16xf32>
    %256 = arith.select %254, %252, %255 : vector<16x16xi1>, vector<16x16xf32>
    %c12_i32_164 = arith.constant 12 : i32
    %257 = tpu.dynamic_rotate %251 by %c12_i32_164 dim 0 : vector<16x16xf32>, i32 -> vector<16x16xf32>
    %cst_165 = arith.constant 0.000000e+00 : f32
    %258 = vector.shape_cast %224 : vector<16x1xi1> to vector<16x1xi1>
    %259 = vector.broadcast %258 : vector<16x1xi1> to vector<16x16xi1>
    %260 = vector.broadcast %cst_165 : f32 to vector<16x16xf32>
    %261 = arith.select %259, %257, %260 : vector<16x16xi1>, vector<16x16xf32>
    %c15 = arith.constant 15 : index
    %c0_166 = arith.constant 0 : index
    %c0_167 = arith.constant 0 : index
    %262 = vector.load %arg4[%c15, %c0_166, %c0_167] : memref<24x16x16xf32, #tpu.memory_space<vmem>>, vector<1x16x16xf32>
    %263 = vector.shape_cast %262 : vector<1x16x16xf32> to vector<16x16xf32>
    %cst_168 = arith.constant dense<0.000000e+00> : vector<16x16xf32>
    %264 = tpu.matmul %256, %263, %cst_168 {dimension_numbers = #tpu.dot_dimension_numbers<[1], [0], [0], [1], [0, 0, 1, 1], [], []>} : vector<16x16xf32>, vector<16x16xf32>, vector<16x16xf32> -> vector<16x16xf32>
    %c16 = arith.constant 16 : index
    %c0_169 = arith.constant 0 : index
    %c0_170 = arith.constant 0 : index
    %265 = vector.load %arg4[%c16, %c0_169, %c0_170] : memref<24x16x16xf32, #tpu.memory_space<vmem>>, vector<1x16x16xf32>
    %266 = vector.shape_cast %265 : vector<1x16x16xf32> to vector<16x16xf32>
    %cst_171 = arith.constant dense<0.000000e+00> : vector<16x16xf32>
    %267 = tpu.matmul %251, %266, %cst_171 {dimension_numbers = #tpu.dot_dimension_numbers<[1], [0], [0], [1], [0, 0, 1, 1], [], []>} : vector<16x16xf32>, vector<16x16xf32>, vector<16x16xf32> -> vector<16x16xf32>
    %268 = arith.addf %264, %267 : vector<16x16xf32>
    %c17 = arith.constant 17 : index
    %c0_172 = arith.constant 0 : index
    %c0_173 = arith.constant 0 : index
    %269 = vector.load %arg4[%c17, %c0_172, %c0_173] : memref<24x16x16xf32, #tpu.memory_space<vmem>>, vector<1x16x16xf32>
    %270 = vector.shape_cast %269 : vector<1x16x16xf32> to vector<16x16xf32>
    %cst_174 = arith.constant dense<0.000000e+00> : vector<16x16xf32>
    %271 = tpu.matmul %261, %270, %cst_174 {dimension_numbers = #tpu.dot_dimension_numbers<[1], [0], [0], [1], [0, 0, 1, 1], [], []>} : vector<16x16xf32>, vector<16x16xf32>, vector<16x16xf32> -> vector<16x16xf32>
    %272 = arith.addf %268, %271 : vector<16x16xf32>
    %c5_175 = arith.constant 5 : index
    %c0_176 = arith.constant 0 : index
    %c0_177 = arith.constant 0 : index
    %273 = vector.load %arg5[%c5_175, %c0_176, %c0_177] : memref<8x1x16xf32, #tpu.memory_space<vmem>>, vector<1x1x16xf32>
    %274 = vector.shape_cast %273 : vector<1x1x16xf32> to vector<1x16xf32>
    %275 = vector.broadcast %274 : vector<1x16xf32> to vector<16x16xf32>
    %276 = arith.addf %272, %275 : vector<16x16xf32>
    %cst_178 = arith.constant 0.000000e+00 : f32
    %277 = vector.broadcast %cst_178 : f32 to vector<16x16xf32>
    %278 = arith.maximumf %276, %277 : vector<16x16xf32>
    %279 = arith.negf %278 : vector<16x16xf32>
    %280 = math.exp %279 : vector<16x16xf32>
    %cst_179 = arith.constant 1.000000e+00 : f32
    %281 = vector.broadcast %cst_179 : f32 to vector<16x16xf32>
    %282 = arith.addf %281, %280 : vector<16x16xf32>
    %283 = arith.divf %281, %282 : vector<16x16xf32>
    %284 = arith.mulf %179, %283 : vector<16x16xf32>
    %c0_180 = arith.constant 0 : index
    %c0_181 = arith.constant 0 : index
    %285 = vector.load %arg6[%c0_180, %c0_181] : memref<16x8xf32, #tpu.memory_space<vmem>>, vector<16x8xf32>
    %cst_182 = arith.constant dense<0.000000e+00> : vector<16x8xf32>
    %286 = tpu.matmul %284, %285, %cst_182 {dimension_numbers = #tpu.dot_dimension_numbers<[1], [0], [0], [1], [0, 0, 1, 1], [], []>} : vector<16x16xf32>, vector<16x8xf32>, vector<16x8xf32> -> vector<16x8xf32>
    %c0_183 = arith.constant 0 : index
    %c0_184 = arith.constant 0 : index
    %287 = vector.load %arg7[%c0_183, %c0_184] : memref<1x8xf32, #tpu.memory_space<vmem>>, vector<1x8xf32>
    %288 = vector.broadcast %287 : vector<1x8xf32> to vector<16x8xf32>
    %289 = arith.addf %286, %288 : vector<16x8xf32>
    %c2_185 = arith.constant 2 : index
    %c0_186 = arith.constant 0 : index
    %c0_187 = arith.constant 0 : index
    %290 = vector.load %arg8[%c2_185, %c0_186, %c0_187] : memref<4x8x32xf32, #tpu.memory_space<vmem>>, vector<1x8x32xf32>
    %291 = vector.shape_cast %290 : vector<1x8x32xf32> to vector<8x32xf32>
    %cst_188 = arith.constant dense<0.000000e+00> : vector<16x32xf32>
    %292 = tpu.matmul %289, %291, %cst_188 {dimension_numbers = #tpu.dot_dimension_numbers<[1], [0], [0], [1], [0, 0, 1, 1], [], []>} : vector<16x8xf32>, vector<8x32xf32>, vector<16x32xf32> -> vector<16x32xf32>
    %293 = arith.addf %188, %292 : vector<16x32xf32>
    %c0_189 = arith.constant 0 : index
    %c0_190 = arith.constant 0 : index
    %294 = vector.load %arg9[%c0_189, %c0_190] : memref<8x8xf32, #tpu.memory_space<vmem>>, vector<8x8xf32>
    %cst_191 = arith.constant dense<0.000000e+00> : vector<16x8xf32>
    %295 = tpu.matmul %289, %294, %cst_191 {dimension_numbers = #tpu.dot_dimension_numbers<[1], [0], [0], [1], [0, 0, 1, 1], [], []>} : vector<16x8xf32>, vector<8x8xf32>, vector<16x8xf32> -> vector<16x8xf32>
    %c0_192 = arith.constant 0 : index
    %c0_193 = arith.constant 0 : index
    %296 = vector.load %arg10[%c0_192, %c0_193] : memref<1x8xf32, #tpu.memory_space<vmem>>, vector<1x8xf32>
    %297 = vector.broadcast %296 : vector<1x8xf32> to vector<16x8xf32>
    %298 = arith.addf %295, %297 : vector<16x8xf32>
    %c0_194 = arith.constant 0 : index
    %c0_195 = arith.constant 0 : index
    %299 = vector.load %arg11[%c0_194, %c0_195] : memref<8x8xf32, #tpu.memory_space<vmem>>, vector<8x8xf32>
    %cst_196 = arith.constant dense<0.000000e+00> : vector<16x8xf32>
    %300 = tpu.matmul %289, %299, %cst_196 {dimension_numbers = #tpu.dot_dimension_numbers<[1], [0], [0], [1], [0, 0, 1, 1], [], []>} : vector<16x8xf32>, vector<8x8xf32>, vector<16x8xf32> -> vector<16x8xf32>
    %c0_197 = arith.constant 0 : index
    %c0_198 = arith.constant 0 : index
    %301 = vector.load %arg12[%c0_197, %c0_198] : memref<1x8xf32, #tpu.memory_space<vmem>>, vector<1x8xf32>
    %302 = vector.broadcast %301 : vector<1x8xf32> to vector<16x8xf32>
    %303 = arith.addf %300, %302 : vector<16x8xf32>
    %c0_199 = arith.constant 0 : index
    %c0_200 = arith.constant 0 : index
    %304 = vector.load %arg13[%c0_199, %c0_200] : memref<8x8xf32, #tpu.memory_space<vmem>>, vector<8x8xf32>
    %cst_201 = arith.constant dense<0.000000e+00> : vector<16x8xf32>
    %305 = tpu.matmul %289, %304, %cst_201 {dimension_numbers = #tpu.dot_dimension_numbers<[1], [0], [0], [1], [0, 0, 1, 1], [], []>} : vector<16x8xf32>, vector<8x8xf32>, vector<16x8xf32> -> vector<16x8xf32>
    %c0_202 = arith.constant 0 : index
    %c0_203 = arith.constant 0 : index
    %306 = vector.load %arg14[%c0_202, %c0_203] : memref<1x8xf32, #tpu.memory_space<vmem>>, vector<1x8xf32>
    %307 = vector.broadcast %306 : vector<1x8xf32> to vector<16x8xf32>
    %308 = arith.addf %305, %307 : vector<16x8xf32>
    %cst_204 = arith.constant dense<0.000000e+00> : vector<16x16xf32>
    %309 = tpu.matmul %298, %303, %cst_204 {dimension_numbers = #tpu.dot_dimension_numbers<[1], [1], [0], [0], [0, 0, 1, 0], [], []>} : vector<16x8xf32>, vector<16x8xf32>, vector<16x16xf32> -> vector<16x16xf32>
    %cst_205 = arith.constant 0.176776692 : f32
    %310 = vector.broadcast %cst_205 : f32 to vector<16x16xf32>
    %311 = arith.mulf %309, %310 : vector<16x16xf32>
    %cst_206 = arith.constant dense<0xFF800000> : vector<16xf32>
    %312 = vector.multi_reduction <maximumf>, %311, %cst_206 [1] : vector<16x16xf32> to vector<16xf32>
    %313 = vector.shape_cast %312 : vector<16xf32> to vector<16x1xf32>
    %314 = vector.broadcast %313 : vector<16x1xf32> to vector<16x16xf32>
    %315 = arith.subf %311, %314 : vector<16x16xf32>
    %316 = math.exp %315 : vector<16x16xf32>
    %cst_207 = arith.constant dense<0.000000e+00> : vector<16xf32>
    %317 = vector.multi_reduction <add>, %316, %cst_207 [1] : vector<16x16xf32> to vector<16xf32>
    %318 = vector.shape_cast %317 : vector<16xf32> to vector<16x1xf32>
    %319 = vector.broadcast %318 : vector<16x1xf32> to vector<16x16xf32>
    %320 = arith.divf %316, %319 : vector<16x16xf32>
    %cst_208 = arith.constant dense<0.000000e+00> : vector<16x8xf32>
    %321 = tpu.matmul %320, %308, %cst_208 {dimension_numbers = #tpu.dot_dimension_numbers<[1], [0], [0], [1], [0, 0, 1, 1], [], []>} : vector<16x16xf32>, vector<16x8xf32>, vector<16x8xf32> -> vector<16x8xf32>
    %c2_209 = arith.constant 2 : index
    %c0_210 = arith.constant 0 : index
    %c0_211 = arith.constant 0 : index
    %322 = vector.load %arg15[%c2_209, %c0_210, %c0_211] : memref<4x8x32xf32, #tpu.memory_space<vmem>>, vector<1x8x32xf32>
    %323 = vector.shape_cast %322 : vector<1x8x32xf32> to vector<8x32xf32>
    %cst_212 = arith.constant dense<0.000000e+00> : vector<16x32xf32>
    %324 = tpu.matmul %321, %323, %cst_212 {dimension_numbers = #tpu.dot_dimension_numbers<[1], [0], [0], [1], [0, 0, 1, 1], [], []>} : vector<16x8xf32>, vector<8x32xf32>, vector<16x32xf32> -> vector<16x32xf32>
    %325 = arith.addf %220, %324 : vector<16x32xf32>
    %c8_i32 = arith.constant 8 : i32
    %326 = vector.broadcast %c8_i32 : i32 to vector<16x1xi32>
    %327 = arith.cmpi sge, %8, %326 : vector<16x1xi32>
    %c8_i32_213 = arith.constant 8 : i32
    %328 = vector.broadcast %c8_i32_213 : i32 to vector<16x1xi32>
    %329 = arith.cmpi slt, %8, %328 : vector<16x1xi32>
    %c8_i32_214 = arith.constant 8 : i32
    %330 = tpu.dynamic_rotate %284 by %c8_i32_214 dim 0 : vector<16x16xf32>, i32 -> vector<16x16xf32>
    %cst_215 = arith.constant 0.000000e+00 : f32
    %331 = vector.shape_cast %327 : vector<16x1xi1> to vector<16x1xi1>
    %332 = vector.broadcast %331 : vector<16x1xi1> to vector<16x16xi1>
    %333 = vector.broadcast %cst_215 : f32 to vector<16x16xf32>
    %334 = arith.select %332, %330, %333 : vector<16x16xi1>, vector<16x16xf32>
    %c8_i32_216 = arith.constant 8 : i32
    %335 = tpu.dynamic_rotate %284 by %c8_i32_216 dim 0 : vector<16x16xf32>, i32 -> vector<16x16xf32>
    %cst_217 = arith.constant 0.000000e+00 : f32
    %336 = vector.shape_cast %329 : vector<16x1xi1> to vector<16x1xi1>
    %337 = vector.broadcast %336 : vector<16x1xi1> to vector<16x16xi1>
    %338 = vector.broadcast %cst_217 : f32 to vector<16x16xf32>
    %339 = arith.select %337, %335, %338 : vector<16x16xi1>, vector<16x16xf32>
    %c18 = arith.constant 18 : index
    %c0_218 = arith.constant 0 : index
    %c0_219 = arith.constant 0 : index
    %340 = vector.load %arg4[%c18, %c0_218, %c0_219] : memref<24x16x16xf32, #tpu.memory_space<vmem>>, vector<1x16x16xf32>
    %341 = vector.shape_cast %340 : vector<1x16x16xf32> to vector<16x16xf32>
    %cst_220 = arith.constant dense<0.000000e+00> : vector<16x16xf32>
    %342 = tpu.matmul %334, %341, %cst_220 {dimension_numbers = #tpu.dot_dimension_numbers<[1], [0], [0], [1], [0, 0, 1, 1], [], []>} : vector<16x16xf32>, vector<16x16xf32>, vector<16x16xf32> -> vector<16x16xf32>
    %c19 = arith.constant 19 : index
    %c0_221 = arith.constant 0 : index
    %c0_222 = arith.constant 0 : index
    %343 = vector.load %arg4[%c19, %c0_221, %c0_222] : memref<24x16x16xf32, #tpu.memory_space<vmem>>, vector<1x16x16xf32>
    %344 = vector.shape_cast %343 : vector<1x16x16xf32> to vector<16x16xf32>
    %cst_223 = arith.constant dense<0.000000e+00> : vector<16x16xf32>
    %345 = tpu.matmul %284, %344, %cst_223 {dimension_numbers = #tpu.dot_dimension_numbers<[1], [0], [0], [1], [0, 0, 1, 1], [], []>} : vector<16x16xf32>, vector<16x16xf32>, vector<16x16xf32> -> vector<16x16xf32>
    %346 = arith.addf %342, %345 : vector<16x16xf32>
    %c20 = arith.constant 20 : index
    %c0_224 = arith.constant 0 : index
    %c0_225 = arith.constant 0 : index
    %347 = vector.load %arg4[%c20, %c0_224, %c0_225] : memref<24x16x16xf32, #tpu.memory_space<vmem>>, vector<1x16x16xf32>
    %348 = vector.shape_cast %347 : vector<1x16x16xf32> to vector<16x16xf32>
    %cst_226 = arith.constant dense<0.000000e+00> : vector<16x16xf32>
    %349 = tpu.matmul %339, %348, %cst_226 {dimension_numbers = #tpu.dot_dimension_numbers<[1], [0], [0], [1], [0, 0, 1, 1], [], []>} : vector<16x16xf32>, vector<16x16xf32>, vector<16x16xf32> -> vector<16x16xf32>
    %350 = arith.addf %346, %349 : vector<16x16xf32>
    %c6_227 = arith.constant 6 : index
    %c0_228 = arith.constant 0 : index
    %c0_229 = arith.constant 0 : index
    %351 = vector.load %arg5[%c6_227, %c0_228, %c0_229] : memref<8x1x16xf32, #tpu.memory_space<vmem>>, vector<1x1x16xf32>
    %352 = vector.shape_cast %351 : vector<1x1x16xf32> to vector<1x16xf32>
    %353 = vector.broadcast %352 : vector<1x16xf32> to vector<16x16xf32>
    %354 = arith.addf %350, %353 : vector<16x16xf32>
    %cst_230 = arith.constant 0.000000e+00 : f32
    %355 = vector.broadcast %cst_230 : f32 to vector<16x16xf32>
    %356 = arith.maximumf %354, %355 : vector<16x16xf32>
    %c8_i32_231 = arith.constant 8 : i32
    %357 = tpu.dynamic_rotate %356 by %c8_i32_231 dim 0 : vector<16x16xf32>, i32 -> vector<16x16xf32>
    %cst_232 = arith.constant 0.000000e+00 : f32
    %358 = vector.shape_cast %327 : vector<16x1xi1> to vector<16x1xi1>
    %359 = vector.broadcast %358 : vector<16x1xi1> to vector<16x16xi1>
    %360 = vector.broadcast %cst_232 : f32 to vector<16x16xf32>
    %361 = arith.select %359, %357, %360 : vector<16x16xi1>, vector<16x16xf32>
    %c8_i32_233 = arith.constant 8 : i32
    %362 = tpu.dynamic_rotate %356 by %c8_i32_233 dim 0 : vector<16x16xf32>, i32 -> vector<16x16xf32>
    %cst_234 = arith.constant 0.000000e+00 : f32
    %363 = vector.shape_cast %329 : vector<16x1xi1> to vector<16x1xi1>
    %364 = vector.broadcast %363 : vector<16x1xi1> to vector<16x16xi1>
    %365 = vector.broadcast %cst_234 : f32 to vector<16x16xf32>
    %366 = arith.select %364, %362, %365 : vector<16x16xi1>, vector<16x16xf32>
    %c21 = arith.constant 21 : index
    %c0_235 = arith.constant 0 : index
    %c0_236 = arith.constant 0 : index
    %367 = vector.load %arg4[%c21, %c0_235, %c0_236] : memref<24x16x16xf32, #tpu.memory_space<vmem>>, vector<1x16x16xf32>
    %368 = vector.shape_cast %367 : vector<1x16x16xf32> to vector<16x16xf32>
    %cst_237 = arith.constant dense<0.000000e+00> : vector<16x16xf32>
    %369 = tpu.matmul %361, %368, %cst_237 {dimension_numbers = #tpu.dot_dimension_numbers<[1], [0], [0], [1], [0, 0, 1, 1], [], []>} : vector<16x16xf32>, vector<16x16xf32>, vector<16x16xf32> -> vector<16x16xf32>
    %c22 = arith.constant 22 : index
    %c0_238 = arith.constant 0 : index
    %c0_239 = arith.constant 0 : index
    %370 = vector.load %arg4[%c22, %c0_238, %c0_239] : memref<24x16x16xf32, #tpu.memory_space<vmem>>, vector<1x16x16xf32>
    %371 = vector.shape_cast %370 : vector<1x16x16xf32> to vector<16x16xf32>
    %cst_240 = arith.constant dense<0.000000e+00> : vector<16x16xf32>
    %372 = tpu.matmul %356, %371, %cst_240 {dimension_numbers = #tpu.dot_dimension_numbers<[1], [0], [0], [1], [0, 0, 1, 1], [], []>} : vector<16x16xf32>, vector<16x16xf32>, vector<16x16xf32> -> vector<16x16xf32>
    %373 = arith.addf %369, %372 : vector<16x16xf32>
    %c23 = arith.constant 23 : index
    %c0_241 = arith.constant 0 : index
    %c0_242 = arith.constant 0 : index
    %374 = vector.load %arg4[%c23, %c0_241, %c0_242] : memref<24x16x16xf32, #tpu.memory_space<vmem>>, vector<1x16x16xf32>
    %375 = vector.shape_cast %374 : vector<1x16x16xf32> to vector<16x16xf32>
    %cst_243 = arith.constant dense<0.000000e+00> : vector<16x16xf32>
    %376 = tpu.matmul %366, %375, %cst_243 {dimension_numbers = #tpu.dot_dimension_numbers<[1], [0], [0], [1], [0, 0, 1, 1], [], []>} : vector<16x16xf32>, vector<16x16xf32>, vector<16x16xf32> -> vector<16x16xf32>
    %377 = arith.addf %373, %376 : vector<16x16xf32>
    %c7_244 = arith.constant 7 : index
    %c0_245 = arith.constant 0 : index
    %c0_246 = arith.constant 0 : index
    %378 = vector.load %arg5[%c7_244, %c0_245, %c0_246] : memref<8x1x16xf32, #tpu.memory_space<vmem>>, vector<1x1x16xf32>
    %379 = vector.shape_cast %378 : vector<1x1x16xf32> to vector<1x16xf32>
    %380 = vector.broadcast %379 : vector<1x16xf32> to vector<16x16xf32>
    %381 = arith.addf %377, %380 : vector<16x16xf32>
    %cst_247 = arith.constant 0.000000e+00 : f32
    %382 = vector.broadcast %cst_247 : f32 to vector<16x16xf32>
    %383 = arith.maximumf %381, %382 : vector<16x16xf32>
    %384 = arith.negf %383 : vector<16x16xf32>
    %385 = math.exp %384 : vector<16x16xf32>
    %cst_248 = arith.constant 1.000000e+00 : f32
    %386 = vector.broadcast %cst_248 : f32 to vector<16x16xf32>
    %387 = arith.addf %386, %385 : vector<16x16xf32>
    %388 = arith.divf %386, %387 : vector<16x16xf32>
    %389 = arith.mulf %284, %388 : vector<16x16xf32>
    %c0_249 = arith.constant 0 : index
    %c0_250 = arith.constant 0 : index
    %390 = vector.load %arg6[%c0_249, %c0_250] : memref<16x8xf32, #tpu.memory_space<vmem>>, vector<16x8xf32>
    %cst_251 = arith.constant dense<0.000000e+00> : vector<16x8xf32>
    %391 = tpu.matmul %389, %390, %cst_251 {dimension_numbers = #tpu.dot_dimension_numbers<[1], [0], [0], [1], [0, 0, 1, 1], [], []>} : vector<16x16xf32>, vector<16x8xf32>, vector<16x8xf32> -> vector<16x8xf32>
    %c0_252 = arith.constant 0 : index
    %c0_253 = arith.constant 0 : index
    %392 = vector.load %arg7[%c0_252, %c0_253] : memref<1x8xf32, #tpu.memory_space<vmem>>, vector<1x8xf32>
    %393 = vector.broadcast %392 : vector<1x8xf32> to vector<16x8xf32>
    %394 = arith.addf %391, %393 : vector<16x8xf32>
    %c3_254 = arith.constant 3 : index
    %c0_255 = arith.constant 0 : index
    %c0_256 = arith.constant 0 : index
    %395 = vector.load %arg8[%c3_254, %c0_255, %c0_256] : memref<4x8x32xf32, #tpu.memory_space<vmem>>, vector<1x8x32xf32>
    %396 = vector.shape_cast %395 : vector<1x8x32xf32> to vector<8x32xf32>
    %cst_257 = arith.constant dense<0.000000e+00> : vector<16x32xf32>
    %397 = tpu.matmul %394, %396, %cst_257 {dimension_numbers = #tpu.dot_dimension_numbers<[1], [0], [0], [1], [0, 0, 1, 1], [], []>} : vector<16x8xf32>, vector<8x32xf32>, vector<16x32xf32> -> vector<16x32xf32>
    %398 = arith.addf %293, %397 : vector<16x32xf32>
    %c0_258 = arith.constant 0 : index
    %c0_259 = arith.constant 0 : index
    %399 = vector.load %arg9[%c0_258, %c0_259] : memref<8x8xf32, #tpu.memory_space<vmem>>, vector<8x8xf32>
    %cst_260 = arith.constant dense<0.000000e+00> : vector<16x8xf32>
    %400 = tpu.matmul %394, %399, %cst_260 {dimension_numbers = #tpu.dot_dimension_numbers<[1], [0], [0], [1], [0, 0, 1, 1], [], []>} : vector<16x8xf32>, vector<8x8xf32>, vector<16x8xf32> -> vector<16x8xf32>
    %c0_261 = arith.constant 0 : index
    %c0_262 = arith.constant 0 : index
    %401 = vector.load %arg10[%c0_261, %c0_262] : memref<1x8xf32, #tpu.memory_space<vmem>>, vector<1x8xf32>
    %402 = vector.broadcast %401 : vector<1x8xf32> to vector<16x8xf32>
    %403 = arith.addf %400, %402 : vector<16x8xf32>
    %c0_263 = arith.constant 0 : index
    %c0_264 = arith.constant 0 : index
    %404 = vector.load %arg11[%c0_263, %c0_264] : memref<8x8xf32, #tpu.memory_space<vmem>>, vector<8x8xf32>
    %cst_265 = arith.constant dense<0.000000e+00> : vector<16x8xf32>
    %405 = tpu.matmul %394, %404, %cst_265 {dimension_numbers = #tpu.dot_dimension_numbers<[1], [0], [0], [1], [0, 0, 1, 1], [], []>} : vector<16x8xf32>, vector<8x8xf32>, vector<16x8xf32> -> vector<16x8xf32>
    %c0_266 = arith.constant 0 : index
    %c0_267 = arith.constant 0 : index
    %406 = vector.load %arg12[%c0_266, %c0_267] : memref<1x8xf32, #tpu.memory_space<vmem>>, vector<1x8xf32>
    %407 = vector.broadcast %406 : vector<1x8xf32> to vector<16x8xf32>
    %408 = arith.addf %405, %407 : vector<16x8xf32>
    %c0_268 = arith.constant 0 : index
    %c0_269 = arith.constant 0 : index
    %409 = vector.load %arg13[%c0_268, %c0_269] : memref<8x8xf32, #tpu.memory_space<vmem>>, vector<8x8xf32>
    %cst_270 = arith.constant dense<0.000000e+00> : vector<16x8xf32>
    %410 = tpu.matmul %394, %409, %cst_270 {dimension_numbers = #tpu.dot_dimension_numbers<[1], [0], [0], [1], [0, 0, 1, 1], [], []>} : vector<16x8xf32>, vector<8x8xf32>, vector<16x8xf32> -> vector<16x8xf32>
    %c0_271 = arith.constant 0 : index
    %c0_272 = arith.constant 0 : index
    %411 = vector.load %arg14[%c0_271, %c0_272] : memref<1x8xf32, #tpu.memory_space<vmem>>, vector<1x8xf32>
    %412 = vector.broadcast %411 : vector<1x8xf32> to vector<16x8xf32>
    %413 = arith.addf %410, %412 : vector<16x8xf32>
    %cst_273 = arith.constant dense<0.000000e+00> : vector<16x16xf32>
    %414 = tpu.matmul %403, %408, %cst_273 {dimension_numbers = #tpu.dot_dimension_numbers<[1], [1], [0], [0], [0, 0, 1, 0], [], []>} : vector<16x8xf32>, vector<16x8xf32>, vector<16x16xf32> -> vector<16x16xf32>
    %cst_274 = arith.constant 0.176776692 : f32
    %415 = vector.broadcast %cst_274 : f32 to vector<16x16xf32>
    %416 = arith.mulf %414, %415 : vector<16x16xf32>
    %cst_275 = arith.constant dense<0xFF800000> : vector<16xf32>
    %417 = vector.multi_reduction <maximumf>, %416, %cst_275 [1] : vector<16x16xf32> to vector<16xf32>
    %418 = vector.shape_cast %417 : vector<16xf32> to vector<16x1xf32>
    %419 = vector.broadcast %418 : vector<16x1xf32> to vector<16x16xf32>
    %420 = arith.subf %416, %419 : vector<16x16xf32>
    %421 = math.exp %420 : vector<16x16xf32>
    %cst_276 = arith.constant dense<0.000000e+00> : vector<16xf32>
    %422 = vector.multi_reduction <add>, %421, %cst_276 [1] : vector<16x16xf32> to vector<16xf32>
    %423 = vector.shape_cast %422 : vector<16xf32> to vector<16x1xf32>
    %424 = vector.broadcast %423 : vector<16x1xf32> to vector<16x16xf32>
    %425 = arith.divf %421, %424 : vector<16x16xf32>
    %cst_277 = arith.constant dense<0.000000e+00> : vector<16x8xf32>
    %426 = tpu.matmul %425, %413, %cst_277 {dimension_numbers = #tpu.dot_dimension_numbers<[1], [0], [0], [1], [0, 0, 1, 1], [], []>} : vector<16x16xf32>, vector<16x8xf32>, vector<16x8xf32> -> vector<16x8xf32>
    %c3_278 = arith.constant 3 : index
    %c0_279 = arith.constant 0 : index
    %c0_280 = arith.constant 0 : index
    %427 = vector.load %arg15[%c3_278, %c0_279, %c0_280] : memref<4x8x32xf32, #tpu.memory_space<vmem>>, vector<1x8x32xf32>
    %428 = vector.shape_cast %427 : vector<1x8x32xf32> to vector<8x32xf32>
    %cst_281 = arith.constant dense<0.000000e+00> : vector<16x32xf32>
    %429 = tpu.matmul %426, %428, %cst_281 {dimension_numbers = #tpu.dot_dimension_numbers<[1], [0], [0], [1], [0, 0, 1, 1], [], []>} : vector<16x8xf32>, vector<8x32xf32>, vector<16x32xf32> -> vector<16x32xf32>
    %430 = arith.addf %325, %429 : vector<16x32xf32>
    %c0_282 = arith.constant 0 : index
    %c0_283 = arith.constant 0 : index
    %431 = vector.load %arg16[%c0_282, %c0_283] : memref<1x32xf32, #tpu.memory_space<vmem>>, vector<1x32xf32>
    %432 = vector.broadcast %431 : vector<1x32xf32> to vector<16x32xf32>
    %433 = arith.addf %430, %432 : vector<16x32xf32>
    %c0_284 = arith.constant 0 : index
    %c0_285 = arith.constant 0 : index
    %434 = vector.load %arg17[%c0_284, %c0_285] : memref<1x32xf32, #tpu.memory_space<vmem>>, vector<1x32xf32>
    %c0_286 = arith.constant 0 : index
    %c0_287 = arith.constant 0 : index
    %435 = vector.load %arg18[%c0_286, %c0_287] : memref<1x32xf32, #tpu.memory_space<vmem>>, vector<1x32xf32>
    %436 = arith.addf %433, %398 : vector<16x32xf32>
    %cst_288 = arith.constant dense<0.000000e+00> : vector<16xf32>
    %437 = vector.multi_reduction <add>, %436, %cst_288 [1] : vector<16x32xf32> to vector<16xf32>
    %438 = vector.shape_cast %437 : vector<16xf32> to vector<16x1xf32>
    %cst_289 = arith.constant 3.200000e+01 : f32
    %439 = vector.broadcast %cst_289 : f32 to vector<16x1xf32>
    %440 = arith.divf %438, %439 : vector<16x1xf32>
    %441 = vector.broadcast %440 : vector<16x1xf32> to vector<16x32xf32>
    %442 = arith.subf %436, %441 : vector<16x32xf32>
    %443 = arith.mulf %442, %442 : vector<16x32xf32>
    %cst_290 = arith.constant dense<0.000000e+00> : vector<16xf32>
    %444 = vector.multi_reduction <add>, %443, %cst_290 [1] : vector<16x32xf32> to vector<16xf32>
    %445 = vector.shape_cast %444 : vector<16xf32> to vector<16x1xf32>
    %cst_291 = arith.constant 3.200000e+01 : f32
    %446 = vector.broadcast %cst_291 : f32 to vector<16x1xf32>
    %447 = arith.divf %445, %446 : vector<16x1xf32>
    %448 = vector.broadcast %440 : vector<16x1xf32> to vector<16x32xf32>
    %449 = arith.subf %436, %448 : vector<16x32xf32>
    %cst_292 = arith.constant 9.99999974E-6 : f32
    %450 = vector.broadcast %cst_292 : f32 to vector<16x1xf32>
    %451 = arith.addf %447, %450 : vector<16x1xf32>
    %452 = math.rsqrt %451 : vector<16x1xf32>
    %453 = vector.broadcast %452 : vector<16x1xf32> to vector<16x32xf32>
    %454 = arith.mulf %449, %453 : vector<16x32xf32>
    %455 = vector.broadcast %434 : vector<1x32xf32> to vector<16x32xf32>
    %456 = arith.mulf %454, %455 : vector<16x32xf32>
    %457 = vector.broadcast %435 : vector<1x32xf32> to vector<16x32xf32>
    %458 = arith.addf %456, %457 : vector<16x32xf32>
    %c0_293 = arith.constant 0 : index
    %c0_294 = arith.constant 0 : index
    %459 = vector.load %arg19[%c0_293, %c0_294] : memref<32x32xf32, #tpu.memory_space<vmem>>, vector<32x32xf32>
    %cst_295 = arith.constant dense<0.000000e+00> : vector<16x32xf32>
    %460 = tpu.matmul %458, %459, %cst_295 {dimension_numbers = #tpu.dot_dimension_numbers<[1], [0], [0], [1], [0, 0, 1, 1], [], []>} : vector<16x32xf32>, vector<32x32xf32>, vector<16x32xf32> -> vector<16x32xf32>
    %c0_296 = arith.constant 0 : index
    %c0_297 = arith.constant 0 : index
    %461 = vector.load %arg20[%c0_296, %c0_297] : memref<1x32xf32, #tpu.memory_space<vmem>>, vector<1x32xf32>
    %462 = vector.broadcast %461 : vector<1x32xf32> to vector<16x32xf32>
    %463 = arith.addf %460, %462 : vector<16x32xf32>
    %cst_298 = arith.constant 0.000000e+00 : f32
    %464 = vector.broadcast %cst_298 : f32 to vector<16x32xf32>
    %465 = arith.maximumf %463, %464 : vector<16x32xf32>
    %c0_299 = arith.constant 0 : index
    %c0_300 = arith.constant 0 : index
    %466 = vector.load %arg21[%c0_299, %c0_300] : memref<32x32xf32, #tpu.memory_space<vmem>>, vector<32x32xf32>
    %cst_301 = arith.constant dense<0.000000e+00> : vector<16x32xf32>
    %467 = tpu.matmul %465, %466, %cst_301 {dimension_numbers = #tpu.dot_dimension_numbers<[1], [0], [0], [1], [0, 0, 1, 1], [], []>} : vector<16x32xf32>, vector<32x32xf32>, vector<16x32xf32> -> vector<16x32xf32>
    %c0_302 = arith.constant 0 : index
    %c0_303 = arith.constant 0 : index
    %468 = vector.load %arg22[%c0_302, %c0_303] : memref<1x32xf32, #tpu.memory_space<vmem>>, vector<1x32xf32>
    %469 = vector.broadcast %468 : vector<1x32xf32> to vector<16x32xf32>
    %470 = arith.addf %467, %469 : vector<16x32xf32>
    %cst_304 = arith.constant 0.000000e+00 : f32
    %471 = vector.broadcast %cst_304 : f32 to vector<16x32xf32>
    %472 = arith.maximumf %470, %471 : vector<16x32xf32>
    %473 = arith.addf %472, %458 : vector<16x32xf32>
    %cst_305 = arith.constant dense<0.000000e+00> : vector<16xf32>
    %474 = vector.multi_reduction <add>, %473, %cst_305 [1] : vector<16x32xf32> to vector<16xf32>
    %475 = vector.shape_cast %474 : vector<16xf32> to vector<16x1xf32>
    %cst_306 = arith.constant 3.200000e+01 : f32
    %476 = vector.broadcast %cst_306 : f32 to vector<16x1xf32>
    %477 = arith.divf %475, %476 : vector<16x1xf32>
    %478 = vector.broadcast %477 : vector<16x1xf32> to vector<16x32xf32>
    %479 = arith.subf %473, %478 : vector<16x32xf32>
    %480 = arith.mulf %479, %479 : vector<16x32xf32>
    %cst_307 = arith.constant dense<0.000000e+00> : vector<16xf32>
    %481 = vector.multi_reduction <add>, %480, %cst_307 [1] : vector<16x32xf32> to vector<16xf32>
    %482 = vector.shape_cast %481 : vector<16xf32> to vector<16x1xf32>
    %cst_308 = arith.constant 3.200000e+01 : f32
    %483 = vector.broadcast %cst_308 : f32 to vector<16x1xf32>
    %484 = arith.divf %482, %483 : vector<16x1xf32>
    %485 = vector.broadcast %477 : vector<16x1xf32> to vector<16x32xf32>
    %486 = arith.subf %473, %485 : vector<16x32xf32>
    %cst_309 = arith.constant 9.99999974E-6 : f32
    %487 = vector.broadcast %cst_309 : f32 to vector<16x1xf32>
    %488 = arith.addf %484, %487 : vector<16x1xf32>
    %489 = math.rsqrt %488 : vector<16x1xf32>
    %490 = vector.broadcast %489 : vector<16x1xf32> to vector<16x32xf32>
    %491 = arith.mulf %486, %490 : vector<16x32xf32>
    %492 = vector.broadcast %434 : vector<1x32xf32> to vector<16x32xf32>
    %493 = arith.mulf %491, %492 : vector<16x32xf32>
    %494 = vector.broadcast %435 : vector<1x32xf32> to vector<16x32xf32>
    %495 = arith.addf %493, %494 : vector<16x32xf32>
    %c0_310 = arith.constant 0 : index
    %c0_311 = arith.constant 0 : index
    %496 = vector.load %arg23[%c0_310, %c0_311] : memref<1x32xf32, #tpu.memory_space<vmem>>, vector<1x32xf32>
    %cst_312 = arith.constant dense<0.000000e+00> : vector<1x16xf32>
    %497 = tpu.matmul %496, %495, %cst_312 {dimension_numbers = #tpu.dot_dimension_numbers<[1], [1], [0], [0], [0, 0, 1, 0], [], []>} : vector<1x32xf32>, vector<16x32xf32>, vector<1x16xf32> -> vector<1x16xf32>
    %c0_313 = arith.constant 0 : index
    %c0_314 = arith.constant 0 : index
    %498 = vector.load %arg24[%c0_313, %c0_314] : memref<1x1xf32, #tpu.memory_space<vmem>>, vector<1x1xf32>
    %499 = vector.broadcast %498 : vector<1x1xf32> to vector<1x16xf32>
    %500 = arith.addf %497, %499 : vector<1x16xf32>
    %c0_315 = arith.constant 0 : index
    %c0_316 = arith.constant 0 : index
    %501 = vector.load %arg25[%c0_315, %c0_316] : memref<16x3xf32, #tpu.memory_space<vmem>>, vector<16x3xf32>
    %cst_317 = arith.constant dense<0.000000e+00> : vector<1x3xf32>
    %502 = tpu.matmul %500, %501, %cst_317 {dimension_numbers = #tpu.dot_dimension_numbers<[1], [0], [0], [1], [0, 0, 1, 1], [], []>} : vector<1x16xf32>, vector<16x3xf32>, vector<1x3xf32> -> vector<1x3xf32>
    %c0_318 = arith.constant 0 : index
    %c0_319 = arith.constant 0 : index
    %503 = vector.load %arg26[%c0_318, %c0_319] : memref<1x3xf32, #tpu.memory_space<vmem>>, vector<1x3xf32>
    %504 = arith.addf %502, %503 : vector<1x3xf32>
    %c0_320 = arith.constant 0 : index
    %c0_321 = arith.constant 0 : index
    %c0_322 = arith.constant 0 : index
    %505 = vector.load %arg27[%c0_320, %c0_321, %c0_322] : memref<1x1x3xf32, #tpu.memory_space<vmem>>, vector<1x1x3xf32>
    %506 = vector.shape_cast %505 : vector<1x1x3xf32> to vector<1x3xf32>
    %507 = vector.shape_cast %504 : vector<1x3xf32> to vector<1x1x3xf32>
    tpu.vector_store %arg27[%c0_320, %c0_321, %c0_322], %507 {strides = array<i32>} : memref<1x1x3xf32, #tpu.memory_space<vmem>>, vector<1x1x3xf32>,
    return
  }
  func.func @transform_0(%arg0: i32) -> (i32, i32) {
    %c0_i32 = arith.constant 0 : i32
    %c0_i32_0 = arith.constant 0 : i32
    return %arg0, %c0_i32 : i32, i32
  }
  func.func @transform_1(%arg0: i32) -> (i32, i32) {
    %c0_i32 = arith.constant 0 : i32
    %c0_i32_0 = arith.constant 0 : i32
    %c0_i32_1 = arith.constant 0 : i32
    return %c0_i32, %c0_i32_0 : i32, i32
  }
  func.func @transform_2(%arg0: i32) -> (i32, i32) {
    %c0_i32 = arith.constant 0 : i32
    %c0_i32_0 = arith.constant 0 : i32
    %c0_i32_1 = arith.constant 0 : i32
    return %c0_i32, %c0_i32_0 : i32, i32
  }
  func.func @transform_3(%arg0: i32) -> (i32, i32, i32) {
    %c0_i32 = arith.constant 0 : i32
    %c0_i32_0 = arith.constant 0 : i32
    %c0_i32_1 = arith.constant 0 : i32
    %c0_i32_2 = arith.constant 0 : i32
    return %c0_i32, %c0_i32_0, %c0_i32_1 : i32, i32, i32
  }
  func.func @transform_4(%arg0: i32) -> (i32, i32, i32) {
    %c0_i32 = arith.constant 0 : i32
    %c0_i32_0 = arith.constant 0 : i32
    %c0_i32_1 = arith.constant 0 : i32
    %c0_i32_2 = arith.constant 0 : i32
    return %c0_i32, %c0_i32_0, %c0_i32_1 : i32, i32, i32
  }
  func.func @transform_5(%arg0: i32) -> (i32, i32) {
    %c0_i32 = arith.constant 0 : i32
    %c0_i32_0 = arith.constant 0 : i32
    %c0_i32_1 = arith.constant 0 : i32
    return %c0_i32, %c0_i32_0 : i32, i32
  }
  func.func @transform_6(%arg0: i32) -> (i32, i32) {
    %c0_i32 = arith.constant 0 : i32
    %c0_i32_0 = arith.constant 0 : i32
    %c0_i32_1 = arith.constant 0 : i32
    return %c0_i32, %c0_i32_0 : i32, i32
  }
  func.func @transform_7(%arg0: i32) -> (i32, i32, i32) {
    %c0_i32 = arith.constant 0 : i32
    %c0_i32_0 = arith.constant 0 : i32
    %c0_i32_1 = arith.constant 0 : i32
    %c0_i32_2 = arith.constant 0 : i32
    return %c0_i32, %c0_i32_0, %c0_i32_1 : i32, i32, i32
  }
  func.func @transform_8(%arg0: i32) -> (i32, i32) {
    %c0_i32 = arith.constant 0 : i32
    %c0_i32_0 = arith.constant 0 : i32
    %c0_i32_1 = arith.constant 0 : i32
    return %c0_i32, %c0_i32_0 : i32, i32
  }
  func.func @transform_9(%arg0: i32) -> (i32, i32) {
    %c0_i32 = arith.constant 0 : i32
    %c0_i32_0 = arith.constant 0 : i32
    %c0_i32_1 = arith.constant 0 : i32
    return %c0_i32, %c0_i32_0 : i32, i32
  }
  func.func @transform_10(%arg0: i32) -> (i32, i32) {
    %c0_i32 = arith.constant 0 : i32
    %c0_i32_0 = arith.constant 0 : i32
    %c0_i32_1 = arith.constant 0 : i32
    return %c0_i32, %c0_i32_0 : i32, i32
  }
  func.func @transform_11(%arg0: i32) -> (i32, i32) {
    %c0_i32 = arith.constant 0 : i32
    %c0_i32_0 = arith.constant 0 : i32
    %c0_i32_1 = arith.constant 0 : i32
    return %c0_i32, %c0_i32_0 : i32, i32
  }
  func.func @transform_12(%arg0: i32) -> (i32, i32) {
    %c0_i32 = arith.constant 0 : i32
    %c0_i32_0 = arith.constant 0 : i32
    %c0_i32_1 = arith.constant 0 : i32
    return %c0_i32, %c0_i32_0 : i32, i32
  }
  func.func @transform_13(%arg0: i32) -> (i32, i32) {
    %c0_i32 = arith.constant 0 : i32
    %c0_i32_0 = arith.constant 0 : i32
    %c0_i32_1 = arith.constant 0 : i32
    return %c0_i32, %c0_i32_0 : i32, i32
  }
  func.func @transform_14(%arg0: i32) -> (i32, i32, i32) {
    %c0_i32 = arith.constant 0 : i32
    %c0_i32_0 = arith.constant 0 : i32
    %c0_i32_1 = arith.constant 0 : i32
    %c0_i32_2 = arith.constant 0 : i32
    return %c0_i32, %c0_i32_0, %c0_i32_1 : i32, i32, i32
  }
  func.func @transform_15(%arg0: i32) -> (i32, i32) {
    %c0_i32 = arith.constant 0 : i32
    %c0_i32_0 = arith.constant 0 : i32
    %c0_i32_1 = arith.constant 0 : i32
    return %c0_i32, %c0_i32_0 : i32, i32
  }
  func.func @transform_16(%arg0: i32) -> (i32, i32) {
    %c0_i32 = arith.constant 0 : i32
    %c0_i32_0 = arith.constant 0 : i32
    %c0_i32_1 = arith.constant 0 : i32
    return %c0_i32, %c0_i32_0 : i32, i32
  }
  func.func @transform_17(%arg0: i32) -> (i32, i32) {
    %c0_i32 = arith.constant 0 : i32
    %c0_i32_0 = arith.constant 0 : i32
    %c0_i32_1 = arith.constant 0 : i32
    return %c0_i32, %c0_i32_0 : i32, i32
  }
  func.func @transform_18(%arg0: i32) -> (i32, i32) {
    %c0_i32 = arith.constant 0 : i32
    %c0_i32_0 = arith.constant 0 : i32
    %c0_i32_1 = arith.constant 0 : i32
    return %c0_i32, %c0_i32_0 : i32, i32
  }
  func.func @transform_19(%arg0: i32) -> (i32, i32) {
    %c0_i32 = arith.constant 0 : i32
    %c0_i32_0 = arith.constant 0 : i32
    %c0_i32_1 = arith.constant 0 : i32
    return %c0_i32, %c0_i32_0 : i32, i32
  }
  func.func @transform_20(%arg0: i32) -> (i32, i32) {
    %c0_i32 = arith.constant 0 : i32
    %c0_i32_0 = arith.constant 0 : i32
    %c0_i32_1 = arith.constant 0 : i32
    return %c0_i32, %c0_i32_0 : i32, i32
  }
  func.func @transform_21(%arg0: i32) -> (i32, i32) {
    %c0_i32 = arith.constant 0 : i32
    %c0_i32_0 = arith.constant 0 : i32
    %c0_i32_1 = arith.constant 0 : i32
    return %c0_i32, %c0_i32_0 : i32, i32
  }
  func.func @transform_22(%arg0: i32) -> (i32, i32) {
    %c0_i32 = arith.constant 0 : i32
    %c0_i32_0 = arith.constant 0 : i32
    %c0_i32_1 = arith.constant 0 : i32
    return %c0_i32, %c0_i32_0 : i32, i32
  }
  func.func @transform_23(%arg0: i32) -> (i32, i32) {
    %c0_i32 = arith.constant 0 : i32
    %c0_i32_0 = arith.constant 0 : i32
    %c0_i32_1 = arith.constant 0 : i32
    return %c0_i32, %c0_i32_0 : i32, i32
  }
  func.func @transform_24(%arg0: i32) -> (i32, i32) {
    %c0_i32 = arith.constant 0 : i32
    %c0_i32_0 = arith.constant 0 : i32
    %c0_i32_1 = arith.constant 0 : i32
    return %c0_i32, %c0_i32_0 : i32, i32
  }
  func.func @transform_25(%arg0: i32) -> (i32, i32) {
    %c0_i32 = arith.constant 0 : i32
    %c0_i32_0 = arith.constant 0 : i32
    %c0_i32_1 = arith.constant 0 : i32
    return %c0_i32, %c0_i32_0 : i32, i32
  }
  func.func @transform_26(%arg0: i32) -> (i32, i32, i32) {
    %c0_i32 = arith.constant 0 : i32
    %c0_i32_0 = arith.constant 0 : i32
    %c0_i32_1 = arith.constant 0 : i32
    return %arg0, %c0_i32, %c0_i32_0 : i32, i32, i32
  }
}

</mosaic_0001>

<bundles_post_ra>
// kernel: _lambda_.1
= control target key start
LH: loop header
LB: loop body
LE: loop exit
PB: predicated region body
PF: predicated region fallthrough
CT: control target
= control target key end

     0   :  { %s8393_s0 = inlined_call_operand.vmem [shape: f32[32,8], index: 0, kind: input, shape index: {}]   ;;  %s8394_s1 = inlined_call_operand.vmem [shape: f32[8,16], index: 1, kind: input, shape index: {}]   ;;  %s8395_s2 = inlined_call_operand.vmem [shape: f32[1,16], index: 2, kind: input, shape index: {}]   ;;  %s8396_s3 = inlined_call_operand.vmem [shape: f32[24,16,16], index: 3, kind: input, shape index: {}]   ;;  %s8397_s4 = inlined_call_operand.vmem [shape: f32[8,1,16], index: 4, kind: input, shape index: {}]   ;;  %s8398_s5 = inlined_call_operand.vmem [shape: f32[16,8], index: 5, kind: input, shape index: {}]   ;;  %s8399_s6 = inlined_call_operand.vmem [shape: f32[1,8], index: 6, kind: input, shape index: {}]   ;;  %s8400_s7 = inlined_call_operand.vmem [shape: f32[4,8,32], index: 7, kind: input, shape index: {}]   ;;  %s8401_s8 = inlined_call_operand.vmem [shape: f32[8,8], index: 8, kind: input, shape index: {}]   ;;  %s8402_s9 = inlined_call_operand.vmem [shape: f32[1,8], index: 9, kind: input, shape index: {}]   ;;  %s8403_s10 = inlined_call_operand.vmem [shape: f32[8,8], index: 10, kind: input, shape index: {}]   ;;  %s8404_s11 = inlined_call_operand.vmem [shape: f32[1,8], index: 11, kind: input, shape index: {}]   ;;  %s8405_s12 = inlined_call_operand.vmem [shape: f32[8,8], index: 12, kind: input, shape index: {}]   ;;  %s8406_s13 = inlined_call_operand.vmem [shape: f32[1,8], index: 13, kind: input, shape index: {}]   ;;  %s8407_s14 = inlined_call_operand.vmem [shape: f32[4,8,32], index: 14, kind: input, shape index: {}]   ;;  %s8408_s15 = inlined_call_operand.vmem [shape: f32[1,32], index: 15, kind: input, shape index: {}]   ;;  %s8409_s16 = inlined_call_operand.vmem [shape: f32[1,32], index: 16, kind: input, shape index: {}]   ;;  %s8410_s17 = inlined_call_operand.vmem [shape: f32[1,32], index: 17, kind: input, shape index: {}]   ;;  %s8411_s18 = inlined_call_operand.vmem [shape: f32[32,32], index: 18, kind: input, shape index: {}]   ;;  %s8412_s19 = inlined_call_operand.vmem [shape: f32[1,32], index: 19, kind: input, shape index: {}]   ;;  %s8413_s20 = inlined_call_operand.vmem [shape: f32[32,32], index: 20, kind: input, shape index: {}]   ;;  %s8414_s21 = inlined_call_operand.vmem [shape: f32[1,32], index: 21, kind: input, shape index: {}]   ;;  %s8415_s22 = inlined_call_operand.vmem [shape: f32[1,32], index: 22, kind: input, shape index: {}]   ;;  %s8416_s23 = inlined_call_operand.<no memory space> [shape: f32[1,1], index: 23, kind: input, shape index: {}]   ;;  %s8417_s24 = inlined_call_operand.vmem [shape: f32[16,3], index: 24, kind: input, shape index: {}]   ;;  %s8418_s25 = inlined_call_operand.vmem [shape: f32[1,3], index: 25, kind: input, shape index: {}]   ;;  %s8419_s26 = inlined_call_operand.hbm [shape: f32[2,1,3], index: 26, kind: output, shape index: {}]  }
   0x1   :  { %8441 = sst [smem:[#allocation13_spill]] %s8393_s0  ;;  %v31_v0 = vstv %s8416_s23 }
   0x2   :  { %8442 = sst [smem:[#allocation14_spill]] %s8394_s1  ;;  %32 = vst [vmem:[#allocation2] sm:$0x1] %v31_v0 }
   0x3   :  { %8443 = sst [smem:[#allocation15_spill]] %s8395_s2 }
   0x4   :  { %8444 = sst [smem:[#allocation16_spill]] %s8396_s3 }
   0x5   :  { %8445 = sst [smem:[#allocation17_spill]] %s8397_s4 }
   0x6   :  { %8446 = sst [smem:[#allocation18_spill]] %s8398_s5 }
   0x7   :  { %8447 = sst [smem:[#allocation19_spill]] %s8399_s6 }
   0x8   :  { %8448 = sst [smem:[#allocation20_spill]] %s8400_s7 }
   0x9   :  { %8449 = sst [smem:[#allocation21_spill]] %s8401_s8 }
   0xa   :  { %8450 = sst [smem:[#allocation22_spill]] %s8402_s9 }
   0xb   :  { %8451 = sst [smem:[#allocation23_spill]] %s8403_s10 }
   0xc   :  { %8452 = sst [smem:[#allocation24_spill]] %s8404_s11 }
   0xd   :  { %8453 = sst [smem:[#allocation25_spill]] %s8405_s12 }
   0xe   :  { %8454 = sst [smem:[#allocation26_spill]] %s8418_s25 }
   0xf   :  { %8455 = sst [smem:[#allocation27_spill]] %s8419_s26 }
  0x10   :  { %33 = vsyncpa [#allocation4], 0 }
  0x11   :  { %35 = vsyncpa [#allocation4 + $0x1], 0  ;;  %s7554_s7 = smov 0   ;;  %s7556_s28 = smov 0  }
  0x12   :  { %s7558_s8 = smov 0   ;;  %s7560_s4 = smov 0  }
  0x13 LB: > { %8456 = sst [smem:[#allocation6_spill]] %s7398_s7  ;;  %s7575_s23 = sadd.s32 4294967295, %s7410_s4   ;;  %s7410_s4 = sphi %s7560_s4, %s8487_s4   ;;  %s7406_s8 = sphi %s7558_s8, %s8489_s8   ;;  %s7402_s28 = sphi %s7556_s28, %s8491_s28   ;;  %s7398_s7 = sphi %s7554_s7, %s8490_s7  }
  0x14   : > { %8457 = sst [smem:[#allocation7_spill]] %s7406_s8  ;;  %s6388_s29 = sadd.s32 4294967294, %s7410_s4  }
  0x15   : > { %8458 = sst [smem:[#allocation8_spill]] %s7410_s4  ;;  %s7579_s0 = sadd.s32 1, %s7410_s4  }
  0x16   : > { %8459 = sst [smem:[#allocation9_spill]] %s7579_s0  ;;  %s599_s9 = sadd.s32 1, %s7406_s8 }
  0x17   : > { %s596_s30 = ssub.s32 %s7410_s4, %s7579_s0  ;;  %p609_p0 = scmp.ne.s32.totalorder %s7406_s8, %s7402_s28 }
  0x18   : > { %p597_p1 = scmp.eq.s32.totalorder %s596_s30, 0  ;;  %p610_p2 = scmp.eq.s32.totalorder %s7575_s23, 1 }
  0x19   : > { %p615_p3 = scmp.ne.s32.totalorder %s7402_s28, %s7398_s7  ;;  %p616_p4 = scmp.eq.s32.totalorder %s6388_s29, 1 }
  0x1a   : > { %s7590_s2 = scalar_select %p597_p1, %s7406_s8, %s599_s9  }
  0x1b   : > { %p7592_p5 = por %p610_p2, %p609_p0  ;;  %p7596_p6 = por %p616_p4, %p615_p3 }
  0x1c   : > { %8460 = sst [smem:[#allocation10_spill]] %s7590_s2  ;;  %p6391_p7 = scmp.ge.s32.totalorder %s7410_s4, 1 }
  0x1d   : > { %s8461_s5 = scalar_select %p7592_p5, 1, 0 }
  0x1e   : > { %s8463_s10 = scalar_select %p7596_p6, 1, 0 }
  0x1f   : > { %8462 = sst [smem:[#allocation11_spill]] %s8461_s5  ;;  %p718_p8 = scmp.lt.s32.totalorder %s7410_s4, 3 }
  0x20   : > { %8464 = sst [smem:[#allocation12_spill]] %s8463_s10 }
  0x21   : > { %p719_p9 = pnand %p6391_p7, %p718_p8 }
  0x22   : > { %s8465_s27 = sld [smem:[#allocation14_spill]] (!%p719_p9)  ;;  %s6392_s3 = sshll.u32 (!%p719_p9), %s7575_s23, 1 }
  0x23   : > { %722 = sbr.rel (%p719_p9) target bundleno = 7917 (0x1eed), region = 124  ;;  %p788_p10 = scmp.lt.s32.totalorder (!%p719_p9), %s6392_s3, 3 }
  0x24   : > { %s8466_s2 = sld [smem:[#allocation13_spill]] (!%p719_p9)  ;;  %s6605_s4 = sshll.u32 (!%p719_p9), %s7575_s23, 4 }
  0x25   : > { %s8468_s6 = sld [smem:[#allocation15_spill]] (!%p719_p9)  ;;  %s7415_s23 = smov (!%p719_p9), [#allocation3]  }
  0x26   : > { %s8471_s0 = sld [smem:[#allocation23_spill]] (!%p719_p9) }
  0x27   : > { %s8473_s12 = sld [smem:[#allocation25_spill]] (!%p719_p9) }
  0x28   : > { %v795_v1 = vld [vmem:[%s8465_s27] sm:$0xff]  ;;  %s8493_s3 = smov (!%p788_p10, %s6392_s3), 3  ;;  %vm803_vm0 = vcmask 64512   ;;  %s8467_s27 = sld [smem:[#allocation16_spill]]  ;;  %v887_v9 = vlaneseq  ;;  %vm921_vm1 = vcmask 130048   ;;  %vm5888_vm13 = vcmask 261120  }
  0x29   : > { %6833 = vmatprep.subr.mxu0 %v795_v1  ;;  %s6393_s29 = sshll.u32 %s8493_s3, 3  ;;  %s8472_s3 = sld [smem:[#allocation21_spill]]  ;;  %vm7413_vm14 = vmmov 0   ;;  %vm6318_vm15 = vcmask 16384  }
  0x2a   : > { %6834 = vmatpush3.msra.mxu0 %v795_v1  ;;  %s791_s8 = scalar_lea.vmem %s8466_s2, %s6393_s29  ;;  %v7629_v11 = vshrl.u32 %v887_v9, 7  ;;  %s8469_s29 = sld [smem:[#allocation17_spill]] }
  0x2b   : > { %v793_v2 = vld [vmem:[%s791_s8] sm:$0xff]  ;;  %v794_v3 = vld [vmem:[%s791_s8 + $0x8] sm:$0xff]  ;;  %s8474_s7 = sld [smem:[#allocation19_spill]]  ;;  %s785_s2 = sand.u32 1, %s7402_s28  }
  0x2c   : > { %6835 = vmatprep.mubr.msk.f32.mxu0 %vm803_vm0, %v793_v2  ;;  %v6394_v10 = vld [vmem:[%s8468_s6] ss:$0 sm:$0xff]  ;;  %v7632_v15 = vadd.s32 8, %v7629_v11  ;;  %vm907_vm2 = vcmp.lt.s32.totalorder %v7629_v11, 7  ;;  %vm890_vm3 = vcmp.ge.s32.totalorder %v7629_v11, 1  ;;  %vm896_vm4 = vcmp.lt.s32.totalorder %v7629_v11, 1 }
  0x2d   : > { %6836 = vmatmul.mubr.msk.f32.vlgmr.msra.gmra.mxu0 %vm803_vm0, %v794_v3  ;;  %s8470_s6 = sld [smem:[#allocation18_spill]]  ;;  %vm2018_vm6 = vcmp.lt.s32.totalorder %v7629_v11, 2  ;;  %vm2012_vm7 = vcmp.ge.s32.totalorder %v7629_v11, 2  ;;  %vm2029_vm8 = vcmp.lt.s32.totalorder %v7629_v11, 6  ;;  %vm3416_vm10 = vcmp.lt.s32.totalorder %v7629_v11, 4 }
  0x2e   : > { %v6398_v4 = vld [vmem:[%s8467_s27 + $0x18] sm:$0xff]  ;;  %v6397_v5 = vld [vmem:[%s8467_s27 + $0x10] sm:$0xff]  ;;  %v917_v6 = vld [vmem:[%s8467_s27 + $0x8] sm:$0xff]  ;;  %vm893_vm5 = vcmp.lt.s32.totalorder %v7632_v15, 15  ;;  %s8476_s11 = sld [smem:[#allocation24_spill]]  ;;  %vm2015_vm9 = vcmp.lt.s32.totalorder %v7632_v15, 14 }
  0x2f   : > { %6838 = vmatprep.subr.mxu1 %v6398_v4  ;;  %v6404_v7 = vld [vmem:[%s8467_s27 + $0x28] sm:$0xff]  ;;  %6845 = vmatprep.subr.mxu0 %v917_v6  ;;  %v916_v8 = vld [vmem:[%s8467_s27] sm:$0xff]  ;;  %v6409_v32 = vld [vmem:[%s8467_s27 + $0x38] sm:$0xff]  ;;  %s8477_s8 = sld [smem:[#allocation22_spill]]  ;;  %vm3410_vm11 = vcmp.ge.s32.totalorder %v7629_v11, 4  ;;  %vm3413_vm12 = vcmp.lt.s32.totalorder %v7632_v15, 12 }
  0x30   : > { %6839 = vmatpush3.msra.mxu1 %v6398_v4  ;;  %6846 = vmatpush3.msra.mxu0 %v917_v6  ;;  %v6403_v19 = vld [vmem:[%s8467_s27 + $0x20] sm:$0xff]  ;;  %v6411_v30 = vld [vmem:[%s8467_s27 + $0x48] sm:$0xff]  ;;  %v6417_v33 = vld [vmem:[%s8467_s27 + $0x58] sm:$0xff]  ;;  %s8482_s5 = sld [smem:[#allocation26_spill]] }
  0x31   : > { %6840 = vmatprep.subr.mxu1 %v6397_v5  ;;  %6847 = vmatprep.subr.mxu0 %v916_v8  ;;  %v6410_v31 = vld [vmem:[%s8467_s27 + $0x40] sm:$0xff]  ;;  %v6408_v34 = vld [vmem:[%s8467_s27 + $0x30] sm:$0xff]  ;;  %s8475_s26 = smov %s8474_s7 }
  0x32   : > { %6841 = vmatpush3.msra.mxu1 %v6397_v5  ;;  %6848 = vmatpush3.msra.mxu0 %v916_v8  ;;  %v6407_v40 = vld [vmem:[%s8469_s29] ss:$0 sm:$0xff]  ;;  %v6416_v54 = vld [vmem:[%s8467_s27 + $0x50] sm:$0xff]  ;;  %v6421_v4 = vld [vmem:[%s8469_s29 + $0x1] ss:$0 sm:$0xff] }
  0x33   : > { %6852 = vmatprep.subr.mxu1 %v6404_v7  ;;  %6859 = vmatprep.subr.mxu0 %v6411_v30  ;;  %v7711_v61 = vld [vmem:[%s8470_s6 + $0x8] sm:$0xff]  ;;  %v7716_v62 = vld [vmem:[%s8470_s6] sm:$0xff] }
  0x35   : > { %s8478_s9 = smov %s8477_s8 }
  0xed   : > { %v6837_v12 = vpop.f32.mrf.mxu0 }
  0xee   : > { %v882_v13 = vadd.f32 %v6837_v12, %v6394_v10 }
  0xef   : > { %v876_v14 = vpop.f32.mrf.mxu0 }
  0xf0   : > { %v7634_v16 = vmax.f32 %v882_v13, 0.0  ;;  %v877_v17 = vadd.f32 %v6394_v10, %v876_v14 }
  0xf2   : > { %v7636_v18 = vmax.f32 %v877_v17, 0.0  ;;  %v906_v21 = vrot.slane %v7634_v16, 1  ;;  %v895_v23 = vrot.slane %v7634_v16, 7 }
  0xf4   : > { %6842 = vmatprep.mubr.msk.f32.mxu1 %vm921_vm1, %v7636_v18  ;;  %v905_v20 = vrot.slane %v7636_v18, 1  ;;  %v894_v22 = vrot.slane %v7636_v18, 7 }
  0xf5   : > { %6843 = vmatmul.mubr.msk.f32.vlgmr.msra.gmra.mxu1 %vm921_vm1, %v7634_v16 }
  0xf6   : > { %6853 = vmatpush3.msra.mxu1 %v6404_v7  ;;  %v908_v24 = vsel %vm907_vm2, %v905_v20, %v906_v21  ;;  %v898_v25 = vsel %vm896_vm4, %v895_v23, %v894_v22  ;;  %v909_v26 = vsel %vm907_vm2, %v906_v21, %v905_v20  ;;  %v897_v29 = vsel %vm896_vm4, %v894_v22, %v895_v23 }
  0xf7   : > { %6854 = vmatprep.subr.mxu1 %v6403_v19  ;;  %6856 = vmatprep.mubr.msk.f32.mxu1 %vm921_vm1, %v908_v24  ;;  %v903_v27 = vsel %vm890_vm3, %v898_v25, 0.0  ;;  %v915_v28 = vsel %vm893_vm5, %v909_v26, 0.0 }
  0xf8   : > { %6849 = vmatprep.mubr.msk.f32.mxu0 %vm921_vm1, %v903_v27  ;;  %6855 = vmatpush3.msra.mxu1 %v6403_v19 }
  0xf9   : > { %6850 = vmatmul.mubr.msk.f32.vlgmr.msra.gmra.mxu0 %vm921_vm1, %v897_v29  ;;  %6857 = vmatmul.mubr.msk.f32.vlgmr.msra.gmra.mxu1 %vm921_vm1, %v915_v28  ;;  %v7738_v28 = vld [vmem:[%s8471_s0] sm:$0xff] }
  0xfa   : > { %6860 = vmatpush3.msra.mxu0 %v6411_v30  ;;  %6866 = vmatprep.subr.mxu1 %v6409_v32  ;;  %v7758_v30 = vld [vmem:[%s8474_s7] ss:$0 sm:$0xff] }
  0xfb   : > { %6861 = vmatprep.subr.mxu0 %v6410_v31  ;;  %6867 = vmatpush3.msra.mxu1 %v6409_v32 }
  0xfc   : > { %6862 = vmatpush3.msra.mxu0 %v6410_v31  ;;  %6868 = vmatprep.subr.mxu1 %v6408_v34 }
  0xfd   : > { %6873 = vmatprep.subr.mxu0 %v6417_v33  ;;  %6869 = vmatpush3.msra.mxu1 %v6408_v34  ;;  %v7782_v34 = vld [vmem:[%s8476_s11] ss:$0 sm:$0xff] }
  0xfe   : > { %6880 = vmatprep.subr.mxu1 %v7711_v61 }
 0x1b5   : > { %v6844_v35 = vpop.f32.mrf.mxu1 }
 0x1b7   : > { %v994_v36 = vpop.f32.mrf.mxu1 }
 0x1b9   : > { %v6851_v37 = vpop.f32.mrf.mxu0  ;;  %v6858_v38 = vpop.f32.mrf.mxu1 }
 0x1ba   : > { %v1081_v39 = vadd.f32 %v6851_v37, %v6844_v35 }
 0x1bb   : > { %v1075_v41 = vpop.f32.mrf.mxu0  ;;  %v1159_v44 = vpop.f32.mrf.mxu1 }
 0x1bc   : > { %v1169_v42 = vadd.f32 %v6858_v38, %v1081_v39  ;;  %v1076_v43 = vadd.f32 %v1075_v41, %v994_v36  ;;  %v7788_v38 = vld [vmem:[%s8477_s8] ss:$0 sm:$0xff]  ;;  %s8479_s8 = sld [smem:[#allocation20_spill]] }
 0x1bd   : > { %v7793_v41 = vld [vmem:[%s8406_s13] ss:$0 sm:$0xff] }
 0x1be   : > { %v1178_v45 = vadd.f32 %v6407_v40, %v1169_v42  ;;  %v1168_v46 = vadd.f32 %v1159_v44, %v1076_v43 }
 0x1c0   : > { %v1180_v47 = vmax.f32 %v1178_v45, 0.0  ;;  %v1177_v48 = vadd.f32 %v6407_v40, %v1168_v46 }
 0x1c2   : > { %v1179_v49 = vmax.f32 %v1177_v48, 0.0  ;;  %v1182_v50 = vrot.slane %v1180_v47, 7  ;;  %v1188_v51 = vrot.slane %v1180_v47, 1  ;;  %v6443_v48 = vld [vmem:[%s8467_s27 + $0x68] sm:$0xff]  ;;  %s8480_s30 = smov %s8479_s8 }
 0x1c4   : > { %v1181_v52 = vrot.slane %v1179_v49, 7  ;;  %v1187_v53 = vrot.slane %v1179_v49, 1  ;;  %6863 = vmatprep.mubr.msk.f32.mxu0 %vm921_vm1, %v1179_v49 }
 0x1c5   : > { %6864 = vmatmul.mubr.msk.f32.vlgmr.msra.gmra.mxu0 %vm921_vm1, %v1180_v47 }
 0x1c6   : > { %6874 = vmatpush3.msra.mxu0 %v6417_v33  ;;  %v1189_v55 = vsel %vm907_vm2, %v1187_v53, %v1188_v51  ;;  %v1184_v56 = vsel %vm896_vm4, %v1182_v50, %v1181_v52  ;;  %v1190_v57 = vsel %vm907_vm2, %v1188_v51, %v1187_v53  ;;  %v1183_v60 = vsel %vm896_vm4, %v1181_v52, %v1182_v50  ;;  %v6442_v53 = vld [vmem:[%s8467_s27 + $0x60] sm:$0xff] }
 0x1c7   : > { %6875 = vmatprep.subr.mxu0 %v6416_v54  ;;  %6877 = vmatprep.mubr.msk.f32.mxu0 %vm921_vm1, %v1189_v55  ;;  %v1185_v58 = vsel %vm890_vm3, %v1184_v56, 0.0  ;;  %v1192_v59 = vsel %vm893_vm5, %v1190_v57, 0.0 }
 0x1c8   : > { %6870 = vmatprep.mubr.msk.f32.mxu1 %vm921_vm1, %v1185_v58  ;;  %6876 = vmatpush3.msra.mxu0 %v6416_v54 }
 0x1c9   : > { %6871 = vmatmul.mubr.msk.f32.vlgmr.msra.gmra.mxu1 %vm921_vm1, %v1183_v60  ;;  %6878 = vmatmul.mubr.msk.f32.vlgmr.msra.gmra.mxu0 %vm921_vm1, %v1192_v59 }
 0x1ca   : > { %6881 = vmatpush3.msra.mxu1 %v7711_v61 }
 0x1cb   : > { %6882 = vmatprep.subr.mxu1 %v7716_v62 }
 0x1cc   : > { %6883 = vmatpush3.msra.mxu1 %v7716_v62 }
 0x1cd   : > { %6892 = vmatprep.subr.mxu1 %v7738_v28 }
 0x285   : > { %v6865_v63 = vpop.f32.mrf.mxu0 }
 0x287   : > { %v1271_v0 = vpop.f32.mrf.mxu0 }
 0x289   : > { %v6872_v1 = vpop.f32.mrf.mxu1  ;;  %v6879_v2 = vpop.f32.mrf.mxu0 }
 0x28a   : > { %v1358_v3 = vadd.f32 %v6872_v1, %v6865_v63 }
 0x28b   : > { %v1352_v5 = vpop.f32.mrf.mxu1  ;;  %v1436_v8 = vpop.f32.mrf.mxu0 }
 0x28c   : > { %v1446_v6 = vadd.f32 %v6879_v2, %v1358_v3  ;;  %v1353_v7 = vadd.f32 %v1352_v5, %v1271_v0 }
 0x28e   : > { %v1456_v9 = vadd.f32 %v6421_v4, %v1446_v6  ;;  %v1445_v10 = vadd.f32 %v1436_v8, %v1353_v7 }
 0x290   : > { %v1458_v12 = vmax.f32 %v1456_v9, 0.0  ;;  %v1455_v13 = vadd.f32 %v6421_v4, %v1445_v10  ;;  %v6445_v10 = vld [vmem:[%s8467_s27 + $0x78] sm:$0xff] }
 0x292   : > { %v6423_v14 = vmul.f32 -1.442695, %v1458_v12  ;;  %v1457_v17 = vmax.f32 %v1455_v13, 0.0 }
 0x294   : > { %7269 = vpow2.f32 %v6423_v14  ;;  %v6422_v19 = vmul.f32 -1.442695, %v1457_v17 }
 0x296   : > { %7271 = vpow2.f32 %v6422_v19 }
 0x2a1   : > { %v7270_v20 = vpop.eup %7269 }
 0x2a2   : > { %v1466_v21 = vadd.f32 1.0, %v7270_v20 }
 0x2a3   : > { %v7272_v22 = vpop.eup %7271 }
 0x2a4   : > { %v1465_v23 = vadd.f32 1.0, %v7272_v22  ;;  %7273 = vrcp.f32 %v1466_v21  ;;  %v6444_v21 = vld [vmem:[%s8467_s27 + $0x70] sm:$0xff] }
 0x2a6   : > { %7275 = vrcp.f32 %v1465_v23  ;;  %v6451_v23 = vld [vmem:[%s8467_s27 + $0x88] sm:$0xff] }
 0x2b1   : > { %v7274_v24 = vpop.eup %7273 }
 0x2b2   : > { %v7729_v27 = vmul.f32 %v7274_v24, %v7634_v16  ;;  %v7745_v16 = vld [vmem:[%s8472_s3] sm:$0xff] }
 0x2b3   : > { %v7276_v25 = vpop.eup %7275  ;;  %6887 = vmatprep.subr.mxu0 %v7745_v16 }
 0x2b4   : > { %v7726_v26 = vmul.f32 %v7276_v25, %v7636_v18  ;;  %6888 = vmatpush3.msra.mxu0 %v7745_v16  ;;  %v7752_v18 = vld [vmem:[%s8473_s12] sm:$0xff]  ;;  %v2017_v49 = vrot.slane %v7729_v27, 6  ;;  %v2028_v24 = vrot.slane %v7729_v27, 2 }
 0x2b5   : > { %6897 = vmatprep.subr.mxu0 %v7752_v18  ;;  %v6450_v25 = vld [vmem:[%s8467_s27 + $0x80] sm:$0xff] }
 0x2b6   : > { %6884 = vmatprep.mubr.msk.f32.mxu1 %vm921_vm1, %v7726_v26  ;;  %v2016_v45 = vrot.slane %v7726_v26, 6  ;;  %v2027_v22 = vrot.slane %v7726_v26, 2 }
 0x2b7   : > { %6885 = vmatmul.mubr.msk.f32.vlgmr.msra.gmra.mxu1 %vm921_vm1, %v7729_v27 }
 0x2b8   : > { %6893 = vmatpush3.msra.mxu1 %v7738_v28  ;;  %v2020_v51 = vsel %vm2018_vm6, %v2017_v49, %v2016_v45  ;;  %v2019_v55 = vsel %vm2018_vm6, %v2016_v45, %v2017_v49 }
 0x2b9   : > { %v2025_v54 = vsel %vm2012_vm7, %v2020_v51, 0.0  ;;  %v6455_v51 = vld [vmem:[%s8469_s29 + $0x2] ss:$0 sm:$0xff] }
 0x377   : > { %v6886_v29 = vpop.f32.mrf.mxu1 }
 0x378   : > { %v7764_v33 = vadd.f32 %v6886_v29, %v7758_v30  ;;  %v2030_v29 = vsel %vm2029_vm8, %v2027_v22, %v2028_v24 }
 0x379   : > { %v1554_v31 = vpop.f32.mrf.mxu1 }
 0x37a   : > { %v7761_v32 = vadd.f32 %v7758_v30, %v1554_v31  ;;  %v2031_v31 = vsel %vm2029_vm8, %v2028_v24, %v2027_v22 }
 0x37c   : > { %6889 = vmatprep.mubr.msk.f32.mxu0 %vm803_vm0, %v7761_v32  ;;  %6894 = vmatprep.mubr.msk.f32.mxu1 %vm803_vm0, %v7761_v32 }
 0x37d   : > { %6890 = vmatmul.mubr.msk.f32.vlgmr.msra.gmra.mxu0 %vm803_vm0, %v7764_v33  ;;  %6895 = vmatmul.mubr.msk.f32.vlgmr.msra.gmra.mxu1 %vm803_vm0, %v7764_v33 }
 0x37e   : > { %6899 = vmatprep.mubr.msk.f32.mxu0 %vm803_vm0, %v7761_v32  ;;  %6898 = vmatpush3.msra.mxu0 %v7752_v18 }
 0x381   : > { %6900 = vmatmul.mubr.msk.f32.vlgmr.msra.gmra.mxu0 %vm803_vm0, %v7764_v33 }
 0x43d   : > { %v6891_v35 = vpop.f32.mrf.mxu0  ;;  %v6896_v36 = vpop.f32.mrf.mxu1 }
 0x43e   : > { %v1733_v37 = vadd.f32 %v6896_v36, %v7782_v34  ;;  %v1650_v52 = vadd.f32 %v6891_v35, %v7788_v38  ;;  %v2037_v35 = vsel %vm2015_vm9, %v2031_v31, 0.0  ;;  %v6459_v36 = vld [vmem:[%s8467_s27 + $0xa8] sm:$0xff] }
 0x43f   : > { %v1644_v39 = vpop.f32.mrf.mxu0  ;;  %v1727_v40 = vpop.f32.mrf.mxu1 }
 0x440   : > { %v1645_v42 = vadd.f32 %v7788_v38, %v1644_v39  ;;  %v1728_v43 = vadd.f32 %v7782_v34, %v1727_v40  ;;  %6902 = vmatprep.subr.msk.mxu1 %vm803_vm0, %v1733_v37  ;;  %v6457_v39 = vld [vmem:[%s8467_s27 + $0x98] sm:$0xff] }
 0x441   : > { %v6901_v44 = vpop.f32.mrf.mxu0  ;;  %6903 = vmatpush3.xpose.msk.msra.mxu1 %vm803_vm0, %v1733_v37  ;;  %v6458_v37 = vld [vmem:[%s8467_s27 + $0xa0] sm:$0xff]  ;;  %v6465_v40 = vld [vmem:[%s8467_s27 + $0xb8] sm:$0xff] }
 0x442   : > { %v1816_v46 = vadd.f32 %v6901_v44, %v7793_v41  ;;  %6904 = vmatprep.subr.msk.mxu1 %vm803_vm0, %v1728_v43  ;;  %6906 = vmatprep.mubr.msk.f32.mxu1 %vm803_vm0, %v1645_v42  ;;  %v6456_v42 = vld [vmem:[%s8467_s27 + $0x90] sm:$0xff] }
 0x443   : > { %v1810_v47 = vpop.f32.mrf.mxu0 }
 0x444   : > { %v1811_v50 = vadd.f32 %v7793_v41, %v1810_v47  ;;  %6909 = vmatprep.subr.mxu0 %v1816_v46 }
 0x445   : > { %6905 = vmatpush3.xpose.msk.msra.mxu1 %vm803_vm0, %v1728_v43  ;;  %6910 = vmatpush3.msra.mxu0 %v1816_v46 }
 0x446   : > { %6911 = vmatprep.subr.mxu0 %v1811_v50  ;;  %6923 = vmatprep.subr.mxu1 %v6443_v48 }
 0x447   : > { %6912 = vmatpush3.msra.mxu0 %v1811_v50 }
 0x448   : > { %6907 = vmatmul.mubr.msk.f32.vlgmr.msra.gmra.mxu1 %vm803_vm0, %v1650_v52  ;;  %6916 = vmatprep.subr.mxu0 %v6445_v10 }
 0x449   : > { %6924 = vmatpush3.msra.mxu1 %v6443_v48  ;;  %6927 = vmatprep.mubr.msk.f32.mxu1 %vm921_vm1, %v2025_v54 }
 0x44a   : > { %6925 = vmatprep.subr.mxu1 %v6442_v53 }
 0x44b   : > { %6926 = vmatpush3.msra.mxu1 %v6442_v53 }
 0x44c   : > { %6928 = vmatmul.mubr.msk.f32.vlgmr.msra.gmra.mxu1 %vm921_vm1, %v2019_v55  ;;  %6937 = vmatprep.subr.mxu1 %v6459_v36 }
 0x44d   : > { %6938 = vmatpush3.msra.mxu1 %v6459_v36 }
 0x44e   : > { %6939 = vmatprep.subr.mxu1 %v6458_v37 }
 0x44f   : > { %6940 = vmatpush3.msra.mxu1 %v6458_v37 }
 0x450   : > { %6951 = vmatprep.subr.mxu1 %v6465_v40 }
 0x508   : > { %v6908_v56 = vpop.f32.mrf.mxu1 }
 0x509   : > { %v1907_v59 = vmul.f32 0.17677669, %v6908_v56 }
 0x50a   : > { %v1897_v57 = vpop.f32.mrf.mxu1 }
 0x50b   : > { %v1906_v58 = vmul.f32 0.17677669, %v1897_v57  ;;  %v1911_v63 = vsel %vm921_vm1, %v1907_v59, -inf }
 0x50c   : > { %v6929_v45 = vpop.f32.mrf.mxu1 }
 0x50d   : > { %v1908_v60 = vsel %vm921_vm1, %v1906_v58, -inf }
 0x50e   : > { %1909 = vmax.xlane.f32.xlu0 %v1908_v60  ;;  %v2191_v49 = vpop.f32.mrf.mxu1 }
 0x512   : > { %1912 = vmax.xlane.f32.xlu0 %v1911_v63 }
 0x597   : > { %v1910_v0 = vpop.xlane.xlu0 %1909 }
 0x598   : > { %v1914_v1 = vsub.f32 %v1906_v58, %v1910_v0 }
 0x59a   : > { %v1916_v2 = vmul.f32 1.442695, %v1914_v1 }
 0x59b   : > { %v1913_v3 = vpop.xlane.xlu0 %1912 }
 0x59c   : > { %7277 = vpow2.f32 %v1916_v2  ;;  %v1915_v4 = vsub.f32 %v1907_v59, %v1913_v3  ;;  %v6464_v2 = vld [vmem:[%s8467_s27 + $0xb0] sm:$0xff] }
 0x59e   : > { %v1918_v5 = vmul.f32 1.442695, %v1915_v4 }
 0x5a0   : > { %7279 = vpow2.f32 %v1918_v5 }
 0x5a9   : > { %v7278_v6 = vpop.eup %7277 }
 0x5aa   : > { %v1920_v7 = vsel %vm921_vm1, %v7278_v6, 0.0 }
 0x5ab   : > { %1921 = vadd.xlane.f32.xlu1 %v1920_v7 }
 0x5ad   : > { %v7280_v8 = vpop.eup %7279 }
 0x5ae   : > { %v1923_v9 = vsel %vm921_vm1, %v7280_v8, 0.0 }
 0x5af   : > { %1924 = vadd.xlane.f32.xlu1 %v1923_v9  ;;  %v1563_v9 = vld [vmem:[%s8479_s8] sm:$0xff]  ;;  %s7354_s8 = sshll.u32 %s7415_s23, 4  ;;  %s7355_s8 = int_to_ptr.vmem [resolvable:$false] %s7354_s8 }
 0x5b0   : > { %s7356_s25 = scalar_lea.vmem %s7355_s8, 32 }
 0x634   : > { %v1922_v12 = vpop.xlane.xlu1 %1921 }
 0x635   : > { %7281 = vrcp.f32 %v1922_v12 }
 0x638   : > { %v1925_v13 = vpop.xlane.xlu1 %1924 }
 0x639   : > { %7283 = vrcp.f32 %v1925_v13 }
 0x642   : > { %v7282_v14 = vpop.eup %7281 }
 0x643   : > { %v1927_v17 = vmul.f32 %v7282_v14, %v7278_v6 }
 0x645   : > { %6913 = vmatprep.mubr.msk.f32.mxu0 %vm921_vm1, %v1927_v17 }
 0x646   : > { %v7284_v19 = vpop.eup %7283 }
 0x647   : > { %v1929_v20 = vmul.f32 %v7284_v19, %v7280_v8  ;;  %v6469_v19 = vld [vmem:[%s8469_s29 + $0x3] ss:$0 sm:$0xff] }
 0x649   : > { %6914 = vmatmul.mubr.msk.f32.vlgmr.msra.gmra.mxu0 %vm921_vm1, %v1929_v20 }
 0x64a   : > { %6917 = vmatpush3.msra.mxu0 %v6445_v10  ;;  %6920 = vmatprep.mubr.msk.f32.mxu0 %vm921_vm1, %v7726_v26 }
 0x64b   : > { %6918 = vmatprep.subr.mxu0 %v6444_v21 }
 0x64c   : > { %6919 = vmatpush3.msra.mxu0 %v6444_v21 }
 0x64d   : > { %6930 = vmatprep.subr.mxu0 %v6451_v23  ;;  %6921 = vmatmul.mubr.msk.f32.vlgmr.msra.gmra.mxu0 %vm921_vm1, %v7729_v27 }
 0x64e   : > { %6931 = vmatpush3.msra.mxu0 %v6451_v23  ;;  %6934 = vmatprep.mubr.msk.f32.mxu0 %vm921_vm1, %v2030_v29 }
 0x64f   : > { %6932 = vmatprep.subr.mxu0 %v6450_v25 }
 0x650   : > { %6933 = vmatpush3.msra.mxu0 %v6450_v25 }
 0x651   : > { %6935 = vmatmul.mubr.msk.f32.vlgmr.msra.gmra.mxu0 %vm921_vm1, %v2037_v35  ;;  %6944 = vmatprep.subr.mxu0 %v6457_v39 }
 0x652   : > { %6945 = vmatpush3.msra.mxu0 %v6457_v39 }
 0x653   : > { %6946 = vmatprep.subr.mxu0 %v6456_v42 }
 0x654   : > { %6947 = vmatpush3.msra.mxu0 %v6456_v42 }
 0x655   : > { %6958 = vmatprep.subr.mxu0 %v7711_v61 }
 0x709   : > { %v7874_v43 = vpop.f32.mrf.mxu0 }
 0x70b   : > { %v7876_v44 = vpop.f32.mrf.mxu0 }
 0x70d   : > { %v6922_v46 = vpop.f32.mrf.mxu0 }
 0x70e   : > { %v2197_v48 = vadd.f32 %v6929_v45, %v6922_v46 }
 0x70f   : > { %v2110_v47 = vpop.f32.mrf.mxu0 }
 0x710   : > { %v2192_v52 = vadd.f32 %v2191_v49, %v2110_v47 }
 0x711   : > { %v6936_v50 = vpop.f32.mrf.mxu0 }
 0x712   : > { %v2285_v53 = vadd.f32 %v6936_v50, %v2197_v48 }
 0x713   : > { %v2275_v54 = vpop.f32.mrf.mxu0 }
 0x714   : > { %v2295_v55 = vadd.f32 %v6455_v51, %v2285_v53  ;;  %v2284_v56 = vadd.f32 %v2275_v54, %v2192_v52 }
 0x716   : > { %v2297_v57 = vmax.f32 %v2295_v55, 0.0  ;;  %v2294_v58 = vadd.f32 %v6455_v51, %v2284_v56 }
 0x718   : > { %v2296_v59 = vmax.f32 %v2294_v58, 0.0  ;;  %v2299_v60 = vrot.slane %v2297_v57, 6  ;;  %v2305_v63 = vrot.slane %v2297_v57, 2 }
 0x71a   : > { %v2298_v0 = vrot.slane %v2296_v59, 6  ;;  %v2304_v1 = vrot.slane %v2296_v59, 2  ;;  %6941 = vmatprep.mubr.msk.f32.mxu1 %vm921_vm1, %v2296_v59 }
 0x71b   : > { %6942 = vmatmul.mubr.msk.f32.vlgmr.msra.gmra.mxu1 %vm921_vm1, %v2297_v57 }
 0x71c   : > { %6952 = vmatpush3.msra.mxu1 %v6465_v40  ;;  %v2306_v3 = vsel %vm2029_vm8, %v2304_v1, %v2305_v63  ;;  %v2301_v4 = vsel %vm2018_vm6, %v2299_v60, %v2298_v0  ;;  %v2307_v5 = vsel %vm2029_vm8, %v2305_v63, %v2304_v1  ;;  %v2300_v8 = vsel %vm2018_vm6, %v2298_v0, %v2299_v60  ;;  %v2011_v0 = vld [vmem:[%s8407_s14] sm:$0xff] }
 0x71d   : > { %6953 = vmatprep.subr.mxu1 %v6464_v2  ;;  %6955 = vmatprep.mubr.msk.f32.mxu1 %vm921_vm1, %v2306_v3  ;;  %v2302_v6 = vsel %vm2012_vm7, %v2301_v4, 0.0  ;;  %v2309_v7 = vsel %vm2015_vm9, %v2307_v5, 0.0 }
 0x71e   : > { %6948 = vmatprep.mubr.msk.f32.mxu0 %vm921_vm1, %v2302_v6  ;;  %6954 = vmatpush3.msra.mxu1 %v6464_v2 }
 0x71f   : > { %6949 = vmatmul.mubr.msk.f32.vlgmr.msra.gmra.mxu0 %vm921_vm1, %v2300_v8  ;;  %6956 = vmatmul.mubr.msk.f32.vlgmr.msra.gmra.mxu1 %vm921_vm1, %v2309_v7 }
 0x720   : > { %6959 = vmatpush3.msra.mxu0 %v7711_v61 }
 0x721   : > { %6960 = vmatprep.subr.mxu0 %v7716_v62 }
 0x722   : > { %6961 = vmatpush3.msra.mxu0 %v7716_v62 }
 0x723   : > { %6970 = vmatprep.subr.mxu0 %v1563_v9 }
 0x7db   : > { %v6943_v10 = vpop.f32.mrf.mxu1 }
 0x7dd   : > { %v2388_v12 = vpop.f32.mrf.mxu1 }
 0x7df   : > { %v6950_v13 = vpop.f32.mrf.mxu0  ;;  %v6957_v14 = vpop.f32.mrf.mxu1 }
 0x7e0   : > { %v2475_v17 = vadd.f32 %v6950_v13, %v6943_v10 }
 0x7e1   : > { %v2469_v20 = vpop.f32.mrf.mxu0  ;;  %v2553_v23 = vpop.f32.mrf.mxu1 }
 0x7e2   : > { %v2563_v21 = vadd.f32 %v6957_v14, %v2475_v17  ;;  %v2470_v22 = vadd.f32 %v2469_v20, %v2388_v12  ;;  %v6496_v12 = vld [vmem:[%s8467_s27 + $0xc0] sm:$0xff] }
 0x7e4   : > { %v2573_v24 = vadd.f32 %v6469_v19, %v2563_v21  ;;  %v2562_v25 = vadd.f32 %v2553_v23, %v2470_v22 }
 0x7e6   : > { %v2575_v29 = vmax.f32 %v2573_v24, 0.0  ;;  %v2572_v31 = vadd.f32 %v6469_v19, %v2562_v25 }
 0x7e8   : > { %v6471_v35 = vmul.f32 -1.442695, %v2575_v29  ;;  %v2574_v36 = vmax.f32 %v2572_v31, 0.0 }
 0x7ea   : > { %7285 = vpow2.f32 %v6471_v35  ;;  %v6470_v37 = vmul.f32 -1.442695, %v2574_v36 }
 0x7ec   : > { %7287 = vpow2.f32 %v6470_v37 }
 0x7f7   : > { %v7286_v39 = vpop.eup %7285 }
 0x7f8   : > { %v2583_v40 = vadd.f32 1.0, %v7286_v39 }
 0x7f9   : > { %v7288_v42 = vpop.eup %7287 }
 0x7fa   : > { %v2582_v45 = vadd.f32 1.0, %v7288_v42  ;;  %7289 = vrcp.f32 %v2583_v40  ;;  %v6491_v40 = vld [vmem:[%s8407_s14 + $0x8] sm:$0xff] }
 0x7fc   : > { %7291 = vrcp.f32 %v2582_v45 }
 0x807   : > { %v7290_v46 = vpop.eup %7289 }
 0x808   : > { %v7915_v49 = vmul.f32 %v7290_v46, %v7729_v27 }
 0x809   : > { %v7292_v47 = vpop.eup %7291 }
 0x80a   : > { %v7912_v48 = vmul.f32 %v7292_v47, %v7726_v26  ;;  %v6474_v26 = vld [vmem:[%s8480_s30 + $0x8] sm:$0xff]  ;;  %v3415_v7 = vrot.slane %v7915_v49, 4 }
 0x80b   : > { %6965 = vmatprep.subr.mxu1 %v6474_v26 }
 0x80c   : > { %6962 = vmatprep.mubr.msk.f32.mxu0 %vm921_vm1, %v7912_v48  ;;  %6966 = vmatpush3.msra.mxu1 %v6474_v26  ;;  %v3414_v3 = vrot.slane %v7912_v48, 4 }
 0x80d   : > { %6963 = vmatmul.mubr.msk.f32.vlgmr.msra.gmra.mxu0 %vm921_vm1, %v7915_v49  ;;  %6975 = vmatprep.subr.mxu1 %v7745_v16 }
 0x80e   : > { %6972 = vmatprep.mubr.msk.f32.mxu0 %vm803_vm0, %v7761_v32  ;;  %6971 = vmatpush3.msra.mxu0 %v1563_v9  ;;  %v6497_v9 = vld [vmem:[%s8467_s27 + $0xc8] sm:$0xff]  ;;  %v7976_v10 = vsel %vm3416_vm10, %v3415_v7, %v3414_v3  ;;  %v3417_v13 = vsel %vm3416_vm10, %v3414_v3, %v3415_v7 }
 0x80f   : > { %6980 = vmatprep.subr.mxu0 %v7738_v28 }
 0x811   : > { %6973 = vmatmul.mubr.msk.f32.vlgmr.msra.gmra.mxu0 %vm803_vm0, %v7764_v33 }
 0x812   : > { %6981 = vmatpush3.msra.mxu0 %v7738_v28 }
 0x8cd   : > { %v6964_v27 = vpop.f32.mrf.mxu0 }
 0x8ce   : > { %v2668_v51 = vadd.f32 %v6964_v27, %v7758_v30 }
 0x8cf   : > { %v2662_v50 = vpop.f32.mrf.mxu0 }
 0x8d0   : > { %v2663_v32 = vadd.f32 %v7758_v30, %v2662_v50  ;;  %v6499_v50 = vld [vmem:[%s8467_s27 + $0xd8] sm:$0xff] }
 0x8d1   : > { %v7944_v33 = vpop.f32.mrf.mxu0 }
 0x8d2   : > { %6967 = vmatprep.mubr.msk.f32.mxu1 %vm803_vm0, %v2663_v32  ;;  %6982 = vmatprep.mubr.msk.f32.mxu0 %vm803_vm0, %v2663_v32 }
 0x8d3   : > { %6968 = vmatmul.mubr.msk.f32.vlgmr.msra.gmra.mxu1 %vm803_vm0, %v2668_v51  ;;  %6983 = vmatmul.mubr.msk.f32.vlgmr.msra.gmra.mxu0 %vm803_vm0, %v2668_v51  ;;  %v2820_v52 = vpop.f32.mrf.mxu0 }
 0x8d4   : > { %6976 = vmatpush3.msra.mxu1 %v7745_v16  ;;  %6977 = vmatprep.mubr.msk.f32.mxu1 %vm803_vm0, %v2663_v32 }
 0x8d5   : > { %6985 = vmatprep.subr.mxu1 %v7752_v18 }
 0x8d7   : > { %6978 = vmatmul.mubr.msk.f32.vlgmr.msra.gmra.mxu1 %vm803_vm0, %v2668_v51 }
 0x8d8   : > { %6987 = vmatprep.mubr.msk.f32.mxu1 %vm803_vm0, %v2663_v32  ;;  %6986 = vmatpush3.msra.mxu1 %v7752_v18 }
 0x8db   : > { %6988 = vmatmul.mubr.msk.f32.vlgmr.msra.gmra.mxu1 %vm803_vm0, %v2668_v51 }
 0x993   : > { %v7946_v53 = vpop.f32.mrf.mxu1  ;;  %v6984_v54 = vpop.f32.mrf.mxu0 }
 0x994   : > { %v2976_v55 = vadd.f32 %v6984_v54, %v7782_v34  ;;  %v6505_v54 = vld [vmem:[%s8467_s27 + $0xe8] sm:$0xff] }
 0x995   : > { %v2745_v56 = vpop.f32.mrf.mxu1  ;;  %v2970_v57 = vpop.f32.mrf.mxu0 }
 0x996   : > { %v7949_v58 = vadd.f32 %v2820_v52, %v2745_v56  ;;  %v2971_v59 = vadd.f32 %v7782_v34, %v2970_v57  ;;  %6990 = vmatprep.subr.msk.mxu0 %vm803_vm0, %v2976_v55  ;;  %v6498_v52 = vld [vmem:[%s8467_s27 + $0xd0] sm:$0xff]  ;;  %v3430_v56 = vsel %vm3413_vm12, %v7976_v10, 0.0  ;;  %v6513_v57 = vld [vmem:[%s8467_s27 + $0x108] sm:$0xff] }
 0x997   : > { %v6979_v60 = vpop.f32.mrf.mxu1  ;;  %6991 = vmatpush3.xpose.msk.msra.mxu0 %vm803_vm0, %v2976_v55  ;;  %v6504_v55 = vld [vmem:[%s8467_s27 + $0xe0] sm:$0xff] }
 0x998   : > { %6992 = vmatprep.subr.msk.mxu0 %vm803_vm0, %v2971_v59  ;;  %v2901_v4 = vadd.f32 %v6979_v60, %v7788_v38  ;;  %v6511_v60 = vld [vmem:[%s8467_s27 + $0xf8] sm:$0xff] }
 0x999   : > { %v2895_v63 = vpop.f32.mrf.mxu1 }
 0x99a   : > { %v2896_v1 = vadd.f32 %v7788_v38, %v2895_v63  ;;  %v6519_v63 = vld [vmem:[%s8467_s27 + $0x118] sm:$0xff] }
 0x99b   : > { %v6989_v2 = vpop.f32.mrf.mxu1  ;;  %6993 = vmatpush3.xpose.msk.msra.mxu0 %vm803_vm0, %v2971_v59  ;;  %v6512_v59 = vld [vmem:[%s8467_s27 + $0x100] sm:$0xff] }
 0x99c   : > { %v3051_v5 = vadd.f32 %v6989_v2, %v7793_v41  ;;  %6994 = vmatprep.mubr.msk.f32.mxu0 %vm803_vm0, %v2896_v1  ;;  %7009 = vmatprep.subr.mxu0 %v2011_v0 }
 0x99d   : > { %v3045_v6 = vpop.f32.mrf.mxu1 }
 0x99e   : > { %v3046_v8 = vadd.f32 %v7793_v41, %v3045_v6  ;;  %6995 = vmatmul.mubr.msk.f32.vlgmr.msra.gmra.mxu0 %vm803_vm0, %v2901_v4  ;;  %6997 = vmatprep.subr.mxu1 %v3051_v5 }
 0x99f   : > { %6998 = vmatpush3.msra.mxu1 %v3051_v5  ;;  %7011 = vmatprep.mubr.msk.f32.mxu0 %vm803_vm0, %v7876_v44  ;;  %v3423_v44 = vsel %vm3410_vm11, %v7976_v10, 0.0 }
 0x9a0   : > { %6999 = vmatprep.subr.mxu1 %v3046_v8  ;;  %7010 = vmatpush3.msra.mxu0 %v2011_v0  ;;  %v6510_v0 = vld [vmem:[%s8467_s27 + $0xf0] sm:$0xff] }
 0x9a1   : > { %7000 = vmatpush3.msra.mxu1 %v3046_v8  ;;  %7021 = vmatprep.subr.mxu0 %v6497_v9 }
 0x9a2   : > { %7012 = vmatmul.mubr.msk.f32.vlgmr.msra.gmra.mxu0 %vm803_vm0, %v7874_v43  ;;  %7004 = vmatprep.subr.mxu1 %v6491_v40 }
 0x9a3   : > { %7022 = vmatpush3.msra.mxu0 %v6497_v9  ;;  %7025 = vmatprep.mubr.msk.f32.mxu0 %vm921_vm1, %v3423_v44 }
 0x9a4   : > { %7023 = vmatprep.subr.mxu0 %v6496_v12 }
 0x9a5   : > { %7024 = vmatpush3.msra.mxu0 %v6496_v12  ;;  %v6509_v12 = vld [vmem:[%s8469_s29 + $0x4] ss:$0 sm:$0xff] }
 0x9a6   : > { %7026 = vmatmul.mubr.msk.f32.vlgmr.msra.gmra.mxu0 %vm921_vm1, %v3417_v13  ;;  %7035 = vmatprep.subr.mxu0 %v6513_v57 }
 0x9a7   : > { %7036 = vmatpush3.msra.mxu0 %v6513_v57 }
 0x9a8   : > { %7037 = vmatprep.subr.mxu0 %v6512_v59 }
 0x9a9   : > { %7038 = vmatpush3.msra.mxu0 %v6512_v59 }
 0x9aa   : > { %7049 = vmatprep.subr.mxu0 %v6519_v63 }
 0xa5e   : > { %v6996_v14 = vpop.f32.mrf.mxu0 }
 0xa5f   : > { %v3142_v17 = vmul.f32 0.17677669, %v6996_v14 }
 0xa60   : > { %v3132_v19 = vpop.f32.mrf.mxu0 }
 0xa61   : > { %v3141_v20 = vmul.f32 0.17677669, %v3132_v19  ;;  %v3146_v43 = vsel %vm921_vm1, %v3142_v17, -inf }
 0xa62   : > { %3147 = vmax.xlane.f32.xlu1 %v3146_v43  ;;  %v8039_v1 = vpop.f32.mrf.mxu0 }
 0xa63   : > { %v3143_v21 = vsel %vm921_vm1, %v3141_v20, -inf }
 0xa64   : > { %3144 = vmax.xlane.f32.xlu0 %v3143_v21  ;;  %v8041_v2 = vpop.f32.mrf.mxu0 }
 0xa66   : > { %v7027_v5 = vpop.f32.mrf.mxu0 }
 0xa68   : > { %v3584_v9 = vpop.f32.mrf.mxu0 }
 0xaeb   : > { %v3148_v22 = vpop.xlane.xlu1 %3147 }
 0xaec   : > { %v3150_v23 = vsub.f32 %v3142_v17, %v3148_v22 }
 0xaed   : > { %v3145_v24 = vpop.xlane.xlu0 %3144 }
 0xaee   : > { %v3153_v25 = vmul.f32 1.442695, %v3150_v23  ;;  %v3149_v29 = vsub.f32 %v3141_v20, %v3145_v24  ;;  %v6518_v24 = vld [vmem:[%s8467_s27 + $0x110] sm:$0xff] }
 0xaf0   : > { %7293 = vpow2.f32 %v3153_v25  ;;  %v3151_v31 = vmul.f32 1.442695, %v3149_v29 }
 0xaf2   : > { %7295 = vpow2.f32 %v3151_v31 }
 0xafd   : > { %v7294_v35 = vpop.eup %7293 }
 0xafe   : > { %v3158_v36 = vsel %vm921_vm1, %v7294_v35, 0.0 }
 0xaff   : > { %v7296_v37 = vpop.eup %7295  ;;  %3159 = vadd.xlane.f32.xlu1 %v3158_v36 }
 0xb00   : > { %v3155_v39 = vsel %vm921_vm1, %v7296_v37, 0.0 }
 0xb01   : > { %3156 = vadd.xlane.f32.xlu0 %v3155_v39 }
 0xb88   : > { %v3160_v42 = vpop.xlane.xlu1 %3159 }
 0xb89   : > { %7297 = vrcp.f32 %v3160_v42  ;;  %v6523_v42 = vld [vmem:[%s8469_s29 + $0x5] ss:$0 sm:$0xff] }
 0xb8a   : > { %v3157_v45 = vpop.xlane.xlu0 %3156 }
 0xb8b   : > { %7299 = vrcp.f32 %v3157_v45 }
 0xb96   : > { %v7298_v46 = vpop.eup %7297 }
 0xb97   : > { %v3164_v27 = vmul.f32 %v7298_v46, %v7294_v35 }
 0xb98   : > { %v7300_v47 = vpop.eup %7299 }
 0xb99   : > { %v3162_v26 = vmul.f32 %v7300_v47, %v7296_v37 }
 0xb9b   : > { %7001 = vmatprep.mubr.msk.f32.mxu1 %vm921_vm1, %v3162_v26 }
 0xb9c   : > { %7002 = vmatmul.mubr.msk.f32.vlgmr.msra.gmra.mxu1 %vm921_vm1, %v3164_v27 }
 0xb9d   : > { %7005 = vmatpush3.msra.mxu1 %v6491_v40 }
 0xb9e   : > { %7014 = vmatprep.subr.mxu1 %v6499_v50 }
 0xc5c   : > { %v7003_v32 = vpop.f32.mrf.mxu1 }
 0xc5e   : > { %v3237_v51 = vpop.f32.mrf.mxu1 }
 0xc5f   : > { %7006 = vmatprep.mubr.msk.f32.mxu1 %vm803_vm0, %v3237_v51 }
 0xc60   : > { %7007 = vmatmul.mubr.msk.f32.vlgmr.msra.gmra.mxu1 %vm803_vm0, %v7003_v32 }
 0xc61   : > { %7015 = vmatpush3.msra.mxu1 %v6499_v50  ;;  %7018 = vmatprep.mubr.msk.f32.mxu1 %vm921_vm1, %v7912_v48 }
 0xc62   : > { %7016 = vmatprep.subr.mxu1 %v6498_v52 }
 0xc63   : > { %7017 = vmatpush3.msra.mxu1 %v6498_v52 }
 0xc64   : > { %7028 = vmatprep.subr.mxu1 %v6505_v54  ;;  %7019 = vmatmul.mubr.msk.f32.vlgmr.msra.gmra.mxu1 %vm921_vm1, %v7915_v49 }
 0xc65   : > { %7029 = vmatpush3.msra.mxu1 %v6505_v54  ;;  %7032 = vmatprep.mubr.msk.f32.mxu1 %vm921_vm1, %v3417_v13 }
 0xc66   : > { %7030 = vmatprep.subr.mxu1 %v6504_v55 }
 0xc67   : > { %7031 = vmatpush3.msra.mxu1 %v6504_v55 }
 0xc68   : > { %7033 = vmatmul.mubr.msk.f32.vlgmr.msra.gmra.mxu1 %vm921_vm1, %v3430_v56  ;;  %7042 = vmatprep.subr.mxu1 %v6511_v60 }
 0xc69   : > { %7043 = vmatpush3.msra.mxu1 %v6511_v60 }
 0xc6a   : > { %7044 = vmatprep.subr.mxu1 %v6510_v0 }
 0xc6b   : > { %7045 = vmatpush3.msra.mxu1 %v6510_v0 }
 0xc6c   : > { %7056 = vmatprep.subr.mxu1 %v7711_v61 }
 0xd20   : > { %v8043_v3 = vpop.f32.mrf.mxu1 }
 0xd22   : > { %v8045_v4 = vpop.f32.mrf.mxu1 }
 0xd24   : > { %v7020_v6 = vpop.f32.mrf.mxu1 }
 0xd25   : > { %v3590_v8 = vadd.f32 %v7027_v5, %v7020_v6  ;;  %v6528_v5 = vld [vmem:[%s8480_s30 + $0x10] sm:$0xff] }
 0xd26   : > { %v3503_v7 = vpop.f32.mrf.mxu1 }
 0xd27   : > { %v3585_v44 = vadd.f32 %v3584_v9, %v3503_v7 }
 0xd28   : > { %v7034_v10 = vpop.f32.mrf.mxu1 }
 0xd29   : > { %v3678_v13 = vadd.f32 %v7034_v10, %v3590_v8 }
 0xd2a   : > { %v3668_v14 = vpop.f32.mrf.mxu1 }
 0xd2b   : > { %v3688_v17 = vadd.f32 %v6509_v12, %v3678_v13  ;;  %v3677_v19 = vadd.f32 %v3668_v14, %v3585_v44 }
 0xd2d   : > { %v3690_v20 = vmax.f32 %v3688_v17, 0.0  ;;  %v3687_v43 = vadd.f32 %v6509_v12, %v3677_v19 }
 0xd2f   : > { %v3689_v21 = vmax.f32 %v3687_v43, 0.0  ;;  %v3692_v22 = vrot.slane %v3690_v20, 4 }
 0xd31   : > { %v3691_v23 = vrot.slane %v3689_v21, 4  ;;  %7039 = vmatprep.mubr.msk.f32.mxu0 %vm921_vm1, %v3689_v21 }
 0xd32   : > { %7040 = vmatmul.mubr.msk.f32.vlgmr.msra.gmra.mxu0 %vm921_vm1, %v3690_v20 }
 0xd33   : > { %7050 = vmatpush3.msra.mxu0 %v6519_v63  ;;  %v3693_v25 = vsel %vm3416_vm10, %v3691_v23, %v3692_v22  ;;  %v3694_v29 = vsel %vm3416_vm10, %v3692_v22, %v3691_v23 }
 0xd34   : > { %7051 = vmatprep.subr.mxu0 %v6518_v24  ;;  %7053 = vmatprep.mubr.msk.f32.mxu0 %vm921_vm1, %v3693_v25  ;;  %v3695_v31 = vsel %vm3410_vm11, %v3694_v29, 0.0  ;;  %v3698_v35 = vsel %vm3413_vm12, %v3694_v29, 0.0 }
 0xd35   : > { %7046 = vmatprep.mubr.msk.f32.mxu1 %vm921_vm1, %v3695_v31  ;;  %7052 = vmatpush3.msra.mxu0 %v6518_v24 }
 0xd36   : > { %7047 = vmatmul.mubr.msk.f32.vlgmr.msra.gmra.mxu1 %vm921_vm1, %v3693_v25  ;;  %7054 = vmatmul.mubr.msk.f32.vlgmr.msra.gmra.mxu0 %vm921_vm1, %v3698_v35 }
 0xd37   : > { %7057 = vmatpush3.msra.mxu1 %v7711_v61  ;;  %7063 = vmatprep.subr.mxu0 %v6528_v5 }
 0xd38   : > { %7058 = vmatprep.subr.mxu1 %v7716_v62  ;;  %7064 = vmatpush3.msra.mxu0 %v6528_v5  ;;  %v6558_v5 = vld [vmem:[%s8467_s27 + $0x150] sm:$0xff] }
 0xd39   : > { %7059 = vmatpush3.msra.mxu1 %v7716_v62  ;;  %7073 = vmatprep.subr.mxu0 %v7738_v28 }
 0xd3a   : > { %7068 = vmatprep.subr.mxu1 %v7745_v16 }
 0xdf2   : > { %v7041_v36 = vpop.f32.mrf.mxu0 }
 0xdf4   : > { %v3777_v37 = vpop.f32.mrf.mxu0 }
 0xdf6   : > { %v7048_v39 = vpop.f32.mrf.mxu1  ;;  %v7055_v15 = vpop.f32.mrf.mxu0 }
 0xdf7   : > { %v3864_v40 = vadd.f32 %v7048_v39, %v7041_v36 }
 0xdf8   : > { %v3858_v45 = vpop.f32.mrf.mxu1  ;;  %v3942_v26 = vpop.f32.mrf.mxu0 }
 0xdf9   : > { %v3952_v46 = vadd.f32 %v7055_v15, %v3864_v40  ;;  %v3859_v47 = vadd.f32 %v3858_v45, %v3777_v37  ;;  %v6543_v45 = vld [vmem:[%s8407_s14 + $0x10] sm:$0xff] }
 0xdfb   : > { %v3962_v61 = vadd.f32 %v6523_v42, %v3952_v46  ;;  %v3951_v27 = vadd.f32 %v3942_v26, %v3859_v47 }
 0xdfd   : > { %v3964_v50 = vmax.f32 %v3962_v61, 0.0  ;;  %v3961_v32 = vadd.f32 %v6523_v42, %v3951_v27 }
 0xdff   : > { %v6525_v62 = vmul.f32 -1.442695, %v3964_v50  ;;  %v3963_v51 = vmax.f32 %v3961_v32, 0.0  ;;  %v6547_v32 = vld [vmem:[%s8467_s27 + $0x128] sm:$0xff] }
 0xe01   : > { %7301 = vpow2.f32 %v6525_v62  ;;  %v6524_v52 = vmul.f32 -1.442695, %v3963_v51  ;;  %v6554_v62 = vld [vmem:[%s8467_s27 + $0x148] sm:$0xff]  ;;  %v6553_v51 = vld [vmem:[%s8467_s27 + $0x140] sm:$0xff] }
 0xe03   : > { %7303 = vpow2.f32 %v6524_v52  ;;  %v7412_v52 = vmov 0.0  }
 0xe0e   : > { %v7302_v54 = vpop.eup %7301 }
 0xe0f   : > { %v3972_v55 = vadd.f32 1.0, %v7302_v54 }
 0xe10   : > { %v7304_v56 = vpop.eup %7303 }
 0xe11   : > { %v3971_v57 = vadd.f32 1.0, %v7304_v56  ;;  %7305 = vrcp.f32 %v3972_v55  ;;  %v6546_v56 = vld [vmem:[%s8467_s27 + $0x120] sm:$0xff] }
 0xe13   : > { %7307 = vrcp.f32 %v3971_v57  ;;  %v6559_v57 = vld [vmem:[%s8467_s27 + $0x158] sm:$0xff] }
 0xe1e   : > { %v7306_v59 = vpop.eup %7305 }
 0xe1f   : > { %v8078_v0 = vmul.f32 %v7306_v59, %v7915_v49  ;;  %v6561_v59 = vld [vmem:[%s8467_s27 + $0x168] sm:$0xff] }
 0xe20   : > { %v7308_v60 = vpop.eup %7307 }
 0xe21   : > { %v8075_v63 = vmul.f32 %v7308_v60, %v7912_v48  ;;  %v6560_v60 = vld [vmem:[%s8467_s27 + $0x160] sm:$0xff] }
 0xe23   : > { %7060 = vmatprep.mubr.msk.f32.mxu1 %vm921_vm1, %v8075_v63 }
 0xe24   : > { %7061 = vmatmul.mubr.msk.f32.vlgmr.msra.gmra.mxu1 %vm921_vm1, %v8078_v0 }
 0xe25   : > { %7069 = vmatpush3.msra.mxu1 %v7745_v16  ;;  %v2826_v16 = vadd.f32 %v7944_v33, %v7946_v53 }
 0xe26   : > { %7078 = vmatprep.subr.mxu1 %v7752_v18 }
 0xee4   : > { %v7062_v48 = vpop.f32.mrf.mxu1 }
 0xee5   : > { %v4057_v7 = vadd.f32 %v7062_v48, %v7758_v30  ;;  %v6566_v48 = vld [vmem:[%s8467_s27 + $0x178] sm:$0xff] }
 0xee6   : > { %v4051_v49 = vpop.f32.mrf.mxu1 }
 0xee7   : > { %v4052_v6 = vadd.f32 %v7758_v30, %v4051_v49  ;;  %v7341_v49 = vld [vmem:[%s8470_s6 + $0x8] sm:$0xff] }
 0xee9   : > { %7065 = vmatprep.mubr.msk.f32.mxu0 %vm803_vm0, %v4052_v6  ;;  %7070 = vmatprep.mubr.msk.f32.mxu1 %vm803_vm0, %v4052_v6 }
 0xeea   : > { %7066 = vmatmul.mubr.msk.f32.vlgmr.msra.gmra.mxu0 %vm803_vm0, %v4057_v7  ;;  %7071 = vmatmul.mubr.msk.f32.vlgmr.msra.gmra.mxu1 %vm803_vm0, %v4057_v7 }
 0xeeb   : > { %7074 = vmatpush3.msra.mxu0 %v7738_v28  ;;  %7075 = vmatprep.mubr.msk.f32.mxu0 %vm803_vm0, %v4052_v6 }
 0xeec   : > { %7080 = vmatprep.mubr.msk.f32.mxu1 %vm803_vm0, %v4052_v6  ;;  %7079 = vmatpush3.msra.mxu1 %v7752_v18 }
 0xeee   : > { %7076 = vmatmul.mubr.msk.f32.vlgmr.msra.gmra.mxu0 %vm803_vm0, %v4057_v7  ;;  %7081 = vmatmul.mubr.msk.f32.vlgmr.msra.gmra.mxu1 %vm803_vm0, %v4057_v7  ;;  %v3407_v7 = vadd.f32 %v8039_v1, %v8043_v3 }
 0xfaa   : > { %v7067_v30 = vpop.f32.mrf.mxu0  ;;  %v7072_v8 = vpop.f32.mrf.mxu1 }
 0xfab   : > { %v8104_v9 = vadd.f32 %v7067_v30, %v2826_v16  ;;  %v3402_v30 = vadd.f32 %v8041_v2, %v8045_v4 }
 0xfac   : > { %v4134_v10 = vpop.f32.mrf.mxu0  ;;  %v4211_v12 = vpop.f32.mrf.mxu1 }
 0xfad   : > { %v8107_v28 = vadd.f32 %v4134_v10, %v7949_v58  ;;  %v4212_v44 = vadd.f32 %v7788_v38, %v4211_v12  ;;  %v6549_v58 = vld [vmem:[%s8467_s27 + $0x138] sm:$0xff] }
 0xfae   : > { %v7077_v13 = vpop.f32.mrf.mxu0  ;;  %v7082_v18 = vpop.f32.mrf.mxu1 }
 0xfaf   : > { %v4292_v14 = vadd.f32 %v7077_v13, %v7782_v34  ;;  %v4367_v17 = vadd.f32 %v7082_v18, %v7793_v41  ;;  %7087 = vmatprep.mubr.msk.f32.mxu0 %vm803_vm0, %v4212_v44 }
 0xfb0   : > { %v4286_v33 = vpop.f32.mrf.mxu0  ;;  %v4361_v53 = vpop.f32.mrf.mxu1 }
 0xfb1   : > { %v4287_v19 = vadd.f32 %v7782_v34, %v4286_v33  ;;  %v4362_v20 = vadd.f32 %v7793_v41, %v4361_v53  ;;  %7083 = vmatprep.subr.msk.mxu0 %vm803_vm0, %v4292_v14  ;;  %7090 = vmatprep.subr.mxu1 %v4367_v17  ;;  %v4217_v34 = vadd.f32 %v7072_v8, %v7788_v38  ;;  %v6548_v41 = vld [vmem:[%s8467_s27 + $0x130] sm:$0xff]  ;;  %v6557_v53 = vld [vmem:[%s8469_s29 + $0x6] ss:$0 sm:$0xff] }
 0xfb2   : > { %7084 = vmatpush3.xpose.msk.msra.mxu0 %vm803_vm0, %v4292_v14  ;;  %7091 = vmatpush3.msra.mxu1 %v4367_v17 }
 0xfb3   : > { %7085 = vmatprep.subr.msk.mxu0 %vm803_vm0, %v4287_v19  ;;  %7092 = vmatprep.subr.mxu1 %v4362_v20 }
 0xfb4   : > { %7093 = vmatpush3.msra.mxu1 %v4362_v20 }
 0xfb5   : > { %7097 = vmatprep.subr.mxu1 %v6543_v45 }
 0xfb6   : > { %7086 = vmatpush3.xpose.msk.msra.mxu0 %vm803_vm0, %v4287_v19 }
 0xfb7   : > { %7102 = vmatprep.subr.mxu0 %v6549_v58 }
 0xfb9   : > { %7088 = vmatmul.mubr.msk.f32.vlgmr.msra.gmra.mxu0 %vm803_vm0, %v4217_v34  ;;  %v6565_v34 = vld [vmem:[%s8467_s27 + $0x170] sm:$0xff] }
 0xfba   : > { %7103 = vmatpush3.msra.mxu0 %v6549_v58  ;;  %7106 = vmatprep.mubr.msk.f32.mxu0 %vm921_vm1, %v8075_v63 }
 0xfbb   : > { %7104 = vmatprep.subr.mxu0 %v6548_v41 }
 0xfbc   : > { %7105 = vmatpush3.msra.mxu0 %v6548_v41  ;;  %v7342_v41 = vld [vmem:[%s8470_s6] sm:$0xff]  ;;  %s8483_s6 = sld [smem:[#allocation27_spill]] }
 0xfbd   : > { %7107 = vmatmul.mubr.msk.f32.vlgmr.msra.gmra.mxu0 %vm921_vm1, %v8078_v0  ;;  %7116 = vmatprep.subr.mxu0 %v6554_v62 }
 0xfbe   : > { %7120 = vmatprep.mubr.msk.f32.mxu0 %vm921_vm1, %v8078_v0  ;;  %7117 = vmatpush3.msra.mxu0 %v6554_v62 }
 0xfbf   : > { %7118 = vmatprep.subr.mxu0 %v6553_v51 }
 0xfc0   : > { %7119 = vmatpush3.msra.mxu0 %v6553_v51 }
 0xfc1   : > { %7121 = vmatmul.mubr.f32.vlgmr.msra.gmra.mxu0 %v7412_v52  ;;  %7130 = vmatprep.subr.mxu0 %v6559_v57 }
 0xfc2   : > { %7134 = vmatprep.mubr.f32.mxu0 %v7412_v52  ;;  %7131 = vmatpush3.msra.mxu0 %v6559_v57  ;;  %v7346_v57 = vld [vmem:[%s8475_s26] ss:$0 sm:$0xff] }
 0xfc3   : > { %7132 = vmatprep.subr.mxu0 %v6558_v5 }
 0xfc4   : > { %7133 = vmatpush3.msra.mxu0 %v6558_v5 }
 0xfc5   : > { %7144 = vmatprep.subr.mxu0 %v7341_v49 }
0x1079   : > { %v7089_v38 = vpop.f32.mrf.mxu0 }
0x107a   : > { %v4458_v43 = vmul.f32 0.17677669, %v7089_v38  ;;  %v7343_v38 = vld [vmem:[%s8472_s3] sm:$0xff] }
0x107b   : > { %v4448_v21 = vpop.f32.mrf.mxu0 }
0x107c   : > { %v4457_v22 = vmul.f32 0.17677669, %v4448_v21  ;;  %v4462_v23 = vsel %vm921_vm1, %v4458_v43, -inf }
0x107d   : > { %4463 = vmax.xlane.f32.xlu1 %v4462_v23  ;;  %v7108_v6 = vpop.f32.mrf.mxu0 }
0x107e   : > { %v4459_v24 = vsel %vm921_vm1, %v4457_v22, -inf }
0x107f   : > { %4460 = vmax.xlane.f32.xlu0 %v4459_v24  ;;  %v4735_v10 = vpop.f32.mrf.mxu0 }
0x1081   : > { %v7122_v18 = vpop.f32.mrf.mxu0 }
0x1083   : > { %v4900_v3 = vpop.f32.mrf.mxu0 }
0x1106   : > { %v4464_v25 = vpop.xlane.xlu1 %4463 }
0x1107   : > { %v4466_v29 = vsub.f32 %v4458_v43, %v4464_v25 }
0x1108   : > { %v4461_v31 = vpop.xlane.xlu0 %4460 }
0x1109   : > { %v4469_v35 = vmul.f32 1.442695, %v4466_v29  ;;  %v4465_v36 = vsub.f32 %v4457_v22, %v4461_v31  ;;  %v6569_v29 = vld [vmem:[%s8469_s29 + $0x7] ss:$0 sm:$0xff] }
0x110b   : > { %7309 = vpow2.f32 %v4469_v35  ;;  %v4467_v37 = vmul.f32 1.442695, %v4465_v36 }
0x110d   : > { %7311 = vpow2.f32 %v4467_v37 }
0x1118   : > { %v7310_v39 = vpop.eup %7309 }
0x1119   : > { %v4474_v15 = vsel %vm921_vm1, %v7310_v39, 0.0 }
0x111a   : > { %v7312_v40 = vpop.eup %7311  ;;  %4475 = vadd.xlane.f32.xlu1 %v4474_v15 }
0x111b   : > { %v4471_v42 = vsel %vm921_vm1, %v7312_v40, 0.0 }
0x111c   : > { %4472 = vadd.xlane.f32.xlu0 %v4471_v42 }
0x11a3   : > { %v4476_v46 = vpop.xlane.xlu1 %4475 }
0x11a4   : > { %7313 = vrcp.f32 %v4476_v46 }
0x11a5   : > { %v4473_v47 = vpop.xlane.xlu0 %4472 }
0x11a6   : > { %7315 = vrcp.f32 %v4473_v47 }
0x11b1   : > { %v7314_v26 = vpop.eup %7313 }
0x11b2   : > { %v4480_v50 = vmul.f32 %v7314_v26, %v7310_v39 }
0x11b3   : > { %v7316_v61 = vpop.eup %7315 }
0x11b4   : > { %v4478_v27 = vmul.f32 %v7316_v61, %v7312_v40 }
0x11b6   : > { %7094 = vmatprep.mubr.msk.f32.mxu1 %vm921_vm1, %v4478_v27 }
0x11b7   : > { %7095 = vmatmul.mubr.msk.f32.vlgmr.msra.gmra.mxu1 %vm921_vm1, %v4480_v50 }
0x11b8   : > { %7098 = vmatpush3.msra.mxu1 %v6543_v45 }
0x11b9   : > { %7109 = vmatprep.subr.mxu1 %v6547_v32 }
0x1277   : > { %v7096_v54 = vpop.f32.mrf.mxu1 }
0x1279   : > { %v4553_v55 = vpop.f32.mrf.mxu1 }
0x127a   : > { %7099 = vmatprep.mubr.msk.f32.mxu1 %vm803_vm0, %v4553_v55  ;;  %v6574_v55 = vld [vmem:[%s8480_s30 + $0x18] sm:$0xff] }
0x127b   : > { %7100 = vmatmul.mubr.msk.f32.vlgmr.msra.gmra.mxu1 %vm803_vm0, %v7096_v54  ;;  %v7344_v54 = vld [vmem:[%s8473_s12] sm:$0xff] }
0x127c   : > { %7110 = vmatpush3.msra.mxu1 %v6547_v32  ;;  %7113 = vmatprep.mubr.f32.mxu1 %v7412_v52 }
0x127d   : > { %7111 = vmatprep.subr.mxu1 %v6546_v56 }
0x127e   : > { %7112 = vmatpush3.msra.mxu1 %v6546_v56 }
0x127f   : > { %7114 = vmatmul.mubr.msk.f32.vlgmr.msra.gmra.mxu1 %vm921_vm1, %v8075_v63  ;;  %7123 = vmatprep.subr.mxu1 %v6561_v59 }
0x1280   : > { %7124 = vmatpush3.msra.mxu1 %v6561_v59 }
0x1281   : > { %7125 = vmatprep.subr.mxu1 %v6560_v60 }
0x1282   : > { %7126 = vmatpush3.msra.mxu1 %v6560_v60 }
0x1283   : > { %7137 = vmatprep.subr.mxu1 %v6566_v48 }
0x133b   : > { %v7101_v16 = vpop.f32.mrf.mxu1 }
0x133c   : > { %v8183_v8 = vadd.f32 %v7101_v16, %v3407_v7 }
0x133d   : > { %v4636_v12 = vpop.f32.mrf.mxu1 }
0x133e   : > { %v8185_v44 = vadd.f32 %v4636_v12, %v3402_v30  ;;  %v7347_v30 = vld [vmem:[%s8478_s9] ss:$0 sm:$0xff]  ;;  %s8358_s9 = scalar_lea.hbm %s8483_s6, %s6605_s4 }
0x133f   : > { %v7115_v13 = vpop.f32.mrf.mxu1 }
0x1340   : > { %v4822_v14 = vadd.f32 %v7115_v13, %v7108_v6 }
0x1341   : > { %v4816_v17 = vpop.f32.mrf.mxu1 }
0x1342   : > { %v4910_v33 = vadd.f32 %v7122_v18, %v4822_v14  ;;  %v4817_v1 = vadd.f32 %v4816_v17, %v4735_v10  ;;  %v7348_v18 = vld [vmem:[%s8476_s11] ss:$0 sm:$0xff]  ;;  %s6321_s11 = scalar_lea.sflag [#allocation4], %s785_s2 }
0x1344   : > { %v4909_v19 = vadd.f32 %v4900_v3, %v4817_v1  ;;  %v4920_v20 = vadd.f32 %v6557_v53, %v4910_v33 }
0x1346   : > { %v4919_v2 = vadd.f32 %v6557_v53, %v4909_v19  ;;  %v4922_v58 = vmax.f32 %v4920_v20, 0.0 }
0x1348   : > { %v4921_v4 = vmax.f32 %v4919_v2, 0.0 }
0x134a   : > { %7127 = vmatprep.mubr.msk.f32.mxu1 %vm921_vm1, %v4921_v4  ;;  %7135 = vmatmul.mubr.msk.f32.vlgmr.msra.gmra.mxu0 %vm921_vm1, %v4921_v4 }
0x134b   : > { %7128 = vmatmul.mubr.msk.f32.vlgmr.msra.gmra.mxu1 %vm921_vm1, %v4922_v58  ;;  %7145 = vmatpush3.msra.mxu0 %v7341_v49 }
0x134c   : > { %7138 = vmatpush3.msra.mxu1 %v6566_v48  ;;  %7141 = vmatprep.mubr.msk.f32.mxu1 %vm921_vm1, %v4922_v58 }
0x134d   : > { %7139 = vmatprep.subr.mxu1 %v6565_v34  ;;  %7146 = vmatprep.subr.mxu0 %v7342_v41 }
0x134e   : > { %7140 = vmatpush3.msra.mxu1 %v6565_v34  ;;  %7147 = vmatpush3.msra.mxu0 %v7342_v41 }
0x134f   : > { %7142 = vmatmul.mubr.f32.vlgmr.msra.gmra.mxu1 %v7412_v52  ;;  %7156 = vmatprep.subr.mxu0 %v7343_v38 }
0x1350   : > { %7151 = vmatprep.subr.mxu1 %v6574_v55 }
0x1351   : > { %7152 = vmatpush3.msra.mxu1 %v6574_v55 }
0x140a   : > { %v7136_v43 = vpop.f32.mrf.mxu0 }
0x140b   : > { %v7129_v21 = vpop.f32.mrf.mxu1 }
0x140c   : > { %v5086_v22 = vpop.f32.mrf.mxu0  ;;  %v5092_v24 = vadd.f32 %v7136_v43, %v7129_v21 }
0x140d   : > { %v5005_v23 = vpop.f32.mrf.mxu1 }
0x140e   : > { %v5087_v31 = vadd.f32 %v5086_v22, %v5005_v23 }
0x140f   : > { %v7143_v25 = vpop.f32.mrf.mxu1 }
0x1410   : > { %v5180_v35 = vadd.f32 %v7143_v25, %v5092_v24 }
0x1411   : > { %v5170_v36 = vpop.f32.mrf.mxu1 }
0x1412   : > { %v5190_v37 = vadd.f32 %v6569_v29, %v5180_v35  ;;  %v5179_v39 = vadd.f32 %v5170_v36, %v5087_v31  ;;  %v6589_v35 = vld [vmem:[%s8407_s14 + $0x18] sm:$0xff] }
0x1414   : > { %v5192_v15 = vmax.f32 %v5190_v37, 0.0  ;;  %v5189_v40 = vadd.f32 %v6569_v29, %v5179_v39 }
0x1416   : > { %v6571_v42 = vmul.f32 -1.442695, %v5192_v15  ;;  %v5191_v45 = vmax.f32 %v5189_v40, 0.0 }
0x1418   : > { %7317 = vpow2.f32 %v6571_v42  ;;  %v6570_v46 = vmul.f32 -1.442695, %v5191_v45 }
0x141a   : > { %7319 = vpow2.f32 %v6570_v46 }
0x1425   : > { %v7318_v47 = vpop.eup %7317 }
0x1426   : > { %v5200_v26 = vadd.f32 1.0, %v7318_v47 }
0x1427   : > { %v7320_v61 = vpop.eup %7319 }
0x1428   : > { %v5199_v27 = vadd.f32 1.0, %v7320_v61  ;;  %7321 = vrcp.f32 %v5200_v26  ;;  %v6592_v26 = vld [vmem:[%s8408_s15] ss:$0 sm:$0xff] }
0x142a   : > { %7323 = vrcp.f32 %v5199_v27 }
0x1435   : > { %v7322_v50 = vpop.eup %7321 }
0x1436   : > { %v5206_v51 = vmul.f32 %v7322_v50, %v8078_v0 }
0x1437   : > { %v7324_v32 = vpop.eup %7323 }
0x1438   : > { %v5205_v62 = vmul.f32 %v7324_v32, %v8075_v63  ;;  %v7345_v63 = vld [vmem:[%s8471_s0] sm:$0xff]  ;;  %s786_s0 = scalar_lea.vmem [#allocation3], %s785_s2 }
0x1439   : > { %7161 = vmatprep.subr.mxu1 %v7345_v63  ;;  %s6333_s7 = sshll.u32 %s786_s0, 4  ;;  %s6334_s7 = int_to_ptr.vmem [resolvable:$true] %s6333_s7 }
0x143a   : > { %7148 = vmatprep.mubr.msk.f32.mxu0 %vm921_vm1, %v5205_v62  ;;  %s7350_s12 = scalar_lea.vmem %s6334_s7, 16  ;;  %p7357_p0 = scmp.lt.s32.totalorder %s6334_s7, %s7355_s8 }
0x143b   : > { %7149 = vmatmul.mubr.msk.f32.vlgmr.msra.gmra.mxu0 %vm921_vm1, %v5206_v51  ;;  %p7351_p11 = scmp.ne.s32.totalorder %s6334_s7, %s7350_s12  ;;  %p7358_p1 = scmp.lt.s32.totalorder %s7356_s25, %s7350_s12 }
0x143c   : > { %7157 = vmatpush3.msra.mxu0 %v7343_v38 }
0x143d   : > { %7166 = vmatprep.subr.mxu0 %v7344_v54  ;;  %p7352_p12 = pnand %p7351_p11, %p7592_p5  ;;  %p7359_p2 = por %p7358_p1, %p7357_p0 }
0x143f   : > { %p7353_p13 = pneg %p7352_p12 }
0x1441   : > { %p7360_p3 = pnand %p7359_p2, %p7353_p13 }
0x14fb   : > { %v7150_v0 = vpop.f32.mrf.mxu0 }
0x14fc   : > { %v5285_v60 = vadd.f32 %v7346_v57, %v7150_v0 }
0x14fd   : > { %v5279_v56 = vpop.f32.mrf.mxu0 }
0x14fe   : > { %v5280_v59 = vadd.f32 %v7346_v57, %v5279_v56 }
0x1500   : > { %7153 = vmatprep.mubr.msk.f32.mxu1 %vm803_vm0, %v5280_v59  ;;  %7158 = vmatprep.mubr.msk.f32.mxu0 %vm803_vm0, %v5280_v59 }
0x1501   : > { %7154 = vmatmul.mubr.msk.f32.vlgmr.msra.gmra.mxu1 %vm803_vm0, %v5285_v60  ;;  %7159 = vmatmul.mubr.msk.f32.vlgmr.msra.gmra.mxu0 %vm803_vm0, %v5285_v60 }
0x1502   : > { %7162 = vmatpush3.msra.mxu1 %v7345_v63  ;;  %7163 = vmatprep.mubr.msk.f32.mxu1 %vm803_vm0, %v5280_v59 }
0x1503   : > { %7168 = vmatprep.mubr.msk.f32.mxu0 %vm803_vm0, %v5280_v59  ;;  %7167 = vmatpush3.msra.mxu0 %v7344_v54 }
0x1505   : > { %7164 = vmatmul.mubr.msk.f32.vlgmr.msra.gmra.mxu1 %vm803_vm0, %v5285_v60  ;;  %7169 = vmatmul.mubr.msk.f32.vlgmr.msra.gmra.mxu0 %vm803_vm0, %v5285_v60 }
0x15c1   : > { %v7155_v5 = vpop.f32.mrf.mxu1  ;;  %v7160_v48 = vpop.f32.mrf.mxu0 }
0x15c2   : > { %v8232_v49 = vadd.f32 %v7155_v5, %v8104_v9  ;;  %v7349_v9 = vld [vmem:[%s8406_s13] ss:$0 sm:$0xff]  ;;  %v5445_v3 = vadd.f32 %v7347_v30, %v7160_v48 }
0x15c3   : > { %v5362_v6 = vpop.f32.mrf.mxu1  ;;  %v5439_v7 = vpop.f32.mrf.mxu0 }
0x15c4   : > { %v8235_v16 = vadd.f32 %v5362_v6, %v8107_v28  ;;  %v5440_v10 = vadd.f32 %v7347_v30, %v5439_v7  ;;  %v5935_v6 = vld [vmem:[%s8411_s18 + $0x18] sm:$0xff]  ;;  %v5934_v7 = vld [vmem:[%s8411_s18 + $0x10] sm:$0xff]  ;;  %v5932_v30 = vld [vmem:[%s8411_s18] sm:$0xff] }
0x15c5   : > { %v7165_v12 = vpop.f32.mrf.mxu1  ;;  %v7170_v13 = vpop.f32.mrf.mxu0 }
0x15c6   : > { %v5520_v14 = vadd.f32 %v7348_v18, %v7165_v12  ;;  %v5595_v17 = vadd.f32 %v7349_v9, %v7170_v13  ;;  %7175 = vmatprep.mubr.msk.f32.mxu1 %vm803_vm0, %v5440_v10 }
0x15c7   : > { %v5514_v28 = vpop.f32.mrf.mxu1  ;;  %v5589_v33 = vpop.f32.mrf.mxu0 }
0x15c8   : > { %v5515_v53 = vadd.f32 %v7348_v18, %v5514_v28  ;;  %v5590_v1 = vadd.f32 %v7349_v9, %v5589_v33  ;;  %7171 = vmatprep.subr.msk.mxu1 %vm803_vm0, %v5520_v14  ;;  %7178 = vmatprep.subr.mxu0 %v5595_v17  ;;  %v8290_v33 = vld [vmem:[%s8409_s16] ss:$0 sm:$0xff] }
0x15c9   : > { %7172 = vmatpush3.xpose.msk.msra.mxu1 %vm803_vm0, %v5520_v14  ;;  %7179 = vmatpush3.msra.mxu0 %v5595_v17 }
0x15ca   : > { %7173 = vmatprep.subr.msk.mxu1 %vm803_vm0, %v5515_v53  ;;  %7180 = vmatprep.subr.mxu0 %v5590_v1 }
0x15cb   : > { %7181 = vmatpush3.msra.mxu0 %v5590_v1 }
0x15cc   : > { %7185 = vmatprep.subr.mxu0 %v6589_v35 }
0x15cd   : > { %7174 = vmatpush3.xpose.msk.msra.mxu1 %vm803_vm0, %v5515_v53 }
0x15ce   : > { %7190 = vmatprep.subr.mxu1 %v5935_v6 }
0x15d0   : > { %7176 = vmatmul.mubr.msk.f32.vlgmr.msra.gmra.mxu1 %vm803_vm0, %v5445_v3 }
0x15d1   : > { %7191 = vmatpush3.msra.mxu1 %v5935_v6 }
0x15d2   : > { %7192 = vmatprep.subr.mxu1 %v5934_v7 }
0x15d3   : > { %7193 = vmatpush3.msra.mxu1 %v5934_v7 }
0x1690   : > { %v7177_v19 = vpop.f32.mrf.mxu1 }
0x1691   : > { %v5686_v20 = vmul.f32 0.17677669, %v7177_v19  ;;  %v8296_v19 = vld [vmem:[%s8410_s17] ss:$0 sm:$0xff] }
0x1692   : > { %v5676_v2 = vpop.f32.mrf.mxu1 }
0x1693   : > { %v5685_v4 = vmul.f32 0.17677669, %v5676_v2  ;;  %v5690_v58 = vsel %vm921_vm1, %v5686_v20, -inf }
0x1694   : > { %5691 = vmax.xlane.f32.xlu1 %v5690_v58  ;;  %v6029_v58 = vld [vmem:[%s8413_s20 + $0x18] sm:$0xff] }
0x1695   : > { %v5687_v34 = vsel %vm921_vm1, %v5685_v4, -inf }
0x1696   : > { %5688 = vmax.xlane.f32.xlu0 %v5687_v34  ;;  %v6028_v34 = vld [vmem:[%s8413_s20 + $0x10] sm:$0xff] }
0x171d   : > { %v5692_v41 = vpop.xlane.xlu1 %5691 }
0x171e   : > { %v5694_v38 = vsub.f32 %v5686_v20, %v5692_v41  ;;  %v6027_v41 = vld [vmem:[%s8413_s20 + $0x8] sm:$0xff] }
0x171f   : > { %v5689_v43 = vpop.xlane.xlu0 %5688 }
0x1720   : > { %v5697_v21 = vmul.f32 1.442695, %v5694_v38  ;;  %v5693_v22 = vsub.f32 %v5685_v4, %v5689_v43  ;;  %v6026_v38 = vld [vmem:[%s8413_s20] sm:$0xff] }
0x1721   : > { %v6595_v43 = vld [vmem:[%s8412_s19] ss:$0 sm:$0xff] }
0x1722   : > { %7325 = vpow2.f32 %v5697_v21  ;;  %v5695_v23 = vmul.f32 1.442695, %v5693_v22 }
0x1724   : > { %7327 = vpow2.f32 %v5695_v23 }
0x172f   : > { %v7326_v24 = vpop.eup %7325 }
0x1730   : > { %v5702_v25 = vsel %vm921_vm1, %v7326_v24, 0.0 }
0x1731   : > { %v7328_v29 = vpop.eup %7327  ;;  %5703 = vadd.xlane.f32.xlu1 %v5702_v25 }
0x1732   : > { %v5699_v31 = vsel %vm921_vm1, %v7328_v29, 0.0 }
0x1733   : > { %5700 = vadd.xlane.f32.xlu0 %v5699_v31  ;;  %v6598_v31 = vld [vmem:[%s8414_s21] ss:$0 sm:$0xff] }
0x17ba   : > { %v5704_v36 = vpop.xlane.xlu1 %5703 }
0x17bb   : > { %7329 = vrcp.f32 %v5704_v36 }
0x17bc   : > { %v5701_v37 = vpop.xlane.xlu0 %5700 }
0x17bd   : > { %7331 = vrcp.f32 %v5701_v37 }
0x17c8   : > { %v7330_v39 = vpop.eup %7329 }
0x17c9   : > { %v5708_v42 = vmul.f32 %v7330_v39, %v7326_v24 }
0x17ca   : > { %v7332_v15 = vpop.eup %7331 }
0x17cb   : > { %v5706_v40 = vmul.f32 %v7332_v15, %v7328_v29 }
0x17cd   : > { %7182 = vmatprep.mubr.msk.f32.mxu0 %vm921_vm1, %v5706_v40 }
0x17ce   : > { %7183 = vmatmul.mubr.msk.f32.vlgmr.msra.gmra.mxu0 %vm921_vm1, %v5708_v42 }
0x17cf   : > { %7186 = vmatpush3.msra.mxu0 %v6589_v35 }
0x17d0   : > { %7201 = vmatprep.subr.mxu0 %v6029_v58 }
0x188e   : > { %v7184_v45 = vpop.f32.mrf.mxu0 }
0x1890   : > { %v5781_v46 = vpop.f32.mrf.mxu0 }
0x1891   : > { %7187 = vmatprep.mubr.msk.f32.mxu0 %vm803_vm0, %v5781_v46 }
0x1892   : > { %7188 = vmatmul.mubr.msk.f32.vlgmr.msra.gmra.mxu0 %vm803_vm0, %v7184_v45 }
0x1893   : > { %7202 = vmatpush3.msra.mxu0 %v6029_v58 }
0x1894   : > { %7203 = vmatprep.subr.mxu0 %v6028_v34 }
0x1895   : > { %7204 = vmatpush3.msra.mxu0 %v6028_v34 }
0x1896   : > { %7205 = vmatprep.subr.mxu0 %v6027_v41 }
0x1897   : > { %7206 = vmatpush3.msra.mxu0 %v6027_v41 }
0x1898   : > { %7207 = vmatprep.subr.mxu0 %v6026_v38 }
0x1899   : > { %7208 = vmatpush3.msra.mxu0 %v6026_v38 }
0x189a   : > { %7219 = vmatprep.subr.mxu0 %v7412_v52 }
0x1952   : > { %v7189_v47 = vpop.f32.mrf.mxu0 }
0x1953   : > { %v5874_v61 = vadd.f32 %v7189_v47, %v8183_v8 }
0x1954   : > { %v5864_v27 = vpop.f32.mrf.mxu0 }
0x1955   : > { %v5883_v50 = vadd.f32 %v6592_v26, %v5874_v61  ;;  %v5873_v32 = vadd.f32 %v5864_v27, %v8185_v44 }
0x1957   : > { %v5882_v62 = vadd.f32 %v6592_v26, %v5873_v32  ;;  %v5887_v51 = vadd.f32 %v5883_v50, %v8232_v49 }
0x1959   : > { %v5892_v54 = vsel %vm5888_vm13, %v5887_v51, 0.0  ;;  %v5886_v55 = vadd.f32 %v5882_v62, %v8235_v16  ;;  %v5933_v16 = vld [vmem:[%s8411_s18 + $0x8] sm:$0xff] }
0x195a   : > { %5893 = vadd.xlane.f32.xlu1 %v5892_v54  ;;  %7194 = vmatprep.subr.mxu1 %v5933_v16 }
0x195b   : > { %v5889_v63 = vsel %vm5888_vm13, %v5886_v55, 0.0  ;;  %7195 = vmatpush3.msra.mxu1 %v5933_v16 }
0x195c   : > { %5890 = vadd.xlane.f32.xlu0 %v5889_v63  ;;  %7196 = vmatprep.subr.mxu1 %v5932_v30 }
0x195d   : > { %7197 = vmatpush3.msra.mxu1 %v5932_v30 }
0x195e   : > { %7212 = vmatprep.subr.mxu1 %v7412_v52 }
0x19e3   : > { %v5894_v0 = vpop.xlane.xlu1 %5893 }
0x19e4   : > { %v5897_v56 = vmul.f32 0.03125, %v5894_v0  ;;  %v6153_v0 = vld [vmem:[#allocation2] sm:$0x1] }
0x19e5   : > { %v5891_v57 = vpop.xlane.xlu0 %5890 }
0x19e6   : > { %v5899_v8 = vsub.f32 %v5887_v51, %v5897_v56  ;;  %v5896_v59 = vmul.f32 0.03125, %v5891_v57  ;;  %v6243_v56 = vld [vmem:[%s8417_s24 + $0x8] sm:$0xff]  ;;  %v7414_v57 = vmov 0  }
0x19e7   : > { %7268 = vset.pattern.permute.xlu0 %v7414_v57 }
0x19e8   : > { %v5898_v60 = vsub.f32 %v5886_v55, %v5896_v59  ;;  %v5901_v5 = vmul.f32 %v5899_v8, %v5899_v8 }
0x19ea   : > { %v5905_v44 = vsel %vm5888_vm13, %v5901_v5, 0.0  ;;  %v5900_v48 = vmul.f32 %v5898_v60, %v5898_v60 }
0x19eb   : > { %5906 = vadd.xlane.f32.xlu1 %v5905_v44 }
0x19ec   : > { %v5902_v49 = vsel %vm5888_vm13, %v5900_v48, 0.0 }
0x19ed   : > { %5903 = vadd.xlane.f32.xlu0 %v5902_v49 }
0x1a74   : > { %v5907_v10 = vpop.xlane.xlu1 %5906 }
0x1a75   : > { %v5909_v12 = vmul.f32 0.03125, %v5907_v10 }
0x1a76   : > { %v5904_v13 = vpop.xlane.xlu0 %5903 }
0x1a77   : > { %v5911_v18 = vadd.f32 1e-05, %v5909_v12  ;;  %v5908_v14 = vmul.f32 0.03125, %v5904_v13 }
0x1a79   : > { %7333 = vrsqrt.f32 %v5911_v18  ;;  %v5910_v9 = vadd.f32 1e-05, %v5908_v14  ;;  %v6152_v18 = vld [vmem:[%s8415_s22] sm:$0x1] }
0x1a7a   : > { %v6242_v14 = vld [vmem:[%s8417_s24] sm:$0xff] }
0x1a7b   : > { %7335 = vrsqrt.f32 %v5910_v9  ;;  %v6161_v9 = vsub.s32 0, %v7629_v11 }
0x1a86   : > { %v7334_v17 = vpop.eup %7333 }
0x1a87   : > { %v5915_v28 = vmul.f32 %v7334_v17, %v5899_v8 }
0x1a88   : > { %v7336_v53 = vpop.eup %7335 }
0x1a89   : > { %v5914_v1 = vmul.f32 %v7336_v53, %v5898_v60  ;;  %v5923_v3 = vmul.f32 %v8290_v33, %v5915_v28 }
0x1a8b   : > { %v5922_v20 = vmul.f32 %v8290_v33, %v5914_v1  ;;  %v5931_v4 = vadd.f32 %v8296_v19, %v5923_v3  ;;  %v6244_v1 = vld [vmem:[%s8482_s5] sm:$0x1] }
0x1a8d   : > { %v5930_v2 = vadd.f32 %v8296_v19, %v5922_v20 }
0x1a8f   : > { %7198 = vmatprep.mubr.msk.f32.mxu1 %vm5888_vm13, %v5930_v2 }
0x1a90   : > { %7199 = vmatmul.mubr.msk.f32.vlgmr.msra.gmra.mxu1 %vm5888_vm13, %v5931_v4 }
0x1a91   : > { %7216 = vmatprep.mubr.msk.f32.mxu1 %vm7413_vm14, %v7412_v52 }
0x1b50   : > { %v7200_v21 = vpop.f32.mrf.mxu1 }
0x1b51   : > { %v6021_v22 = vadd.f32 %v7200_v21, %v6595_v43 }
0x1b52   : > { %v6015_v23 = vpop.f32.mrf.mxu1 }
0x1b53   : > { %v6016_v24 = vadd.f32 %v6595_v43, %v6015_v23  ;;  %v6025_v29 = vmax.f32 %v6021_v22, 0.0 }
0x1b55   : > { %v6024_v25 = vmax.f32 %v6016_v24, 0.0 }
0x1b57   : > { %7209 = vmatprep.mubr.msk.f32.mxu0 %vm5888_vm13, %v6024_v25 }
0x1b58   : > { %7210 = vmatmul.mubr.msk.f32.vlgmr.msra.gmra.mxu0 %vm5888_vm13, %v6025_v29 }
0x1b59   : > { %7223 = vmatprep.mubr.msk.f32.mxu0 %vm7413_vm14, %v7412_v52  ;;  %7220 = vmatpush3.msra.mxu0 %v6243_v56 }
0x1b5a   : > { %7221 = vmatprep.subr.mxu0 %v7412_v52 }
0x1b5b   : > { %7222 = vmatpush3.msra.mxu0 %v6242_v14 }
0x1c18   : > { %v7211_v35 = vpop.f32.mrf.mxu0 }
0x1c19   : > { %v6115_v36 = vadd.f32 %v7211_v35, %v6598_v31 }
0x1c1a   : > { %v6109_v37 = vpop.f32.mrf.mxu0 }
0x1c1b   : > { %v6119_v39 = vmax.f32 %v6115_v36, 0.0  ;;  %v6110_v15 = vadd.f32 %v6598_v31, %v6109_v37 }
0x1c1d   : > { %v6118_v40 = vmax.f32 %v6110_v15, 0.0  ;;  %v6121_v42 = vadd.f32 %v6119_v39, %v5931_v4 }
0x1c1f   : > { %v6125_v45 = vsel %vm5888_vm13, %v6121_v42, 0.0  ;;  %v6120_v46 = vadd.f32 %v6118_v40, %v5930_v2 }
0x1c20   : > { %6126 = vadd.xlane.f32.xlu0 %v6125_v45 }
0x1c21   : > { %v6122_v47 = vsel %vm5888_vm13, %v6120_v46, 0.0 }
0x1c22   : > { %6123 = vadd.xlane.f32.xlu1 %v6122_v47 }
0x1ca9   : > { %v6127_v26 = vpop.xlane.xlu0 %6126 }
0x1caa   : > { %v6129_v61 = vmul.f32 0.03125, %v6127_v26 }
0x1cab   : > { %v6124_v27 = vpop.xlane.xlu1 %6123 }
0x1cac   : > { %v6131_v50 = vsub.f32 %v6121_v42, %v6129_v61  ;;  %v6128_v32 = vmul.f32 0.03125, %v6124_v27 }
0x1cae   : > { %v6130_v62 = vsub.f32 %v6120_v46, %v6128_v32  ;;  %v6133_v51 = vmul.f32 %v6131_v50, %v6131_v50 }
0x1cb0   : > { %v6137_v54 = vsel %vm5888_vm13, %v6133_v51, 0.0  ;;  %v6132_v55 = vmul.f32 %v6130_v62, %v6130_v62 }
0x1cb1   : > { %6138 = vadd.xlane.f32.xlu0 %v6137_v54 }
0x1cb2   : > { %v6134_v63 = vsel %vm5888_vm13, %v6132_v55, 0.0 }
0x1cb3   : > { %6135 = vadd.xlane.f32.xlu1 %v6134_v63 }
0x1cc7   : > { %6156 = vperm.xlu0 %7268, %v6153_v0  }
0x1d3a   : > { %v6139_v8 = vpop.xlane.xlu0 %6138 }
0x1d3b   : > { %v6141_v59 = vmul.f32 0.03125, %v6139_v8 }
0x1d3c   : > { %v6136_v60 = vpop.xlane.xlu1 %6135 }
0x1d3d   : > { %v6143_v5 = vadd.f32 1e-05, %v6141_v59  ;;  %v6140_v44 = vmul.f32 0.03125, %v6136_v60 }
0x1d3f   : > { %7337 = vrsqrt.f32 %v6143_v5  ;;  %v6142_v48 = vadd.f32 1e-05, %v6140_v44 }
0x1d41   : > { %7339 = vrsqrt.f32 %v6142_v48 }
0x1d42   : > { %v6157_v17 = vpop.permute.xlu0 %6156 }
0x1d4c   : > { %v7338_v49 = vpop.eup %7337 }
0x1d4d   : > { %v6147_v6 = vmul.f32 %v7338_v49, %v6131_v50 }
0x1d4e   : > { %v7340_v7 = vpop.eup %7339 }
0x1d4f   : > { %v6146_v16 = vmul.f32 %v7340_v7, %v6130_v62  ;;  %v6149_v30 = vmul.f32 %v8290_v33, %v6147_v6 }
0x1d51   : > { %v6151_v10 = vadd.f32 %v8296_v19, %v6149_v30  ;;  %v6148_v12 = vmul.f32 %v8290_v33, %v6146_v16 }
0x1d53   : > { %7213 = vmatpush3.xpose.msk.msra.mxu1 %vm5888_vm13, %v6151_v10  ;;  %v6150_v13 = vadd.f32 %v8296_v19, %v6148_v12 }
0x1d54   : > { %7214 = vmatprep.subr.mxu1 %v7412_v52  ;;  %v6162_v52 = vrot.slane %v6157_v17, %v6161_v9 }
0x1d57   : > { %7215 = vmatpush3.xpose.msk.msra.mxu1 %vm5888_vm13, %v6150_v13 }
0x1d5a   : > { %7217 = vmatmul.mubr.msk.f32.vlgmr.msra.gmra.mxu1 %vm5888_vm13, %v6152_v18 }
0x1e1a   : > { %v6238_v28 = vpop.f32.mrf.mxu1 }
0x1e1b   : > { %v6239_v33 = vadd.f32 %v6238_v28, %v6162_v52 }
0x1e1c   : > { %v7218_v53 = vpop.f32.mrf.mxu1 }
0x1e1d   : > { %7224 = vmatmul.mubr.msk.f32.vlgmr.msra.gmra.mxu0 %vm921_vm1, %v6239_v33 }
0x1edd   : > { %v6314_v3 = vpop.f32.mrf.mxu0 }
0x1ede   : > { %v6315_v19 = vadd.f32 %v6314_v3, %v6244_v1 }
0x1edf   : > { %v7225_v11 = vpop.f32.mrf.mxu0 }
0x1ee0   : > { %6319 = vst.msk [vmem:[%s786_s0] sm:$0x1] %vm6318_vm15, %v6315_v19 }
0x1ee1   : > { %7363 = shalt.err (!%p7360_p3)
}
0x1ee2   : > { %s7364_s0 = scalar_lea.hbm %s8358_s9, 16  ;;  %s7368_s5 = scalar_lea.hbm %s8483_s6, 32 }
0x1ee3   : > { %p7365_p4 = scmp.ne.s32.totalorder %s8358_s9, %s7364_s0  ;;  %p7369_p9 = scmp.lt.s32.totalorder %s8358_s9, %s8483_s6 }
0x1ee4   : > { %p7370_p10 = scmp.lt.s32.totalorder %s7368_s5, %s7364_s0 }
0x1ee5   : > { %p7366_p7 = pnand %p7365_p4, %p7592_p5 }
0x1ee6   : > { %p7371_p11 = por %p7370_p10, %p7369_p9 }
0x1ee7   : > { %p7367_p8 = pneg %p7366_p7 }
0x1ee9   : > { %p7372_p12 = pnand %p7371_p11, %p7367_p8 }
0x1eeb   : > { %7375 = shalt.err (!%p7372_p12)
}
0x1eec   : > { %7226 = dma.vmem_to_hbm [thread:$0]  (%p7592_p5), %s6334_s7, 16, %s8358_s9, %s6321_s11  }
0x1eed PF: > { %s8484_s12 = sld [smem:[#allocation8_spill]] }
0x1eee   : > { %s8485_s23 = sld [smem:[#allocation6_spill]] }
0x1ef3   : > { %p7232_p13 = scmp.ge.s32.totalorder %s8484_s12, 2 }
0x1ef4   : > { %s6345_s25 = sand.u32 1, %s8485_s23  }
0x1ef5   : > { %p7229_p0 = pnand %p7232_p13, %p7596_p6  ;;  %s6346_s3 = scalar_lea.sflag [#allocation4], %s6345_s25 }
0x1ef7   : > { %p7230_p1 = pneg %p7229_p0 }
0x1ef9   : > { %7393 = dma.done.wait (%p7230_p1), %s6346_s3, 16  }
0x1efa   : > { %7395 = vsyncadd (%p7230_p1), %s6346_s3, 4294967280  ;;  %s8487_s4 = sld [smem:[#allocation9_spill]]  ;;  %s8490_s7 = smov %s7402_s28 }
0x1efb   : > { %s8488_s0 = sld [smem:[#allocation7_spill]] }
0x1efc   : > { %s8489_s8 = sld [smem:[#allocation10_spill]] }
0x1f00   : > { %p38_p2 = scmp.ge.s32.totalorder %s8487_s4, 4  }
0x1f01   : > { %s8491_s28 = smov %s8488_s0 }
0x1f02   :  { %40 = sbr.rel (!%p38_p2) target bundleno = 19 (0x13), region = 195 }
0x1f07   :  { %6350 = vsyncpa [#allocation4], 1 }
0x1f08   :  { %6352 = vsyncpa [#allocation4 + $0x1], 1 }

</bundles_post_ra>
